<compile_context>
chip_gen: v6e
topology: v6e:2x2x1
jax: 0.10.0
libtpu: 0.0.40
codegen_flags: <defaults>
</compile_context>

<pallas_src>
import functools

import jax
import jax.numpy as jnp
from jax.experimental import pallas as pl
from jax.experimental.pallas import tpu as pltpu

SMEM = pltpu.MemorySpace.SMEM


def _detect_vmem_limit():
    # Generous on v5e/v6e (128 MiB physical VMEM), capped ~48 MiB on v7x
    # (64 MiB per TensorCore).
    cap = 128 * 1024 * 1024
    try:
        info = pltpu.get_tpu_info()
        cap = int(getattr(info, "vmem_capacity_bytes", cap))
    except Exception:  # pragma: no cover - CPU / interpret fallback
        pass
    return int(min(64 * 1024 * 1024, (cap * 3) // 4))


_VMEM_LIMIT = _detect_vmem_limit()


def _round_up(n, m):
    return ((n + m - 1) // m) * m


def _pad_rows(x, rows):
    pad = rows - x.shape[0]
    if pad == 0:
        return x
    return jnp.pad(x, ((0, pad), (0, 0)))


# ----------------------------- flow kernels --------------------------------

def _flow_body(ers_ref, x_ref, feat_refs, w1_refs, b1_ref, w2s_ref, b2s_ref,
               w2t_ref, b2t_ref, lat_ref, lj_ref, num_layers):
    """One stacked ST_Net_Exp coupling flow (flow_forward) on a row tile.

    The conditioning MLP is hoisted out of the layer loop: a single matmul
    against the lane-concatenated first-layer weight gives every layer's
    hidden activation; per-layer s/t use zero-K-padded second-layer weights
    (no serial matmul->matmul dependence, no unaligned lane slices).  Several
    conditioning feature parts are supported via per-part dots (replaces a
    JAX-side lane concat)."""
    x = x_ref[...].astype(jnp.float32)
    pre = b1_ref[...]                                   # (1, L*hid) f32
    for f_ref, w_ref in zip(feat_refs, w1_refs):
        pre = pre + jnp.dot(f_ref[...], w_ref[...],
                            preferred_element_type=jnp.float32)
    h = jnp.tanh(pre).astype(jnp.bfloat16)              # (tm, L*hid)
    log_jacob = jnp.zeros_like(x)
    for i in range(num_layers):
        s_raw = jnp.dot(h, w2s_ref[i],
                        preferred_element_type=jnp.float32) + b2s_ref[i]
        t = jnp.dot(h, w2t_ref[i],
                    preferred_element_type=jnp.float32) + b2t_ref[i]
        # s = exp( exp(rescale_i) * tanh(s_raw) ); exp(rescale) read from SMEM
        s = jnp.exp(ers_ref[i] * jnp.tanh(s_raw))
        x = (x + t) * s
        log_jacob = log_jacob + jnp.log(s + 1e-20)      # matches reference guard
    lat_ref[...] = x
    lj_ref[...] = log_jacob


def _single_flow_kernel(*refs, num_parts, num_layers):
    ers = refs[0]
    x = refs[1]
    feats = list(refs[2:2 + num_parts])
    w1s = list(refs[2 + num_parts:2 + 2 * num_parts])
    b1, w2s, b2s, w2t, b2t = refs[2 + 2 * num_parts:7 + 2 * num_parts]
    lat, lj = refs[7 + 2 * num_parts:9 + 2 * num_parts]
    _flow_body(ers, x, feats, w1s, b1, w2s, b2s, w2t, b2t, lat, lj, num_layers)


def _dual_flow_kernel(*refs, num_layers):
    """node_flow + dist_flow fused (both condition on per-graph features)."""
    a = refs[:9]
    b = refs[9:18]
    outs = refs[18:22]
    _flow_body(a[0], a[1], [a[2]], [a[3]], a[4], a[5], a[6], a[7], a[8],
               outs[0], outs[1], num_layers)
    _flow_body(b[0], b[1], [b[2]], [b[3]], b[4], b[5], b[6], b[7], b[8],
               outs[2], outs[3], num_layers)


def _prep_flow_params(flow_params):
    """Rearrange stacked ST_Net_Exp params into the hoisted-MLP kernel form."""
    w1, b1, w2, b2, rs = flow_params
    L, f, hdim = w1.shape
    d = w2.shape[-1] // 2
    # lane-concatenated first-layer weight / bias: column block i == layer i
    w1cat = jnp.transpose(w1, (1, 0, 2)).reshape(f, L * hdim)
    b1cat = jnp.transpose(b1, (1, 0, 2)).reshape(1, L * hdim)
    # zero-K-padded per-layer second-layer weights over the concatenated
    # hidden axis: s_raw_i = h_all @ w2s[i] == h_i @ w2[i][:, :d]
    eye = jnp.eye(L, dtype=w2.dtype)

    def blockpad(w):  # (L, hid, d) -> (L, L*hid, d)
        return (eye[:, :, None, None] * w[:, None, :, :]).reshape(
            L, L * hdim, d)

    w2s = blockpad(w2[:, :, :d])
    w2t = blockpad(w2[:, :, d:])
    b2s = b2[:, :, :d]
    b2t = b2[:, :, d:]
    ers = jnp.exp(rs.astype(jnp.float32))                     # (L,) -> SMEM
    return dict(w1cat=w1cat, b1cat=b1cat, w2s=w2s, b2s=b2s, w2t=w2t, b2t=b2t,
                ers=ers, L=L, LH=L * hdim, d=d)


def _flow_call_pack(pp, x_p, feat_list, tm):
    """Flattened (args, in_specs) for one flow inside a pallas_call."""
    sizes = [fp.shape[1] for fp in feat_list]
    offs = [0]
    for s in sizes:
        offs.append(offs[-1] + s)
    # split the concatenated first-layer weight rows per feature part so the
    # kernel never concatenates along lanes (trace-time static slices)
    w1_parts = [pp["w1cat"][offs[j]:offs[j + 1]] for j in range(len(sizes))]
    args = ([pp["ers"], x_p] + list(feat_list) + w1_parts
            + [pp["b1cat"], pp["w2s"], pp["b2s"], pp["w2t"], pp["b2t"]])
    d, L, LH = pp["d"], pp["L"], pp["LH"]
    specs = ([pl.BlockSpec(memory_space=SMEM)]                       # ers
             + [pl.BlockSpec((tm, d), lambda i: (i, 0))]             # x
             + [pl.BlockSpec((tm, s), lambda i: (i, 0)) for s in sizes]
             + [pl.BlockSpec((s, LH), lambda i: (0, 0)) for s in sizes]
             + [pl.BlockSpec((1, LH), lambda i: (0, 0)),             # b1
                pl.BlockSpec((L, LH, d), lambda i: (0, 0, 0)),       # w2s
                pl.BlockSpec((L, 1, d), lambda i: (0, 0, 0)),        # b2s
                pl.BlockSpec((L, LH, d), lambda i: (0, 0, 0)),       # w2t
                pl.BlockSpec((L, 1, d), lambda i: (0, 0, 0))])       # b2t
    return args, specs


def flow_forward_pallas(x, feat_parts, flow_params, *, tm=1024):
    """flow_forward of one ST_Net_Exp stack; feat_parts is a list of (G, f_p)
    conditioning features (multiple parts avoid a JAX-side lane concat)."""
    pp = _prep_flow_params(flow_params)
    n, d = x.shape
    rows = _round_up(max(n, 8), 8)
    tm = min(tm, rows)
    grid = (pl.cdiv(rows, tm),)
    x_p = _pad_rows(x.astype(jnp.float32), rows)
    feats_p = [_pad_rows(fp.astype(jnp.bfloat16), rows) for fp in feat_parts]
    args, in_specs = _flow_call_pack(pp, x_p, feats_p, tm)
    kernel = functools.partial(_single_flow_kernel,
                               num_parts=len(feat_parts), num_layers=pp["L"])
    lat, lj = pl.pallas_call(
        kernel,
        grid=grid,
        out_shape=[jax.ShapeDtypeStruct((rows, d), jnp.float32)] * 2,
        in_specs=in_specs,
        out_specs=[pl.BlockSpec((tm, d), lambda i: (i, 0))] * 2,
        compiler_params=pltpu.CompilerParams(
            dimension_semantics=("parallel",),
            vmem_limit_bytes=_VMEM_LIMIT),
    )(*args)
    return lat[:n], lj[:n]


def node_dist_flow_pallas(x_node, feat_node, node_params,
                          x_dist, feat_dist, dist_params, *, tm=1024):
    """node_flow + dist_flow in ONE pallas_call (independent, same rows)."""
    ppn = _prep_flow_params(node_params)
    ppd = _prep_flow_params(dist_params)
    n = x_node.shape[0]
    dn, dd = x_node.shape[1], x_dist.shape[1]
    rows = _round_up(max(n, 8), 8)
    tm = min(tm, rows)
    grid = (pl.cdiv(rows, tm),)
    xn_p = _pad_rows(x_node.astype(jnp.float32), rows)
    xd_p = _pad_rows(x_dist.astype(jnp.float32), rows)
    fn_p = _pad_rows(feat_node.astype(jnp.bfloat16), rows)
    fd_p = _pad_rows(feat_dist.astype(jnp.bfloat16), rows)
    args_n, specs_n = _flow_call_pack(ppn, xn_p, [fn_p], tm)
    args_d, specs_d = _flow_call_pack(ppd, xd_p, [fd_p], tm)
    kernel = functools.partial(_dual_flow_kernel, num_layers=ppn["L"])
    node_lat, node_lj, dist_lat, dist_lj = pl.pallas_call(
        kernel,
        grid=grid,
        out_shape=[jax.ShapeDtypeStruct((rows, dn), jnp.float32),
                   jax.ShapeDtypeStruct((rows, dn), jnp.float32),
                   jax.ShapeDtypeStruct((rows, dd), jnp.float32),
                   jax.ShapeDtypeStruct((rows, dd), jnp.float32)],
        in_specs=specs_n + specs_d,
        out_specs=[pl.BlockSpec((tm, dn), lambda i: (i, 0)),
                   pl.BlockSpec((tm, dn), lambda i: (i, 0)),
                   pl.BlockSpec((tm, dd), lambda i: (i, 0)),
                   pl.BlockSpec((tm, dd), lambda i: (i, 0))],
        compiler_params=pltpu.CompilerParams(
            dimension_semantics=("parallel",),
            vmem_limit_bytes=_VMEM_LIMIT),
    )(*(args_n + args_d))
    return node_lat[:n], node_lj[:n], dist_lat[:n], dist_lj[:n]


# ------------------------- focus / contact kernel --------------------------

def _focus_contact_kernel(xa_ref, w1a_ref, b1a_ref, w2a_ref, b2a_ref,
                          xb_ref, w1b_ref, b1b_ref, w2b_ref, b2b_ref,
                          oa_ref, ob_ref):
    """focus_mlp + contact_mlp + exact sigmoid, one launch."""
    def head(x_ref, w1_ref, b1_ref, w2_ref, b2_ref, o_ref):
        h = jnp.maximum(jnp.dot(x_ref[...], w1_ref[...],
                                preferred_element_type=jnp.float32)
                        + b1_ref[...], 0.0)
        y = jnp.dot(h.astype(jnp.bfloat16), w2_ref[...],
                    preferred_element_type=jnp.float32) + b2_ref[...]
        # exact sigmoid: feeds the BCE loss path (perf-review correctness fix)
        o_ref[...] = 1.0 / (1.0 + jnp.exp(-y))

    head(xa_ref, w1a_ref, b1a_ref, w2a_ref, b2a_ref, oa_ref)
    head(xb_ref, w1b_ref, b1b_ref, w2b_ref, b2b_ref, ob_ref)


def focus_contact_pallas(x_focus, x_contact, focus_params, contact_params, *,
                         tm=1024):
    w1a, b1a, w2a, b2a = focus_params
    w1b, b1b, w2b, b2b = contact_params
    ka, kb = x_focus.shape[0], x_contact.shape[0]
    fa, fb = x_focus.shape[1], x_contact.shape[1]
    ha, hb = w1a.shape[1], w1b.shape[1]
    rows = _round_up(max(ka, kb, 8), 8)
    tm = min(tm, rows)
    grid = (pl.cdiv(rows, tm),)
    xa = _pad_rows(x_focus.astype(jnp.bfloat16), rows)
    xb = _pad_rows(x_contact.astype(jnp.bfloat16), rows)
    oa, ob = pl.pallas_call(
        _focus_contact_kernel,
        grid=grid,
        out_shape=[jax.ShapeDtypeStruct((rows, 1), jnp.float32),
                   jax.ShapeDtypeStruct((rows, 1), jnp.float32)],
        in_specs=[
            pl.BlockSpec((tm, fa), lambda i: (i, 0)),
            pl.BlockSpec((fa, ha), lambda i: (0, 0)),
            pl.BlockSpec((1, ha), lambda i: (0, 0)),
            pl.BlockSpec((ha, 1), lambda i: (0, 0)),
            pl.BlockSpec((1, 1), lambda i: (0, 0)),
            pl.BlockSpec((tm, fb), lambda i: (i, 0)),
            pl.BlockSpec((fb, hb), lambda i: (0, 0)),
            pl.BlockSpec((1, hb), lambda i: (0, 0)),
            pl.BlockSpec((hb, 1), lambda i: (0, 0)),
            pl.BlockSpec((1, 1), lambda i: (0, 0)),
        ],
        out_specs=[pl.BlockSpec((tm, 1), lambda i: (i, 0))] * 2,
        compiler_params=pltpu.CompilerParams(
            dimension_semantics=("parallel",),
            vmem_limit_bytes=_VMEM_LIMIT),
    )(xa, w1a.astype(jnp.bfloat16), b1a.astype(jnp.float32),
      w2a.astype(jnp.bfloat16), b2a.astype(jnp.float32),
      xb, w1b.astype(jnp.bfloat16), b1b.astype(jnp.float32),
      w2b.astype(jnp.bfloat16), b2b.astype(jnp.float32))
    return oa[:ka, 0], ob[:kb, 0]


# ------------------------ head-mul kernels (fused basis) --------------------

def _dist_head_mul_kernel(d_ref, emb_ref, mu_ref, w1_ref, b1_ref, w2_ref,
                          b2_ref, o_ref, *, gamma):
    """node_emb * dist_head(RBF(d)) fused; the radial basis is computed
    in-kernel (exp on the EUP slot, no HBM round trip for the basis)."""
    d = d_ref[...]                                          # (tm, 1)
    rbf = jnp.exp(-gamma * (d - mu_ref[...]) ** 2).astype(jnp.bfloat16)
    h = jnp.maximum(jnp.dot(rbf, w1_ref[...],
                            preferred_element_type=jnp.float32)
                    + b1_ref[...], 0.0)
    y = jnp.dot(h.astype(jnp.bfloat16), w2_ref[...],
                preferred_element_type=jnp.float32) + b2_ref[...]
    o_ref[...] = emb_ref[...] * y


def _angle_head_mul_kernel(d_ref, a_ref, emb_ref, mu_ref, w1_ref, b1_ref,
                           w2_ref, b2_ref, o_ref, *, gamma, num_spherical):
    """node_emb * angle_head(angle_basis(d, a)) fused.  The outer-product
    basis never materializes: basis[:, s*R:(s+1)*R] = cos(s*a) * rbf, so its
    contribution to the first linear layer factors as cos(s*a)*(rbf @ w1[s])."""
    d = d_ref[...]                                          # (tm, 1)
    a = a_ref[...]                                          # (tm, 1)
    rbf = jnp.exp(-gamma * (d - mu_ref[...]) ** 2).astype(jnp.bfloat16)
    pre = b1_ref[...]                                       # (1, hidden)
    for s in range(num_spherical):
        proj = jnp.dot(rbf, w1_ref[s], preferred_element_type=jnp.float32)
        pre = pre + jnp.cos(float(s) * a) * proj
    h = jnp.maximum(pre, 0.0).astype(jnp.bfloat16)
    y = jnp.dot(h, w2_ref[...],
                preferred_element_type=jnp.float32) + b2_ref[...]
    o_ref[...] = emb_ref[...] * y


def dist_head_mul_pallas(dist_per_node, node_emb, mlp_params, *,
                         num_radial, cutoff=10.0, tm=1024):
    w1, b1, w2, b2 = mlp_params
    n, emb = node_emb.shape
    hidden = w1.shape[1]
    rows = _round_up(max(n, 8), 8)
    tm = min(tm, rows)
    grid = (pl.cdiv(rows, tm),)
    mu = jnp.linspace(0.0, cutoff, num_radial,
                      dtype=jnp.float32).reshape(1, num_radial)
    d_p = _pad_rows(dist_per_node.astype(jnp.float32), rows)
    emb_p = _pad_rows(node_emb.astype(jnp.float32), rows)
    out = pl.pallas_call(
        functools.partial(_dist_head_mul_kernel, gamma=10.0 / cutoff),
        grid=grid,
        out_shape=jax.ShapeDtypeStruct((rows, emb), jnp.float32),
        in_specs=[pl.BlockSpec((tm, 1), lambda i: (i, 0)),
                  pl.BlockSpec((tm, emb), lambda i: (i, 0)),
                  pl.BlockSpec((1, num_radial), lambda i: (0, 0)),
                  pl.BlockSpec((num_radial, hidden), lambda i: (0, 0)),
                  pl.BlockSpec((1, hidden), lambda i: (0, 0)),
                  pl.BlockSpec((hidden, emb), lambda i: (0, 0)),
                  pl.BlockSpec((1, emb), lambda i: (0, 0))],
        out_specs=pl.BlockSpec((tm, emb), lambda i: (i, 0)),
        compiler_params=pltpu.CompilerParams(
            dimension_semantics=("parallel",),
            vmem_limit_bytes=_VMEM_LIMIT),
    )(d_p, emb_p, mu, w1.astype(jnp.bfloat16), b1.astype(jnp.float32),
      w2.astype(jnp.bfloat16), b2.astype(jnp.float32))
    return out[:n]


def angle_head_mul_pallas(dist_per_node, angle_per_node, node_emb, mlp_params,
                          *, num_radial, num_spherical, cutoff=10.0, tm=1024):
    w1, b1, w2, b2 = mlp_params                      # w1: (S*R, hidden)
    n, emb = node_emb.shape
    hidden = w1.shape[1]
    rows = _round_up(max(n, 8), 8)
    tm = min(tm, rows)
    grid = (pl.cdiv(rows, tm),)
    mu = jnp.linspace(0.0, cutoff, num_radial,
                      dtype=jnp.float32).reshape(1, num_radial)
    w1_3d = w1.reshape(num_spherical, num_radial, hidden)
    d_p = _pad_rows(dist_per_node.astype(jnp.float32), rows)
    a_p = _pad_rows(angle_per_node.astype(jnp.float32), rows)
    emb_p = _pad_rows(node_emb.astype(jnp.float32), rows)
    out = pl.pallas_call(
        functools.partial(_angle_head_mul_kernel, gamma=10.0 / cutoff,
                          num_spherical=num_spherical),
        grid=grid,
        out_shape=jax.ShapeDtypeStruct((rows, emb), jnp.float32),
        in_specs=[pl.BlockSpec((tm, 1), lambda i: (i, 0)),
                  pl.BlockSpec((tm, 1), lambda i: (i, 0)),
                  pl.BlockSpec((tm, emb), lambda i: (i, 0)),
                  pl.BlockSpec((1, num_radial), lambda i: (0, 0)),
                  pl.BlockSpec((num_spherical, num_radial, hidden),
                               lambda i: (0, 0, 0)),
                  pl.BlockSpec((1, hidden), lambda i: (0, 0)),
                  pl.BlockSpec((hidden, emb), lambda i: (0, 0)),
                  pl.BlockSpec((1, emb), lambda i: (0, 0))],
        out_specs=pl.BlockSpec((tm, emb), lambda i: (i, 0)),
        compiler_params=pltpu.CompilerParams(
            dimension_semantics=("parallel",),
            vmem_limit_bytes=_VMEM_LIMIT),
    )(d_p, a_p, emb_p, mu, w1_3d.astype(jnp.bfloat16),
      b1.astype(jnp.float32), w2.astype(jnp.bfloat16), b2.astype(jnp.float32))
    return out[:n]


# ----------------------------- parameter init -------------------------------

def _xavier_uniform(key, shape):
    fan_in, fan_out = shape
    b = (6.0 / (fan_in + fan_out)) ** 0.5
    return jax.random.uniform(key, shape, jnp.float32, -b, b)


def init_st_net_stack(key, num_layers, in_dim, hid_dim, out_dim):
    """Matches ST_Net_Exp.reset_parameters: xavier linear1, 1e-10 linear2,
    zero biases, zero rescale weight.  Weights stored in bf16 (f32 accum)."""
    keys = jax.random.split(key, num_layers)
    w1 = jnp.stack([_xavier_uniform(k, (in_dim, hid_dim)) for k in keys]
                   ).astype(jnp.bfloat16)
    b1 = jnp.zeros((num_layers, 1, hid_dim), jnp.float32)
    w2 = jnp.full((num_layers, hid_dim, 2 * out_dim), 1e-10, jnp.bfloat16)
    b2 = jnp.zeros((num_layers, 1, 2 * out_dim), jnp.float32)
    rs = jnp.zeros((num_layers,), jnp.float32)
    return (w1, b1, w2, b2, rs)


def init_mlp(key, in_dim, hid_dim, out_dim):
    k1, k2 = jax.random.split(key)
    w1 = _xavier_uniform(k1, (in_dim, hid_dim)).astype(jnp.bfloat16)
    b1 = jnp.zeros((1, hid_dim), jnp.float32)
    w2 = _xavier_uniform(k2, (hid_dim, out_dim)).astype(jnp.bfloat16)
    b2 = jnp.zeros((1, out_dim), jnp.float32)
    return (w1, b1, w2, b2)


# ------------------------------- GraphBP fwd --------------------------------

def bce_loss(p, y):
    p = jnp.clip(p, 1e-12, 1.0 - 1e-12)
    return -jnp.mean(y * jnp.log(p) + (1.0 - y) * jnp.log(1.0 - p))


def graphbp_forward(params, data, key, *, cfg):
    num_classes = cfg["num_classes"]
    z, batch = data["atom_type"], data["batch"]

    # TODO(synk): full SchNet message passing (context_embedder) is not
    # reproducible from the given source; approximated by its atom-type
    # embedding table lookup.
    node_feat = params["embedding"][z]                                 # (N, emb)

    # Fixed-size integer index sets replace the boolean masks gen_flag /
    # contact_y_or_n so the whole forward is jit-able (static shapes).
    focus_score, contact_score = focus_contact_pallas(
        node_feat[data["gen_index"]], node_feat[data["contact_index"]],
        params["focus_mlp"], params["contact_mlp"])

    new_atom_type, focus = data["new_atom_type"], data["focus"]
    x_z = jax.nn.one_hot(new_atom_type, num_classes, dtype=jnp.float32)
    x_z = x_z + cfg["deq_coeff"] * jax.random.uniform(key, x_z.shape)

    node_type_emb = params["embedding"][new_atom_type]                 # (G, emb)
    node_emb = node_feat * node_type_emb[batch]

    dist = data["new_dist"]
    angle = data["new_angle"]
    torsion = data["new_torsion"]

    # node_flow + dist_flow fused in one launch (independent, same rows).
    node_latent, node_log_jacob, dist_latent, dist_log_jacob = \
        node_dist_flow_pallas(x_z, node_feat[focus], params["node_flow"],
                              dist, node_emb[focus], params["dist_flow"])

    # TODO(synk): stand-in Gaussian radial / cos(k*angle) x RBF bases for the
    # original dist_emb / angle_emb (Bessel / spherical bases not provided);
    # computed inside the head-mul kernels.
    dist_per_node = dist[:, 0][batch][:, None]                          # (N, 1)
    node_emb = dist_head_mul_pallas(dist_per_node, node_emb,
                                    params["dist_head"],
                                    num_radial=cfg["num_radial"])

    c1_focus, c2_c1_focus = data["c1_focus"], data["c2_c1_focus"]
    angle_latent, angle_log_jacob = flow_forward_pallas(
        angle,
        [node_emb[c1_focus[:, 1]], node_emb[c1_focus[:, 0]]],
        params["angle_flow"])

    angle_per_node = angle[:, 0][batch][:, None]                        # (N, 1)
    node_emb = angle_head_mul_pallas(dist_per_node, angle_per_node, node_emb,
                                     params["angle_head"],
                                     num_radial=cfg["num_radial"],
                                     num_spherical=cfg["num_spherical"])

    torsion_latent, torsion_log_jacob = flow_forward_pallas(
        torsion,
        [node_emb[c2_c1_focus[:, 2]], node_emb[c2_c1_focus[:, 1]],
         node_emb[c2_c1_focus[:, 0]]],
        params["torsion_flow"])

    cannot_focus = data["cannot_focus"]
    cannot_contact = data["cannot_contact"]

    ll_node = jnp.mean(0.5 * node_latent ** 2 - node_log_jacob)
    ll_dist = jnp.mean(0.5 * dist_latent ** 2 - dist_log_jacob)
    ll_angle = jnp.mean(0.5 * angle_latent ** 2 - angle_log_jacob)
    ll_torsion = jnp.mean(0.5 * torsion_latent ** 2 - torsion_log_jacob)
    focus_ce = bce_loss(focus_score, cannot_focus)
    contact_ce = bce_loss(contact_score, cannot_contact)

    loss_dict = {"node": ll_node, "dist": ll_dist, "angle": ll_angle,
                 "torsion": ll_torsion, "focus": focus_ce,
                 "contact": contact_ce}
    loss_info = {"node_latent": node_latent, "node_log_jacob": node_log_jacob,
                 "dist_lantent": dist_latent, "dist_log_jacob": dist_log_jacob,
                 "angle_latent": angle_latent,
                 "angle_log_jacob": angle_log_jacob,
                 "torsion_latent": torsion_latent,
                 "torsion_log_jacob": torsion_log_jacob,
                 "focus_score": focus_score, "cannot_focus": cannot_focus,
                 "contact_scores": contact_score,
                 "cannot_contact": cannot_contact}
    return loss_dict, loss_info


# ---------------------------------- main ------------------------------------

if __name__ == "__main__":
    cfg = dict(num_classes=4, emb_dim=32, node_feat_dim=32, num_flow_layers=2,
               num_radial=6, num_spherical=7, num_basis=32, deq_coeff=0.9)

    N_NODES = 16   # total atoms across all graphs
    G = 8          # graphs (= number of new atoms / focuses)
    K_FOCUS = 8    # fixed-size index set for focus scores
    K_CONTACT = 8  # fixed-size index set for contact scores

    root = jax.random.PRNGKey(0)
    keys = jax.random.split(root, 24)

    emb = cfg["emb_dim"]
    hid = cfg["node_feat_dim"]
    L = cfg["num_flow_layers"]
    params = {
        "embedding": 0.1 * jax.random.normal(keys[0],
                                             (cfg["num_classes"], emb),
                                             jnp.float32),
        "node_flow": init_st_net_stack(keys[1], L, emb, hid,
                                       cfg["num_classes"]),
        "dist_flow": init_st_net_stack(keys[2], L, emb, hid, 1),
        "angle_flow": init_st_net_stack(keys[3], L, emb * 2, hid, 1),
        "torsion_flow": init_st_net_stack(keys[4], L, emb * 3, hid, 1),
        "focus_mlp": init_mlp(keys[5], hid, hid * 2, 1),
        "contact_mlp": init_mlp(keys[6], hid, hid * 2, 1),
        "dist_head": init_mlp(keys[7], cfg["num_radial"], cfg["num_basis"],
                              emb),
        "angle_head": init_mlp(keys[8],
                               cfg["num_spherical"] * cfg["num_radial"],
                               cfg["num_basis"], emb),
    }

    data = {
        "atom_type": jax.random.randint(keys[9], (N_NODES,), 0,
                                        cfg["num_classes"]),
        "pos": jax.random.normal(keys[10], (N_NODES, 3), jnp.float32),
        "batch": jnp.repeat(jnp.arange(G), N_NODES // G),
        # fixed-size index arrays (jit-friendly) instead of boolean masks
        "gen_index": jnp.arange(K_FOCUS, dtype=jnp.int32),
        "contact_index": jnp.arange(K_CONTACT, dtype=jnp.int32) + K_FOCUS,
        "new_atom_type": jax.random.randint(keys[11], (G,), 0,
                                            cfg["num_classes"]),
        "focus": jnp.arange(0, N_NODES, N_NODES // G),
        "c1_focus": jax.random.randint(keys[12], (G, 2), 0, N_NODES),
        "c2_c1_focus": jax.random.randint(keys[13], (G, 3), 0, N_NODES),
        "new_dist": jax.random.uniform(keys[14], (G, 1), jnp.float32,
                                       0.5, 3.0),
        "new_angle": jax.random.uniform(keys[15], (G, 1), jnp.float32,
                                        0.0, 3.0),
        "new_torsion": jax.random.uniform(keys[16], (G, 1), jnp.float32,
                                          -3.0, 3.0),
        "cannot_focus": (jax.random.uniform(keys[17], (K_FOCUS,)) > 0.5
                         ).astype(jnp.float32),
        "cannot_contact": (jax.random.uniform(keys[18], (K_CONTACT,)) > 0.5
                           ).astype(jnp.float32),
    }

    forward = jax.jit(functools.partial(graphbp_forward, cfg=cfg))
    loss_dict, loss_info = forward(params, data, jax.random.PRNGKey(42))
    jax.block_until_ready((loss_dict, loss_info))
    print("KERNEL_OK")
</pallas_src>

<mosaic_0001>
module attributes {stable_mosaic.version = 11 : i64} {
  func.func @_dist_head_mul_kernel(%arg0: i32, %arg1: memref<16x1xf32, #tpu.memory_space<vmem>>, %arg2: memref<16x32xf32, #tpu.memory_space<vmem>>, %arg3: memref<1x6xf32, #tpu.memory_space<vmem>>, %arg4: memref<6x32xbf16, #tpu.memory_space<vmem>>, %arg5: memref<1x32xf32, #tpu.memory_space<vmem>>, %arg6: memref<32x32xbf16, #tpu.memory_space<vmem>>, %arg7: memref<1x32xf32, #tpu.memory_space<vmem>>, %arg8: memref<16x32xf32, #tpu.memory_space<vmem>>) attributes {dimension_semantics = [#tpu.dimension_semantics<parallel>], iteration_bounds = array<i64: 1>, scalar_prefetch = 0 : i64, scratch_operands = 0 : i64, tpu.core_type = #tpu.core_type<tc>, window_params = [{transform_indices = @transform_0, window_bounds = array<i64: 16, 1>}, {transform_indices = @transform_1, window_bounds = array<i64: 16, 32>}, {pipeline_mode = #tpu.pipeline_mode<synchronous>, transform_indices = @transform_2, window_bounds = array<i64: 1, 6>}, {pipeline_mode = #tpu.pipeline_mode<synchronous>, transform_indices = @transform_3, window_bounds = array<i64: 6, 32>}, {pipeline_mode = #tpu.pipeline_mode<synchronous>, transform_indices = @transform_4, window_bounds = array<i64: 1, 32>}, {pipeline_mode = #tpu.pipeline_mode<synchronous>, transform_indices = @transform_5, window_bounds = array<i64: 32, 32>}, {pipeline_mode = #tpu.pipeline_mode<synchronous>, transform_indices = @transform_6, window_bounds = array<i64: 1, 32>}, {transform_indices = @transform_7, window_bounds = array<i64: 16, 32>}]} {
    %c0 = arith.constant 0 : index
    %c0_0 = arith.constant 0 : index
    %0 = vector.load %arg1[%c0, %c0_0] : memref<16x1xf32, #tpu.memory_space<vmem>>, vector<16x1xf32>
    %c0_1 = arith.constant 0 : index
    %c0_2 = arith.constant 0 : index
    %1 = vector.load %arg3[%c0_1, %c0_2] : memref<1x6xf32, #tpu.memory_space<vmem>>, vector<1x6xf32>
    %2 = vector.broadcast %0 : vector<16x1xf32> to vector<16x6xf32>
    %3 = vector.broadcast %1 : vector<1x6xf32> to vector<16x6xf32>
    %4 = arith.subf %2, %3 : vector<16x6xf32>
    %5 = arith.mulf %4, %4 : vector<16x6xf32>
    %cst = arith.constant -1.000000e+00 : f32
    %6 = vector.broadcast %cst : f32 to vector<16x6xf32>
    %7 = arith.mulf %6, %5 : vector<16x6xf32>
    %8 = math.exp %7 : vector<16x6xf32>
    %9 = arith.truncf %8 : vector<16x6xf32> to vector<16x6xbf16>
    %c0_3 = arith.constant 0 : index
    %c0_4 = arith.constant 0 : index
    %10 = vector.load %arg4[%c0_3, %c0_4] : memref<6x32xbf16, #tpu.memory_space<vmem>>, vector<6x32xbf16>
    %cst_5 = arith.constant dense<0.000000e+00> : vector<16x32xf32>
    %11 = tpu.matmul %9, %10, %cst_5 {dimension_numbers = #tpu.dot_dimension_numbers<[1], [0], [0], [1], [0, 0, 1, 1], [], []>} : vector<16x6xbf16>, vector<6x32xbf16>, vector<16x32xf32> -> vector<16x32xf32>
    %c0_6 = arith.constant 0 : index
    %c0_7 = arith.constant 0 : index
    %12 = vector.load %arg5[%c0_6, %c0_7] : memref<1x32xf32, #tpu.memory_space<vmem>>, vector<1x32xf32>
    %13 = vector.broadcast %12 : vector<1x32xf32> to vector<16x32xf32>
    %14 = arith.addf %11, %13 : vector<16x32xf32>
    %cst_8 = arith.constant 0.000000e+00 : f32
    %15 = vector.broadcast %cst_8 : f32 to vector<16x32xf32>
    %16 = arith.maximumf %14, %15 : vector<16x32xf32>
    %17 = arith.truncf %16 : vector<16x32xf32> to vector<16x32xbf16>
    %c0_9 = arith.constant 0 : index
    %c0_10 = arith.constant 0 : index
    %18 = vector.load %arg6[%c0_9, %c0_10] : memref<32x32xbf16, #tpu.memory_space<vmem>>, vector<32x32xbf16>
    %cst_11 = arith.constant dense<0.000000e+00> : vector<16x32xf32>
    %19 = tpu.matmul %17, %18, %cst_11 {dimension_numbers = #tpu.dot_dimension_numbers<[1], [0], [0], [1], [0, 0, 1, 1], [], []>} : vector<16x32xbf16>, vector<32x32xbf16>, vector<16x32xf32> -> vector<16x32xf32>
    %c0_12 = arith.constant 0 : index
    %c0_13 = arith.constant 0 : index
    %20 = vector.load %arg7[%c0_12, %c0_13] : memref<1x32xf32, #tpu.memory_space<vmem>>, vector<1x32xf32>
    %21 = vector.broadcast %20 : vector<1x32xf32> to vector<16x32xf32>
    %22 = arith.addf %19, %21 : vector<16x32xf32>
    %c0_14 = arith.constant 0 : index
    %c0_15 = arith.constant 0 : index
    %23 = vector.load %arg2[%c0_14, %c0_15] : memref<16x32xf32, #tpu.memory_space<vmem>>, vector<16x32xf32>
    %24 = arith.mulf %23, %22 : vector<16x32xf32>
    %c0_16 = arith.constant 0 : index
    %c0_17 = arith.constant 0 : index
    %25 = vector.load %arg8[%c0_16, %c0_17] : memref<16x32xf32, #tpu.memory_space<vmem>>, vector<16x32xf32>
    tpu.vector_store %arg8[%c0_16, %c0_17], %24 {strides = array<i32>} : memref<16x32xf32, #tpu.memory_space<vmem>>, vector<16x32xf32>,
    return
  }
  func.func @transform_0(%arg0: i32) -> (i32, i32) {
    %c0_i32 = arith.constant 0 : i32
    %c0_i32_0 = arith.constant 0 : i32
    return %arg0, %c0_i32 : i32, i32
  }
  func.func @transform_1(%arg0: i32) -> (i32, i32) {
    %c0_i32 = arith.constant 0 : i32
    %c0_i32_0 = arith.constant 0 : i32
    return %arg0, %c0_i32 : i32, i32
  }
  func.func @transform_2(%arg0: i32) -> (i32, i32) {
    %c0_i32 = arith.constant 0 : i32
    %c0_i32_0 = arith.constant 0 : i32
    %c0_i32_1 = arith.constant 0 : i32
    return %c0_i32, %c0_i32_0 : i32, i32
  }
  func.func @transform_3(%arg0: i32) -> (i32, i32) {
    %c0_i32 = arith.constant 0 : i32
    %c0_i32_0 = arith.constant 0 : i32
    %c0_i32_1 = arith.constant 0 : i32
    return %c0_i32, %c0_i32_0 : i32, i32
  }
  func.func @transform_4(%arg0: i32) -> (i32, i32) {
    %c0_i32 = arith.constant 0 : i32
    %c0_i32_0 = arith.constant 0 : i32
    %c0_i32_1 = arith.constant 0 : i32
    return %c0_i32, %c0_i32_0 : i32, i32
  }
  func.func @transform_5(%arg0: i32) -> (i32, i32) {
    %c0_i32 = arith.constant 0 : i32
    %c0_i32_0 = arith.constant 0 : i32
    %c0_i32_1 = arith.constant 0 : i32
    return %c0_i32, %c0_i32_0 : i32, i32
  }
  func.func @transform_6(%arg0: i32) -> (i32, i32) {
    %c0_i32 = arith.constant 0 : i32
    %c0_i32_0 = arith.constant 0 : i32
    %c0_i32_1 = arith.constant 0 : i32
    return %c0_i32, %c0_i32_0 : i32, i32
  }
  func.func @transform_7(%arg0: i32) -> (i32, i32) {
    %c0_i32 = arith.constant 0 : i32
    %c0_i32_0 = arith.constant 0 : i32
    return %arg0, %c0_i32 : i32, i32
  }
}

module attributes {stable_mosaic.version = 11 : i64} {
  func.func @_single_flow_kernel(%arg0: i32, %arg1: memref<2xf32, #tpu.memory_space<smem>>, %arg2: memref<8x1xf32, #tpu.memory_space<vmem>>, %arg3: memref<8x32xbf16, #tpu.memory_space<vmem>>, %arg4: memref<8x32xbf16, #tpu.memory_space<vmem>>, %arg5: memref<32x64xbf16, #tpu.memory_space<vmem>>, %arg6: memref<32x64xbf16, #tpu.memory_space<vmem>>, %arg7: memref<1x64xf32, #tpu.memory_space<vmem>>, %arg8: memref<2x64x1xbf16, #tpu.memory_space<vmem>>, %arg9: memref<2x1x1xf32, #tpu.memory_space<vmem>>, %arg10: memref<2x64x1xbf16, #tpu.memory_space<vmem>>, %arg11: memref<2x1x1xf32, #tpu.memory_space<vmem>>, %arg12: memref<8x1xf32, #tpu.memory_space<vmem>>, %arg13: memref<8x1xf32, #tpu.memory_space<vmem>>) attributes {dimension_semantics = [#tpu.dimension_semantics<parallel>], iteration_bounds = array<i64: 1>, scalar_prefetch = 0 : i64, scratch_operands = 0 : i64, tpu.core_type = #tpu.core_type<tc>, window_params = [{transform_indices = @transform_0, window_bounds = array<i64: 2>}, {transform_indices = @transform_1, window_bounds = array<i64: 8, 1>}, {transform_indices = @transform_2, window_bounds = array<i64: 8, 32>}, {transform_indices = @transform_3, window_bounds = array<i64: 8, 32>}, {pipeline_mode = #tpu.pipeline_mode<synchronous>, transform_indices = @transform_4, window_bounds = array<i64: 32, 64>}, {pipeline_mode = #tpu.pipeline_mode<synchronous>, transform_indices = @transform_5, window_bounds = array<i64: 32, 64>}, {pipeline_mode = #tpu.pipeline_mode<synchronous>, transform_indices = @transform_6, window_bounds = array<i64: 1, 64>}, {pipeline_mode = #tpu.pipeline_mode<synchronous>, transform_indices = @transform_7, window_bounds = array<i64: 2, 64, 1>}, {pipeline_mode = #tpu.pipeline_mode<synchronous>, transform_indices = @transform_8, window_bounds = array<i64: 2, 1, 1>}, {pipeline_mode = #tpu.pipeline_mode<synchronous>, transform_indices = @transform_9, window_bounds = array<i64: 2, 64, 1>}, {pipeline_mode = #tpu.pipeline_mode<synchronous>, transform_indices = @transform_10, window_bounds = array<i64: 2, 1, 1>}, {transform_indices = @transform_11, window_bounds = array<i64: 8, 1>}, {transform_indices = @transform_12, window_bounds = array<i64: 8, 1>}]} {
    %c0 = arith.constant 0 : index
    %c0_0 = arith.constant 0 : index
    %0 = vector.load %arg2[%c0, %c0_0] : memref<8x1xf32, #tpu.memory_space<vmem>>, vector<8x1xf32>
    %c0_1 = arith.constant 0 : index
    %c0_2 = arith.constant 0 : index
    %1 = vector.load %arg7[%c0_1, %c0_2] : memref<1x64xf32, #tpu.memory_space<vmem>>, vector<1x64xf32>
    %c0_3 = arith.constant 0 : index
    %c0_4 = arith.constant 0 : index
    %2 = vector.load %arg3[%c0_3, %c0_4] : memref<8x32xbf16, #tpu.memory_space<vmem>>, vector<8x32xbf16>
    %c0_5 = arith.constant 0 : index
    %c0_6 = arith.constant 0 : index
    %3 = vector.load %arg5[%c0_5, %c0_6] : memref<32x64xbf16, #tpu.memory_space<vmem>>, vector<32x64xbf16>
    %cst = arith.constant dense<0.000000e+00> : vector<8x64xf32>
    %4 = tpu.matmul %2, %3, %cst {dimension_numbers = #tpu.dot_dimension_numbers<[1], [0], [0], [1], [0, 0, 1, 1], [], []>} : vector<8x32xbf16>, vector<32x64xbf16>, vector<8x64xf32> -> vector<8x64xf32>
    %5 = vector.broadcast %1 : vector<1x64xf32> to vector<8x64xf32>
    %6 = arith.addf %5, %4 : vector<8x64xf32>
    %c0_7 = arith.constant 0 : index
    %c0_8 = arith.constant 0 : index
    %7 = vector.load %arg4[%c0_7, %c0_8] : memref<8x32xbf16, #tpu.memory_space<vmem>>, vector<8x32xbf16>
    %c0_9 = arith.constant 0 : index
    %c0_10 = arith.constant 0 : index
    %8 = vector.load %arg6[%c0_9, %c0_10] : memref<32x64xbf16, #tpu.memory_space<vmem>>, vector<32x64xbf16>
    %cst_11 = arith.constant dense<0.000000e+00> : vector<8x64xf32>
    %9 = tpu.matmul %7, %8, %cst_11 {dimension_numbers = #tpu.dot_dimension_numbers<[1], [0], [0], [1], [0, 0, 1, 1], [], []>} : vector<8x32xbf16>, vector<32x64xbf16>, vector<8x64xf32> -> vector<8x64xf32>
    %10 = arith.addf %6, %9 : vector<8x64xf32>
    %11 = math.tanh %10 : vector<8x64xf32>
    %12 = arith.truncf %11 : vector<8x64xf32> to vector<8x64xbf16>
    %cst_12 = arith.constant 0.000000e+00 : f32
    %13 = vector.broadcast %cst_12 : f32 to vector<8x1xf32>
    %c0_13 = arith.constant 0 : index
    %c0_14 = arith.constant 0 : index
    %c0_15 = arith.constant 0 : index
    %14 = vector.load %arg8[%c0_13, %c0_14, %c0_15] : memref<2x64x1xbf16, #tpu.memory_space<vmem>>, vector<1x64x1xbf16>
    %15 = vector.shape_cast %14 : vector<1x64x1xbf16> to vector<64x1xbf16>
    %cst_16 = arith.constant dense<0.000000e+00> : vector<8x1xf32>
    %16 = tpu.matmul %12, %15, %cst_16 {dimension_numbers = #tpu.dot_dimension_numbers<[1], [0], [0], [1], [0, 0, 1, 1], [], []>} : vector<8x64xbf16>, vector<64x1xbf16>, vector<8x1xf32> -> vector<8x1xf32>
    %c0_17 = arith.constant 0 : index
    %c0_18 = arith.constant 0 : index
    %c0_19 = arith.constant 0 : index
    %17 = vector.load %arg9[%c0_17, %c0_18, %c0_19] : memref<2x1x1xf32, #tpu.memory_space<vmem>>, vector<1x1x1xf32>
    %18 = vector.shape_cast %17 : vector<1x1x1xf32> to vector<1x1xf32>
    %19 = vector.broadcast %18 : vector<1x1xf32> to vector<8x1xf32>
    %20 = arith.addf %16, %19 : vector<8x1xf32>
    %c0_20 = arith.constant 0 : index
    %c0_21 = arith.constant 0 : index
    %c0_22 = arith.constant 0 : index
    %21 = vector.load %arg10[%c0_20, %c0_21, %c0_22] : memref<2x64x1xbf16, #tpu.memory_space<vmem>>, vector<1x64x1xbf16>
    %22 = vector.shape_cast %21 : vector<1x64x1xbf16> to vector<64x1xbf16>
    %cst_23 = arith.constant dense<0.000000e+00> : vector<8x1xf32>
    %23 = tpu.matmul %12, %22, %cst_23 {dimension_numbers = #tpu.dot_dimension_numbers<[1], [0], [0], [1], [0, 0, 1, 1], [], []>} : vector<8x64xbf16>, vector<64x1xbf16>, vector<8x1xf32> -> vector<8x1xf32>
    %c0_24 = arith.constant 0 : index
    %c0_25 = arith.constant 0 : index
    %c0_26 = arith.constant 0 : index
    %24 = vector.load %arg11[%c0_24, %c0_25, %c0_26] : memref<2x1x1xf32, #tpu.memory_space<vmem>>, vector<1x1x1xf32>
    %25 = vector.shape_cast %24 : vector<1x1x1xf32> to vector<1x1xf32>
    %26 = vector.broadcast %25 : vector<1x1xf32> to vector<8x1xf32>
    %27 = arith.addf %23, %26 : vector<8x1xf32>
    %c0_27 = arith.constant 0 : index
    %28 = memref.load %arg1[%c0_27] : memref<2xf32, #tpu.memory_space<smem>>
    %29 = math.tanh %20 : vector<8x1xf32>
    %30 = vector.broadcast %28 : f32 to vector<8x1xf32>
    %31 = arith.mulf %30, %29 : vector<8x1xf32>
    %32 = math.exp %31 : vector<8x1xf32>
    %33 = arith.addf %0, %27 : vector<8x1xf32>
    %34 = arith.mulf %33, %32 : vector<8x1xf32>
    %cst_28 = arith.constant 9.99999968E-21 : f32
    %35 = vector.broadcast %cst_28 : f32 to vector<8x1xf32>
    %36 = arith.addf %32, %35 : vector<8x1xf32>
    %37 = math.log %36 : vector<8x1xf32>
    %38 = arith.addf %13, %37 : vector<8x1xf32>
    %c1 = arith.constant 1 : index
    %c0_29 = arith.constant 0 : index
    %c0_30 = arith.constant 0 : index
    %39 = vector.load %arg8[%c1, %c0_29, %c0_30] : memref<2x64x1xbf16, #tpu.memory_space<vmem>>, vector<1x64x1xbf16>
    %40 = vector.shape_cast %39 : vector<1x64x1xbf16> to vector<64x1xbf16>
    %cst_31 = arith.constant dense<0.000000e+00> : vector<8x1xf32>
    %41 = tpu.matmul %12, %40, %cst_31 {dimension_numbers = #tpu.dot_dimension_numbers<[1], [0], [0], [1], [0, 0, 1, 1], [], []>} : vector<8x64xbf16>, vector<64x1xbf16>, vector<8x1xf32> -> vector<8x1xf32>
    %c1_32 = arith.constant 1 : index
    %c0_33 = arith.constant 0 : index
    %c0_34 = arith.constant 0 : index
    %42 = vector.load %arg9[%c1_32, %c0_33, %c0_34] : memref<2x1x1xf32, #tpu.memory_space<vmem>>, vector<1x1x1xf32>
    %43 = vector.shape_cast %42 : vector<1x1x1xf32> to vector<1x1xf32>
    %44 = vector.broadcast %43 : vector<1x1xf32> to vector<8x1xf32>
    %45 = arith.addf %41, %44 : vector<8x1xf32>
    %c1_35 = arith.constant 1 : index
    %c0_36 = arith.constant 0 : index
    %c0_37 = arith.constant 0 : index
    %46 = vector.load %arg10[%c1_35, %c0_36, %c0_37] : memref<2x64x1xbf16, #tpu.memory_space<vmem>>, vector<1x64x1xbf16>
    %47 = vector.shape_cast %46 : vector<1x64x1xbf16> to vector<64x1xbf16>
    %cst_38 = arith.constant dense<0.000000e+00> : vector<8x1xf32>
    %48 = tpu.matmul %12, %47, %cst_38 {dimension_numbers = #tpu.dot_dimension_numbers<[1], [0], [0], [1], [0, 0, 1, 1], [], []>} : vector<8x64xbf16>, vector<64x1xbf16>, vector<8x1xf32> -> vector<8x1xf32>
    %c1_39 = arith.constant 1 : index
    %c0_40 = arith.constant 0 : index
    %c0_41 = arith.constant 0 : index
    %49 = vector.load %arg11[%c1_39, %c0_40, %c0_41] : memref<2x1x1xf32, #tpu.memory_space<vmem>>, vector<1x1x1xf32>
    %50 = vector.shape_cast %49 : vector<1x1x1xf32> to vector<1x1xf32>
    %51 = vector.broadcast %50 : vector<1x1xf32> to vector<8x1xf32>
    %52 = arith.addf %48, %51 : vector<8x1xf32>
    %c1_42 = arith.constant 1 : index
    %53 = memref.load %arg1[%c1_42] : memref<2xf32, #tpu.memory_space<smem>>
    %54 = math.tanh %45 : vector<8x1xf32>
    %55 = vector.broadcast %53 : f32 to vector<8x1xf32>
    %56 = arith.mulf %55, %54 : vector<8x1xf32>
    %57 = math.exp %56 : vector<8x1xf32>
    %58 = arith.addf %34, %52 : vector<8x1xf32>
    %59 = arith.mulf %58, %57 : vector<8x1xf32>
    %cst_43 = arith.constant 9.99999968E-21 : f32
    %60 = vector.broadcast %cst_43 : f32 to vector<8x1xf32>
    %61 = arith.addf %57, %60 : vector<8x1xf32>
    %62 = math.log %61 : vector<8x1xf32>
    %63 = arith.addf %38, %62 : vector<8x1xf32>
    %c0_44 = arith.constant 0 : index
    %c0_45 = arith.constant 0 : index
    %64 = vector.load %arg12[%c0_44, %c0_45] : memref<8x1xf32, #tpu.memory_space<vmem>>, vector<8x1xf32>
    tpu.vector_store %arg12[%c0_44, %c0_45], %59 {strides = array<i32>} : memref<8x1xf32, #tpu.memory_space<vmem>>, vector<8x1xf32>,
    %c0_46 = arith.constant 0 : index
    %c0_47 = arith.constant 0 : index
    %65 = vector.load %arg13[%c0_46, %c0_47] : memref<8x1xf32, #tpu.memory_space<vmem>>, vector<8x1xf32>
    tpu.vector_store %arg13[%c0_46, %c0_47], %63 {strides = array<i32>} : memref<8x1xf32, #tpu.memory_space<vmem>>, vector<8x1xf32>,
    return
  }
  func.func @transform_0(%arg0: i32) -> i32 {
    %c0_i32 = arith.constant 0 : i32
    %c0_i32_0 = arith.constant 0 : i32
    return %c0_i32 : i32
  }
  func.func @transform_1(%arg0: i32) -> (i32, i32) {
    %c0_i32 = arith.constant 0 : i32
    %c0_i32_0 = arith.constant 0 : i32
    return %arg0, %c0_i32 : i32, i32
  }
  func.func @transform_2(%arg0: i32) -> (i32, i32) {
    %c0_i32 = arith.constant 0 : i32
    %c0_i32_0 = arith.constant 0 : i32
    return %arg0, %c0_i32 : i32, i32
  }
  func.func @transform_3(%arg0: i32) -> (i32, i32) {
    %c0_i32 = arith.constant 0 : i32
    %c0_i32_0 = arith.constant 0 : i32
    return %arg0, %c0_i32 : i32, i32
  }
  func.func @transform_4(%arg0: i32) -> (i32, i32) {
    %c0_i32 = arith.constant 0 : i32
    %c0_i32_0 = arith.constant 0 : i32
    %c0_i32_1 = arith.constant 0 : i32
    return %c0_i32, %c0_i32_0 : i32, i32
  }
  func.func @transform_5(%arg0: i32) -> (i32, i32) {
    %c0_i32 = arith.constant 0 : i32
    %c0_i32_0 = arith.constant 0 : i32
    %c0_i32_1 = arith.constant 0 : i32
    return %c0_i32, %c0_i32_0 : i32, i32
  }
  func.func @transform_6(%arg0: i32) -> (i32, i32) {
    %c0_i32 = arith.constant 0 : i32
    %c0_i32_0 = arith.constant 0 : i32
    %c0_i32_1 = arith.constant 0 : i32
    return %c0_i32, %c0_i32_0 : i32, i32
  }
  func.func @transform_7(%arg0: i32) -> (i32, i32, i32) {
    %c0_i32 = arith.constant 0 : i32
    %c0_i32_0 = arith.constant 0 : i32
    %c0_i32_1 = arith.constant 0 : i32
    %c0_i32_2 = arith.constant 0 : i32
    return %c0_i32, %c0_i32_0, %c0_i32_1 : i32, i32, i32
  }
  func.func @transform_8(%arg0: i32) -> (i32, i32, i32) {
    %c0_i32 = arith.constant 0 : i32
    %c0_i32_0 = arith.constant 0 : i32
    %c0_i32_1 = arith.constant 0 : i32
    %c0_i32_2 = arith.constant 0 : i32
    return %c0_i32, %c0_i32_0, %c0_i32_1 : i32, i32, i32
  }
  func.func @transform_9(%arg0: i32) -> (i32, i32, i32) {
    %c0_i32 = arith.constant 0 : i32
    %c0_i32_0 = arith.constant 0 : i32
    %c0_i32_1 = arith.constant 0 : i32
    %c0_i32_2 = arith.constant 0 : i32
    return %c0_i32, %c0_i32_0, %c0_i32_1 : i32, i32, i32
  }
  func.func @transform_10(%arg0: i32) -> (i32, i32, i32) {
    %c0_i32 = arith.constant 0 : i32
    %c0_i32_0 = arith.constant 0 : i32
    %c0_i32_1 = arith.constant 0 : i32
    %c0_i32_2 = arith.constant 0 : i32
    return %c0_i32, %c0_i32_0, %c0_i32_1 : i32, i32, i32
  }
  func.func @transform_11(%arg0: i32) -> (i32, i32) {
    %c0_i32 = arith.constant 0 : i32
    %c0_i32_0 = arith.constant 0 : i32
    return %arg0, %c0_i32 : i32, i32
  }
  func.func @transform_12(%arg0: i32) -> (i32, i32) {
    %c0_i32 = arith.constant 0 : i32
    %c0_i32_0 = arith.constant 0 : i32
    return %arg0, %c0_i32 : i32, i32
  }
}

module attributes {stable_mosaic.version = 11 : i64} {
  func.func @_focus_contact_kernel(%arg0: i32, %arg1: memref<8x32xbf16, #tpu.memory_space<vmem>>, %arg2: memref<32x64xbf16, #tpu.memory_space<vmem>>, %arg3: memref<1x64xf32, #tpu.memory_space<vmem>>, %arg4: memref<64x1xbf16, #tpu.memory_space<vmem>>, %arg5: memref<1x1xf32, #tpu.memory_space<vmem>>, %arg6: memref<8x32xbf16, #tpu.memory_space<vmem>>, %arg7: memref<32x64xbf16, #tpu.memory_space<vmem>>, %arg8: memref<1x64xf32, #tpu.memory_space<vmem>>, %arg9: memref<64x1xbf16, #tpu.memory_space<vmem>>, %arg10: memref<1x1xf32, #tpu.memory_space<vmem>>, %arg11: memref<8x1xf32, #tpu.memory_space<vmem>>, %arg12: memref<8x1xf32, #tpu.memory_space<vmem>>) attributes {dimension_semantics = [#tpu.dimension_semantics<parallel>], iteration_bounds = array<i64: 1>, scalar_prefetch = 0 : i64, scratch_operands = 0 : i64, tpu.core_type = #tpu.core_type<tc>, window_params = [{transform_indices = @transform_0, window_bounds = array<i64: 8, 32>}, {pipeline_mode = #tpu.pipeline_mode<synchronous>, transform_indices = @transform_1, window_bounds = array<i64: 32, 64>}, {pipeline_mode = #tpu.pipeline_mode<synchronous>, transform_indices = @transform_2, window_bounds = array<i64: 1, 64>}, {pipeline_mode = #tpu.pipeline_mode<synchronous>, transform_indices = @transform_3, window_bounds = array<i64: 64, 1>}, {pipeline_mode = #tpu.pipeline_mode<synchronous>, transform_indices = @transform_4, window_bounds = array<i64: 1, 1>}, {transform_indices = @transform_5, window_bounds = array<i64: 8, 32>}, {pipeline_mode = #tpu.pipeline_mode<synchronous>, transform_indices = @transform_6, window_bounds = array<i64: 32, 64>}, {pipeline_mode = #tpu.pipeline_mode<synchronous>, transform_indices = @transform_7, window_bounds = array<i64: 1, 64>}, {pipeline_mode = #tpu.pipeline_mode<synchronous>, transform_indices = @transform_8, window_bounds = array<i64: 64, 1>}, {pipeline_mode = #tpu.pipeline_mode<synchronous>, transform_indices = @transform_9, window_bounds = array<i64: 1, 1>}, {transform_indices = @transform_10, window_bounds = array<i64: 8, 1>}, {transform_indices = @transform_11, window_bounds = array<i64: 8, 1>}]} {
    %c0 = arith.constant 0 : index
    %c0_0 = arith.constant 0 : index
    %0 = vector.load %arg1[%c0, %c0_0] : memref<8x32xbf16, #tpu.memory_space<vmem>>, vector<8x32xbf16>
    %c0_1 = arith.constant 0 : index
    %c0_2 = arith.constant 0 : index
    %1 = vector.load %arg2[%c0_1, %c0_2] : memref<32x64xbf16, #tpu.memory_space<vmem>>, vector<32x64xbf16>
    %cst = arith.constant dense<0.000000e+00> : vector<8x64xf32>
    %2 = tpu.matmul %0, %1, %cst {dimension_numbers = #tpu.dot_dimension_numbers<[1], [0], [0], [1], [0, 0, 1, 1], [], []>} : vector<8x32xbf16>, vector<32x64xbf16>, vector<8x64xf32> -> vector<8x64xf32>
    %c0_3 = arith.constant 0 : index
    %c0_4 = arith.constant 0 : index
    %3 = vector.load %arg3[%c0_3, %c0_4] : memref<1x64xf32, #tpu.memory_space<vmem>>, vector<1x64xf32>
    %4 = vector.broadcast %3 : vector<1x64xf32> to vector<8x64xf32>
    %5 = arith.addf %2, %4 : vector<8x64xf32>
    %cst_5 = arith.constant 0.000000e+00 : f32
    %6 = vector.broadcast %cst_5 : f32 to vector<8x64xf32>
    %7 = arith.maximumf %5, %6 : vector<8x64xf32>
    %8 = arith.truncf %7 : vector<8x64xf32> to vector<8x64xbf16>
    %c0_6 = arith.constant 0 : index
    %c0_7 = arith.constant 0 : index
    %9 = vector.load %arg4[%c0_6, %c0_7] : memref<64x1xbf16, #tpu.memory_space<vmem>>, vector<64x1xbf16>
    %cst_8 = arith.constant dense<0.000000e+00> : vector<8x1xf32>
    %10 = tpu.matmul %8, %9, %cst_8 {dimension_numbers = #tpu.dot_dimension_numbers<[1], [0], [0], [1], [0, 0, 1, 1], [], []>} : vector<8x64xbf16>, vector<64x1xbf16>, vector<8x1xf32> -> vector<8x1xf32>
    %c0_9 = arith.constant 0 : index
    %c0_10 = arith.constant 0 : index
    %11 = vector.load %arg5[%c0_9, %c0_10] : memref<1x1xf32, #tpu.memory_space<vmem>>, vector<1x1xf32>
    %12 = vector.broadcast %11 : vector<1x1xf32> to vector<8x1xf32>
    %13 = arith.addf %10, %12 : vector<8x1xf32>
    %cst_11 = arith.constant 0.000000e+00 : f32
    %14 = vector.broadcast %cst_11 : f32 to vector<8x1xf32>
    %15 = arith.subf %14, %13 : vector<8x1xf32>
    %16 = math.exp %15 : vector<8x1xf32>
    %cst_12 = arith.constant 1.000000e+00 : f32
    %17 = vector.broadcast %cst_12 : f32 to vector<8x1xf32>
    %18 = arith.addf %17, %16 : vector<8x1xf32>
    %cst_13 = arith.constant 1.000000e+00 : f32
    %19 = vector.broadcast %cst_13 : f32 to vector<8x1xf32>
    %20 = arith.divf %19, %18 : vector<8x1xf32>
    %c0_14 = arith.constant 0 : index
    %c0_15 = arith.constant 0 : index
    %21 = vector.load %arg11[%c0_14, %c0_15] : memref<8x1xf32, #tpu.memory_space<vmem>>, vector<8x1xf32>
    tpu.vector_store %arg11[%c0_14, %c0_15], %20 {strides = array<i32>} : memref<8x1xf32, #tpu.memory_space<vmem>>, vector<8x1xf32>,
    %c0_16 = arith.constant 0 : index
    %c0_17 = arith.constant 0 : index
    %22 = vector.load %arg6[%c0_16, %c0_17] : memref<8x32xbf16, #tpu.memory_space<vmem>>, vector<8x32xbf16>
    %c0_18 = arith.constant 0 : index
    %c0_19 = arith.constant 0 : index
    %23 = vector.load %arg7[%c0_18, %c0_19] : memref<32x64xbf16, #tpu.memory_space<vmem>>, vector<32x64xbf16>
    %cst_20 = arith.constant dense<0.000000e+00> : vector<8x64xf32>
    %24 = tpu.matmul %22, %23, %cst_20 {dimension_numbers = #tpu.dot_dimension_numbers<[1], [0], [0], [1], [0, 0, 1, 1], [], []>} : vector<8x32xbf16>, vector<32x64xbf16>, vector<8x64xf32> -> vector<8x64xf32>
    %c0_21 = arith.constant 0 : index
    %c0_22 = arith.constant 0 : index
    %25 = vector.load %arg8[%c0_21, %c0_22] : memref<1x64xf32, #tpu.memory_space<vmem>>, vector<1x64xf32>
    %26 = vector.broadcast %25 : vector<1x64xf32> to vector<8x64xf32>
    %27 = arith.addf %24, %26 : vector<8x64xf32>
    %cst_23 = arith.constant 0.000000e+00 : f32
    %28 = vector.broadcast %cst_23 : f32 to vector<8x64xf32>
    %29 = arith.maximumf %27, %28 : vector<8x64xf32>
    %30 = arith.truncf %29 : vector<8x64xf32> to vector<8x64xbf16>
    %c0_24 = arith.constant 0 : index
    %c0_25 = arith.constant 0 : index
    %31 = vector.load %arg9[%c0_24, %c0_25] : memref<64x1xbf16, #tpu.memory_space<vmem>>, vector<64x1xbf16>
    %cst_26 = arith.constant dense<0.000000e+00> : vector<8x1xf32>
    %32 = tpu.matmul %30, %31, %cst_26 {dimension_numbers = #tpu.dot_dimension_numbers<[1], [0], [0], [1], [0, 0, 1, 1], [], []>} : vector<8x64xbf16>, vector<64x1xbf16>, vector<8x1xf32> -> vector<8x1xf32>
    %c0_27 = arith.constant 0 : index
    %c0_28 = arith.constant 0 : index
    %33 = vector.load %arg10[%c0_27, %c0_28] : memref<1x1xf32, #tpu.memory_space<vmem>>, vector<1x1xf32>
    %34 = vector.broadcast %33 : vector<1x1xf32> to vector<8x1xf32>
    %35 = arith.addf %32, %34 : vector<8x1xf32>
    %cst_29 = arith.constant 0.000000e+00 : f32
    %36 = vector.broadcast %cst_29 : f32 to vector<8x1xf32>
    %37 = arith.subf %36, %35 : vector<8x1xf32>
    %38 = math.exp %37 : vector<8x1xf32>
    %cst_30 = arith.constant 1.000000e+00 : f32
    %39 = vector.broadcast %cst_30 : f32 to vector<8x1xf32>
    %40 = arith.addf %39, %38 : vector<8x1xf32>
    %cst_31 = arith.constant 1.000000e+00 : f32
    %41 = vector.broadcast %cst_31 : f32 to vector<8x1xf32>
    %42 = arith.divf %41, %40 : vector<8x1xf32>
    %c0_32 = arith.constant 0 : index
    %c0_33 = arith.constant 0 : index
    %43 = vector.load %arg12[%c0_32, %c0_33] : memref<8x1xf32, #tpu.memory_space<vmem>>, vector<8x1xf32>
    tpu.vector_store %arg12[%c0_32, %c0_33], %42 {strides = array<i32>} : memref<8x1xf32, #tpu.memory_space<vmem>>, vector<8x1xf32>,
    return
  }
  func.func @transform_0(%arg0: i32) -> (i32, i32) {
    %c0_i32 = arith.constant 0 : i32
    %c0_i32_0 = arith.constant 0 : i32
    return %arg0, %c0_i32 : i32, i32
  }
  func.func @transform_1(%arg0: i32) -> (i32, i32) {
    %c0_i32 = arith.constant 0 : i32
    %c0_i32_0 = arith.constant 0 : i32
    %c0_i32_1 = arith.constant 0 : i32
    return %c0_i32, %c0_i32_0 : i32, i32
  }
  func.func @transform_2(%arg0: i32) -> (i32, i32) {
    %c0_i32 = arith.constant 0 : i32
    %c0_i32_0 = arith.constant 0 : i32
    %c0_i32_1 = arith.constant 0 : i32
    return %c0_i32, %c0_i32_0 : i32, i32
  }
  func.func @transform_3(%arg0: i32) -> (i32, i32) {
    %c0_i32 = arith.constant 0 : i32
    %c0_i32_0 = arith.constant 0 : i32
    %c0_i32_1 = arith.constant 0 : i32
    return %c0_i32, %c0_i32_0 : i32, i32
  }
  func.func @transform_4(%arg0: i32) -> (i32, i32) {
    %c0_i32 = arith.constant 0 : i32
    %c0_i32_0 = arith.constant 0 : i32
    %c0_i32_1 = arith.constant 0 : i32
    return %c0_i32, %c0_i32_0 : i32, i32
  }
  func.func @transform_5(%arg0: i32) -> (i32, i32) {
    %c0_i32 = arith.constant 0 : i32
    %c0_i32_0 = arith.constant 0 : i32
    return %arg0, %c0_i32 : i32, i32
  }
  func.func @transform_6(%arg0: i32) -> (i32, i32) {
    %c0_i32 = arith.constant 0 : i32
    %c0_i32_0 = arith.constant 0 : i32
    %c0_i32_1 = arith.constant 0 : i32
    return %c0_i32, %c0_i32_0 : i32, i32
  }
  func.func @transform_7(%arg0: i32) -> (i32, i32) {
    %c0_i32 = arith.constant 0 : i32
    %c0_i32_0 = arith.constant 0 : i32
    %c0_i32_1 = arith.constant 0 : i32
    return %c0_i32, %c0_i32_0 : i32, i32
  }
  func.func @transform_8(%arg0: i32) -> (i32, i32) {
    %c0_i32 = arith.constant 0 : i32
    %c0_i32_0 = arith.constant 0 : i32
    %c0_i32_1 = arith.constant 0 : i32
    return %c0_i32, %c0_i32_0 : i32, i32
  }
  func.func @transform_9(%arg0: i32) -> (i32, i32) {
    %c0_i32 = arith.constant 0 : i32
    %c0_i32_0 = arith.constant 0 : i32
    %c0_i32_1 = arith.constant 0 : i32
    return %c0_i32, %c0_i32_0 : i32, i32
  }
  func.func @transform_10(%arg0: i32) -> (i32, i32) {
    %c0_i32 = arith.constant 0 : i32
    %c0_i32_0 = arith.constant 0 : i32
    return %arg0, %c0_i32 : i32, i32
  }
  func.func @transform_11(%arg0: i32) -> (i32, i32) {
    %c0_i32 = arith.constant 0 : i32
    %c0_i32_0 = arith.constant 0 : i32
    return %arg0, %c0_i32 : i32, i32
  }
}

module attributes {stable_mosaic.version = 11 : i64} {
  func.func @_dual_flow_kernel(%arg0: i32, %arg1: memref<2xf32, #tpu.memory_space<smem>>, %arg2: memref<8x4xf32, #tpu.memory_space<vmem>>, %arg3: memref<8x32xbf16, #tpu.memory_space<vmem>>, %arg4: memref<32x64xbf16, #tpu.memory_space<vmem>>, %arg5: memref<1x64xf32, #tpu.memory_space<vmem>>, %arg6: memref<2x64x4xbf16, #tpu.memory_space<vmem>>, %arg7: memref<2x1x4xf32, #tpu.memory_space<vmem>>, %arg8: memref<2x64x4xbf16, #tpu.memory_space<vmem>>, %arg9: memref<2x1x4xf32, #tpu.memory_space<vmem>>, %arg10: memref<2xf32, #tpu.memory_space<smem>>, %arg11: memref<8x1xf32, #tpu.memory_space<vmem>>, %arg12: memref<8x32xbf16, #tpu.memory_space<vmem>>, %arg13: memref<32x64xbf16, #tpu.memory_space<vmem>>, %arg14: memref<1x64xf32, #tpu.memory_space<vmem>>, %arg15: memref<2x64x1xbf16, #tpu.memory_space<vmem>>, %arg16: memref<2x1x1xf32, #tpu.memory_space<vmem>>, %arg17: memref<2x64x1xbf16, #tpu.memory_space<vmem>>, %arg18: memref<2x1x1xf32, #tpu.memory_space<vmem>>, %arg19: memref<8x4xf32, #tpu.memory_space<vmem>>, %arg20: memref<8x4xf32, #tpu.memory_space<vmem>>, %arg21: memref<8x1xf32, #tpu.memory_space<vmem>>, %arg22: memref<8x1xf32, #tpu.memory_space<vmem>>) attributes {dimension_semantics = [#tpu.dimension_semantics<parallel>], iteration_bounds = array<i64: 1>, scalar_prefetch = 0 : i64, scratch_operands = 0 : i64, tpu.core_type = #tpu.core_type<tc>, window_params = [{transform_indices = @transform_0, window_bounds = array<i64: 2>}, {transform_indices = @transform_1, window_bounds = array<i64: 8, 4>}, {transform_indices = @transform_2, window_bounds = array<i64: 8, 32>}, {pipeline_mode = #tpu.pipeline_mode<synchronous>, transform_indices = @transform_3, window_bounds = array<i64: 32, 64>}, {pipeline_mode = #tpu.pipeline_mode<synchronous>, transform_indices = @transform_4, window_bounds = array<i64: 1, 64>}, {pipeline_mode = #tpu.pipeline_mode<synchronous>, transform_indices = @transform_5, window_bounds = array<i64: 2, 64, 4>}, {pipeline_mode = #tpu.pipeline_mode<synchronous>, transform_indices = @transform_6, window_bounds = array<i64: 2, 1, 4>}, {pipeline_mode = #tpu.pipeline_mode<synchronous>, transform_indices = @transform_7, window_bounds = array<i64: 2, 64, 4>}, {pipeline_mode = #tpu.pipeline_mode<synchronous>, transform_indices = @transform_8, window_bounds = array<i64: 2, 1, 4>}, {transform_indices = @transform_9, window_bounds = array<i64: 2>}, {transform_indices = @transform_10, window_bounds = array<i64: 8, 1>}, {transform_indices = @transform_11, window_bounds = array<i64: 8, 32>}, {pipeline_mode = #tpu.pipeline_mode<synchronous>, transform_indices = @transform_12, window_bounds = array<i64: 32, 64>}, {pipeline_mode = #tpu.pipeline_mode<synchronous>, transform_indices = @transform_13, window_bounds = array<i64: 1, 64>}, {pipeline_mode = #tpu.pipeline_mode<synchronous>, transform_indices = @transform_14, window_bounds = array<i64: 2, 64, 1>}, {pipeline_mode = #tpu.pipeline_mode<synchronous>, transform_indices = @transform_15, window_bounds = array<i64: 2, 1, 1>}, {pipeline_mode = #tpu.pipeline_mode<synchronous>, transform_indices = @transform_16, window_bounds = array<i64: 2, 64, 1>}, {pipeline_mode = #tpu.pipeline_mode<synchronous>, transform_indices = @transform_17, window_bounds = array<i64: 2, 1, 1>}, {transform_indices = @transform_18, window_bounds = array<i64: 8, 4>}, {transform_indices = @transform_19, window_bounds = array<i64: 8, 4>}, {transform_indices = @transform_20, window_bounds = array<i64: 8, 1>}, {transform_indices = @transform_21, window_bounds = array<i64: 8, 1>}]} {
    %c0 = arith.constant 0 : index
    %c0_0 = arith.constant 0 : index
    %0 = vector.load %arg2[%c0, %c0_0] : memref<8x4xf32, #tpu.memory_space<vmem>>, vector<8x4xf32>
    %c0_1 = arith.constant 0 : index
    %c0_2 = arith.constant 0 : index
    %1 = vector.load %arg5[%c0_1, %c0_2] : memref<1x64xf32, #tpu.memory_space<vmem>>, vector<1x64xf32>
    %c0_3 = arith.constant 0 : index
    %c0_4 = arith.constant 0 : index
    %2 = vector.load %arg3[%c0_3, %c0_4] : memref<8x32xbf16, #tpu.memory_space<vmem>>, vector<8x32xbf16>
    %c0_5 = arith.constant 0 : index
    %c0_6 = arith.constant 0 : index
    %3 = vector.load %arg4[%c0_5, %c0_6] : memref<32x64xbf16, #tpu.memory_space<vmem>>, vector<32x64xbf16>
    %cst = arith.constant dense<0.000000e+00> : vector<8x64xf32>
    %4 = tpu.matmul %2, %3, %cst {dimension_numbers = #tpu.dot_dimension_numbers<[1], [0], [0], [1], [0, 0, 1, 1], [], []>} : vector<8x32xbf16>, vector<32x64xbf16>, vector<8x64xf32> -> vector<8x64xf32>
    %5 = vector.broadcast %1 : vector<1x64xf32> to vector<8x64xf32>
    %6 = arith.addf %5, %4 : vector<8x64xf32>
    %7 = math.tanh %6 : vector<8x64xf32>
    %8 = arith.truncf %7 : vector<8x64xf32> to vector<8x64xbf16>
    %cst_7 = arith.constant 0.000000e+00 : f32
    %9 = vector.broadcast %cst_7 : f32 to vector<8x4xf32>
    %c0_8 = arith.constant 0 : index
    %c0_9 = arith.constant 0 : index
    %c0_10 = arith.constant 0 : index
    %10 = vector.load %arg6[%c0_8, %c0_9, %c0_10] : memref<2x64x4xbf16, #tpu.memory_space<vmem>>, vector<1x64x4xbf16>
    %11 = vector.shape_cast %10 : vector<1x64x4xbf16> to vector<64x4xbf16>
    %cst_11 = arith.constant dense<0.000000e+00> : vector<8x4xf32>
    %12 = tpu.matmul %8, %11, %cst_11 {dimension_numbers = #tpu.dot_dimension_numbers<[1], [0], [0], [1], [0, 0, 1, 1], [], []>} : vector<8x64xbf16>, vector<64x4xbf16>, vector<8x4xf32> -> vector<8x4xf32>
    %c0_12 = arith.constant 0 : index
    %c0_13 = arith.constant 0 : index
    %c0_14 = arith.constant 0 : index
    %13 = vector.load %arg7[%c0_12, %c0_13, %c0_14] : memref<2x1x4xf32, #tpu.memory_space<vmem>>, vector<1x1x4xf32>
    %14 = vector.shape_cast %13 : vector<1x1x4xf32> to vector<1x4xf32>
    %15 = vector.broadcast %14 : vector<1x4xf32> to vector<8x4xf32>
    %16 = arith.addf %12, %15 : vector<8x4xf32>
    %c0_15 = arith.constant 0 : index
    %c0_16 = arith.constant 0 : index
    %c0_17 = arith.constant 0 : index
    %17 = vector.load %arg8[%c0_15, %c0_16, %c0_17] : memref<2x64x4xbf16, #tpu.memory_space<vmem>>, vector<1x64x4xbf16>
    %18 = vector.shape_cast %17 : vector<1x64x4xbf16> to vector<64x4xbf16>
    %cst_18 = arith.constant dense<0.000000e+00> : vector<8x4xf32>
    %19 = tpu.matmul %8, %18, %cst_18 {dimension_numbers = #tpu.dot_dimension_numbers<[1], [0], [0], [1], [0, 0, 1, 1], [], []>} : vector<8x64xbf16>, vector<64x4xbf16>, vector<8x4xf32> -> vector<8x4xf32>
    %c0_19 = arith.constant 0 : index
    %c0_20 = arith.constant 0 : index
    %c0_21 = arith.constant 0 : index
    %20 = vector.load %arg9[%c0_19, %c0_20, %c0_21] : memref<2x1x4xf32, #tpu.memory_space<vmem>>, vector<1x1x4xf32>
    %21 = vector.shape_cast %20 : vector<1x1x4xf32> to vector<1x4xf32>
    %22 = vector.broadcast %21 : vector<1x4xf32> to vector<8x4xf32>
    %23 = arith.addf %19, %22 : vector<8x4xf32>
    %c0_22 = arith.constant 0 : index
    %24 = memref.load %arg1[%c0_22] : memref<2xf32, #tpu.memory_space<smem>>
    %25 = math.tanh %16 : vector<8x4xf32>
    %26 = vector.broadcast %24 : f32 to vector<8x4xf32>
    %27 = arith.mulf %26, %25 : vector<8x4xf32>
    %28 = math.exp %27 : vector<8x4xf32>
    %29 = arith.addf %0, %23 : vector<8x4xf32>
    %30 = arith.mulf %29, %28 : vector<8x4xf32>
    %cst_23 = arith.constant 9.99999968E-21 : f32
    %31 = vector.broadcast %cst_23 : f32 to vector<8x4xf32>
    %32 = arith.addf %28, %31 : vector<8x4xf32>
    %33 = math.log %32 : vector<8x4xf32>
    %34 = arith.addf %9, %33 : vector<8x4xf32>
    %c1 = arith.constant 1 : index
    %c0_24 = arith.constant 0 : index
    %c0_25 = arith.constant 0 : index
    %35 = vector.load %arg6[%c1, %c0_24, %c0_25] : memref<2x64x4xbf16, #tpu.memory_space<vmem>>, vector<1x64x4xbf16>
    %36 = vector.shape_cast %35 : vector<1x64x4xbf16> to vector<64x4xbf16>
    %cst_26 = arith.constant dense<0.000000e+00> : vector<8x4xf32>
    %37 = tpu.matmul %8, %36, %cst_26 {dimension_numbers = #tpu.dot_dimension_numbers<[1], [0], [0], [1], [0, 0, 1, 1], [], []>} : vector<8x64xbf16>, vector<64x4xbf16>, vector<8x4xf32> -> vector<8x4xf32>
    %c1_27 = arith.constant 1 : index
    %c0_28 = arith.constant 0 : index
    %c0_29 = arith.constant 0 : index
    %38 = vector.load %arg7[%c1_27, %c0_28, %c0_29] : memref<2x1x4xf32, #tpu.memory_space<vmem>>, vector<1x1x4xf32>
    %39 = vector.shape_cast %38 : vector<1x1x4xf32> to vector<1x4xf32>
    %40 = vector.broadcast %39 : vector<1x4xf32> to vector<8x4xf32>
    %41 = arith.addf %37, %40 : vector<8x4xf32>
    %c1_30 = arith.constant 1 : index
    %c0_31 = arith.constant 0 : index
    %c0_32 = arith.constant 0 : index
    %42 = vector.load %arg8[%c1_30, %c0_31, %c0_32] : memref<2x64x4xbf16, #tpu.memory_space<vmem>>, vector<1x64x4xbf16>
    %43 = vector.shape_cast %42 : vector<1x64x4xbf16> to vector<64x4xbf16>
    %cst_33 = arith.constant dense<0.000000e+00> : vector<8x4xf32>
    %44 = tpu.matmul %8, %43, %cst_33 {dimension_numbers = #tpu.dot_dimension_numbers<[1], [0], [0], [1], [0, 0, 1, 1], [], []>} : vector<8x64xbf16>, vector<64x4xbf16>, vector<8x4xf32> -> vector<8x4xf32>
    %c1_34 = arith.constant 1 : index
    %c0_35 = arith.constant 0 : index
    %c0_36 = arith.constant 0 : index
    %45 = vector.load %arg9[%c1_34, %c0_35, %c0_36] : memref<2x1x4xf32, #tpu.memory_space<vmem>>, vector<1x1x4xf32>
    %46 = vector.shape_cast %45 : vector<1x1x4xf32> to vector<1x4xf32>
    %47 = vector.broadcast %46 : vector<1x4xf32> to vector<8x4xf32>
    %48 = arith.addf %44, %47 : vector<8x4xf32>
    %c1_37 = arith.constant 1 : index
    %49 = memref.load %arg1[%c1_37] : memref<2xf32, #tpu.memory_space<smem>>
    %50 = math.tanh %41 : vector<8x4xf32>
    %51 = vector.broadcast %49 : f32 to vector<8x4xf32>
    %52 = arith.mulf %51, %50 : vector<8x4xf32>
    %53 = math.exp %52 : vector<8x4xf32>
    %54 = arith.addf %30, %48 : vector<8x4xf32>
    %55 = arith.mulf %54, %53 : vector<8x4xf32>
    %cst_38 = arith.constant 9.99999968E-21 : f32
    %56 = vector.broadcast %cst_38 : f32 to vector<8x4xf32>
    %57 = arith.addf %53, %56 : vector<8x4xf32>
    %58 = math.log %57 : vector<8x4xf32>
    %59 = arith.addf %34, %58 : vector<8x4xf32>
    %c0_39 = arith.constant 0 : index
    %c0_40 = arith.constant 0 : index
    %60 = vector.load %arg19[%c0_39, %c0_40] : memref<8x4xf32, #tpu.memory_space<vmem>>, vector<8x4xf32>
    tpu.vector_store %arg19[%c0_39, %c0_40], %55 {strides = array<i32>} : memref<8x4xf32, #tpu.memory_space<vmem>>, vector<8x4xf32>,
    %c0_41 = arith.constant 0 : index
    %c0_42 = arith.constant 0 : index
    %61 = vector.load %arg20[%c0_41, %c0_42] : memref<8x4xf32, #tpu.memory_space<vmem>>, vector<8x4xf32>
    tpu.vector_store %arg20[%c0_41, %c0_42], %59 {strides = array<i32>} : memref<8x4xf32, #tpu.memory_space<vmem>>, vector<8x4xf32>,
    %c0_43 = arith.constant 0 : index
    %c0_44 = arith.constant 0 : index
    %62 = vector.load %arg11[%c0_43, %c0_44] : memref<8x1xf32, #tpu.memory_space<vmem>>, vector<8x1xf32>
    %c0_45 = arith.constant 0 : index
    %c0_46 = arith.constant 0 : index
    %63 = vector.load %arg14[%c0_45, %c0_46] : memref<1x64xf32, #tpu.memory_space<vmem>>, vector<1x64xf32>
    %c0_47 = arith.constant 0 : index
    %c0_48 = arith.constant 0 : index
    %64 = vector.load %arg12[%c0_47, %c0_48] : memref<8x32xbf16, #tpu.memory_space<vmem>>, vector<8x32xbf16>
    %c0_49 = arith.constant 0 : index
    %c0_50 = arith.constant 0 : index
    %65 = vector.load %arg13[%c0_49, %c0_50] : memref<32x64xbf16, #tpu.memory_space<vmem>>, vector<32x64xbf16>
    %cst_51 = arith.constant dense<0.000000e+00> : vector<8x64xf32>
    %66 = tpu.matmul %64, %65, %cst_51 {dimension_numbers = #tpu.dot_dimension_numbers<[1], [0], [0], [1], [0, 0, 1, 1], [], []>} : vector<8x32xbf16>, vector<32x64xbf16>, vector<8x64xf32> -> vector<8x64xf32>
    %67 = vector.broadcast %63 : vector<1x64xf32> to vector<8x64xf32>
    %68 = arith.addf %67, %66 : vector<8x64xf32>
    %69 = math.tanh %68 : vector<8x64xf32>
    %70 = arith.truncf %69 : vector<8x64xf32> to vector<8x64xbf16>
    %cst_52 = arith.constant 0.000000e+00 : f32
    %71 = vector.broadcast %cst_52 : f32 to vector<8x1xf32>
    %c0_53 = arith.constant 0 : index
    %c0_54 = arith.constant 0 : index
    %c0_55 = arith.constant 0 : index
    %72 = vector.load %arg15[%c0_53, %c0_54, %c0_55] : memref<2x64x1xbf16, #tpu.memory_space<vmem>>, vector<1x64x1xbf16>
    %73 = vector.shape_cast %72 : vector<1x64x1xbf16> to vector<64x1xbf16>
    %cst_56 = arith.constant dense<0.000000e+00> : vector<8x1xf32>
    %74 = tpu.matmul %70, %73, %cst_56 {dimension_numbers = #tpu.dot_dimension_numbers<[1], [0], [0], [1], [0, 0, 1, 1], [], []>} : vector<8x64xbf16>, vector<64x1xbf16>, vector<8x1xf32> -> vector<8x1xf32>
    %c0_57 = arith.constant 0 : index
    %c0_58 = arith.constant 0 : index
    %c0_59 = arith.constant 0 : index
    %75 = vector.load %arg16[%c0_57, %c0_58, %c0_59] : memref<2x1x1xf32, #tpu.memory_space<vmem>>, vector<1x1x1xf32>
    %76 = vector.shape_cast %75 : vector<1x1x1xf32> to vector<1x1xf32>
    %77 = vector.broadcast %76 : vector<1x1xf32> to vector<8x1xf32>
    %78 = arith.addf %74, %77 : vector<8x1xf32>
    %c0_60 = arith.constant 0 : index
    %c0_61 = arith.constant 0 : index
    %c0_62 = arith.constant 0 : index
    %79 = vector.load %arg17[%c0_60, %c0_61, %c0_62] : memref<2x64x1xbf16, #tpu.memory_space<vmem>>, vector<1x64x1xbf16>
    %80 = vector.shape_cast %79 : vector<1x64x1xbf16> to vector<64x1xbf16>
    %cst_63 = arith.constant dense<0.000000e+00> : vector<8x1xf32>
    %81 = tpu.matmul %70, %80, %cst_63 {dimension_numbers = #tpu.dot_dimension_numbers<[1], [0], [0], [1], [0, 0, 1, 1], [], []>} : vector<8x64xbf16>, vector<64x1xbf16>, vector<8x1xf32> -> vector<8x1xf32>
    %c0_64 = arith.constant 0 : index
    %c0_65 = arith.constant 0 : index
    %c0_66 = arith.constant 0 : index
    %82 = vector.load %arg18[%c0_64, %c0_65, %c0_66] : memref<2x1x1xf32, #tpu.memory_space<vmem>>, vector<1x1x1xf32>
    %83 = vector.shape_cast %82 : vector<1x1x1xf32> to vector<1x1xf32>
    %84 = vector.broadcast %83 : vector<1x1xf32> to vector<8x1xf32>
    %85 = arith.addf %81, %84 : vector<8x1xf32>
    %c0_67 = arith.constant 0 : index
    %86 = memref.load %arg10[%c0_67] : memref<2xf32, #tpu.memory_space<smem>>
    %87 = math.tanh %78 : vector<8x1xf32>
    %88 = vector.broadcast %86 : f32 to vector<8x1xf32>
    %89 = arith.mulf %88, %87 : vector<8x1xf32>
    %90 = math.exp %89 : vector<8x1xf32>
    %91 = arith.addf %62, %85 : vector<8x1xf32>
    %92 = arith.mulf %91, %90 : vector<8x1xf32>
    %cst_68 = arith.constant 9.99999968E-21 : f32
    %93 = vector.broadcast %cst_68 : f32 to vector<8x1xf32>
    %94 = arith.addf %90, %93 : vector<8x1xf32>
    %95 = math.log %94 : vector<8x1xf32>
    %96 = arith.addf %71, %95 : vector<8x1xf32>
    %c1_69 = arith.constant 1 : index
    %c0_70 = arith.constant 0 : index
    %c0_71 = arith.constant 0 : index
    %97 = vector.load %arg15[%c1_69, %c0_70, %c0_71] : memref<2x64x1xbf16, #tpu.memory_space<vmem>>, vector<1x64x1xbf16>
    %98 = vector.shape_cast %97 : vector<1x64x1xbf16> to vector<64x1xbf16>
    %cst_72 = arith.constant dense<0.000000e+00> : vector<8x1xf32>
    %99 = tpu.matmul %70, %98, %cst_72 {dimension_numbers = #tpu.dot_dimension_numbers<[1], [0], [0], [1], [0, 0, 1, 1], [], []>} : vector<8x64xbf16>, vector<64x1xbf16>, vector<8x1xf32> -> vector<8x1xf32>
    %c1_73 = arith.constant 1 : index
    %c0_74 = arith.constant 0 : index
    %c0_75 = arith.constant 0 : index
    %100 = vector.load %arg16[%c1_73, %c0_74, %c0_75] : memref<2x1x1xf32, #tpu.memory_space<vmem>>, vector<1x1x1xf32>
    %101 = vector.shape_cast %100 : vector<1x1x1xf32> to vector<1x1xf32>
    %102 = vector.broadcast %101 : vector<1x1xf32> to vector<8x1xf32>
    %103 = arith.addf %99, %102 : vector<8x1xf32>
    %c1_76 = arith.constant 1 : index
    %c0_77 = arith.constant 0 : index
    %c0_78 = arith.constant 0 : index
    %104 = vector.load %arg17[%c1_76, %c0_77, %c0_78] : memref<2x64x1xbf16, #tpu.memory_space<vmem>>, vector<1x64x1xbf16>
    %105 = vector.shape_cast %104 : vector<1x64x1xbf16> to vector<64x1xbf16>
    %cst_79 = arith.constant dense<0.000000e+00> : vector<8x1xf32>
    %106 = tpu.matmul %70, %105, %cst_79 {dimension_numbers = #tpu.dot_dimension_numbers<[1], [0], [0], [1], [0, 0, 1, 1], [], []>} : vector<8x64xbf16>, vector<64x1xbf16>, vector<8x1xf32> -> vector<8x1xf32>
    %c1_80 = arith.constant 1 : index
    %c0_81 = arith.constant 0 : index
    %c0_82 = arith.constant 0 : index
    %107 = vector.load %arg18[%c1_80, %c0_81, %c0_82] : memref<2x1x1xf32, #tpu.memory_space<vmem>>, vector<1x1x1xf32>
    %108 = vector.shape_cast %107 : vector<1x1x1xf32> to vector<1x1xf32>
    %109 = vector.broadcast %108 : vector<1x1xf32> to vector<8x1xf32>
    %110 = arith.addf %106, %109 : vector<8x1xf32>
    %c1_83 = arith.constant 1 : index
    %111 = memref.load %arg10[%c1_83] : memref<2xf32, #tpu.memory_space<smem>>
    %112 = math.tanh %103 : vector<8x1xf32>
    %113 = vector.broadcast %111 : f32 to vector<8x1xf32>
    %114 = arith.mulf %113, %112 : vector<8x1xf32>
    %115 = math.exp %114 : vector<8x1xf32>
    %116 = arith.addf %92, %110 : vector<8x1xf32>
    %117 = arith.mulf %116, %115 : vector<8x1xf32>
    %cst_84 = arith.constant 9.99999968E-21 : f32
    %118 = vector.broadcast %cst_84 : f32 to vector<8x1xf32>
    %119 = arith.addf %115, %118 : vector<8x1xf32>
    %120 = math.log %119 : vector<8x1xf32>
    %121 = arith.addf %96, %120 : vector<8x1xf32>
    %c0_85 = arith.constant 0 : index
    %c0_86 = arith.constant 0 : index
    %122 = vector.load %arg21[%c0_85, %c0_86] : memref<8x1xf32, #tpu.memory_space<vmem>>, vector<8x1xf32>
    tpu.vector_store %arg21[%c0_85, %c0_86], %117 {strides = array<i32>} : memref<8x1xf32, #tpu.memory_space<vmem>>, vector<8x1xf32>,
    %c0_87 = arith.constant 0 : index
    %c0_88 = arith.constant 0 : index
    %123 = vector.load %arg22[%c0_87, %c0_88] : memref<8x1xf32, #tpu.memory_space<vmem>>, vector<8x1xf32>
    tpu.vector_store %arg22[%c0_87, %c0_88], %121 {strides = array<i32>} : memref<8x1xf32, #tpu.memory_space<vmem>>, vector<8x1xf32>,
    return
  }
  func.func @transform_0(%arg0: i32) -> i32 {
    %c0_i32 = arith.constant 0 : i32
    %c0_i32_0 = arith.constant 0 : i32
    return %c0_i32 : i32
  }
  func.func @transform_1(%arg0: i32) -> (i32, i32) {
    %c0_i32 = arith.constant 0 : i32
    %c0_i32_0 = arith.constant 0 : i32
    return %arg0, %c0_i32 : i32, i32
  }
  func.func @transform_2(%arg0: i32) -> (i32, i32) {
    %c0_i32 = arith.constant 0 : i32
    %c0_i32_0 = arith.constant 0 : i32
    return %arg0, %c0_i32 : i32, i32
  }
  func.func @transform_3(%arg0: i32) -> (i32, i32) {
    %c0_i32 = arith.constant 0 : i32
    %c0_i32_0 = arith.constant 0 : i32
    %c0_i32_1 = arith.constant 0 : i32
    return %c0_i32, %c0_i32_0 : i32, i32
  }
  func.func @transform_4(%arg0: i32) -> (i32, i32) {
    %c0_i32 = arith.constant 0 : i32
    %c0_i32_0 = arith.constant 0 : i32
    %c0_i32_1 = arith.constant 0 : i32
    return %c0_i32, %c0_i32_0 : i32, i32
  }
  func.func @transform_5(%arg0: i32) -> (i32, i32, i32) {
    %c0_i32 = arith.constant 0 : i32
    %c0_i32_0 = arith.constant 0 : i32
    %c0_i32_1 = arith.constant 0 : i32
    %c0_i32_2 = arith.constant 0 : i32
    return %c0_i32, %c0_i32_0, %c0_i32_1 : i32, i32, i32
  }
  func.func @transform_6(%arg0: i32) -> (i32, i32, i32) {
    %c0_i32 = arith.constant 0 : i32
    %c0_i32_0 = arith.constant 0 : i32
    %c0_i32_1 = arith.constant 0 : i32
    %c0_i32_2 = arith.constant 0 : i32
    return %c0_i32, %c0_i32_0, %c0_i32_1 : i32, i32, i32
  }
  func.func @transform_7(%arg0: i32) -> (i32, i32, i32) {
    %c0_i32 = arith.constant 0 : i32
    %c0_i32_0 = arith.constant 0 : i32
    %c0_i32_1 = arith.constant 0 : i32
    %c0_i32_2 = arith.constant 0 : i32
    return %c0_i32, %c0_i32_0, %c0_i32_1 : i32, i32, i32
  }
  func.func @transform_8(%arg0: i32) -> (i32, i32, i32) {
    %c0_i32 = arith.constant 0 : i32
    %c0_i32_0 = arith.constant 0 : i32
    %c0_i32_1 = arith.constant 0 : i32
    %c0_i32_2 = arith.constant 0 : i32
    return %c0_i32, %c0_i32_0, %c0_i32_1 : i32, i32, i32
  }
  func.func @transform_9(%arg0: i32) -> i32 {
    %c0_i32 = arith.constant 0 : i32
    %c0_i32_0 = arith.constant 0 : i32
    return %c0_i32 : i32
  }
  func.func @transform_10(%arg0: i32) -> (i32, i32) {
    %c0_i32 = arith.constant 0 : i32
    %c0_i32_0 = arith.constant 0 : i32
    return %arg0, %c0_i32 : i32, i32
  }
  func.func @transform_11(%arg0: i32) -> (i32, i32) {
    %c0_i32 = arith.constant 0 : i32
    %c0_i32_0 = arith.constant 0 : i32
    return %arg0, %c0_i32 : i32, i32
  }
  func.func @transform_12(%arg0: i32) -> (i32, i32) {
    %c0_i32 = arith.constant 0 : i32
    %c0_i32_0 = arith.constant 0 : i32
    %c0_i32_1 = arith.constant 0 : i32
    return %c0_i32, %c0_i32_0 : i32, i32
  }
  func.func @transform_13(%arg0: i32) -> (i32, i32) {
    %c0_i32 = arith.constant 0 : i32
    %c0_i32_0 = arith.constant 0 : i32
    %c0_i32_1 = arith.constant 0 : i32
    return %c0_i32, %c0_i32_0 : i32, i32
  }
  func.func @transform_14(%arg0: i32) -> (i32, i32, i32) {
    %c0_i32 = arith.constant 0 : i32
    %c0_i32_0 = arith.constant 0 : i32
    %c0_i32_1 = arith.constant 0 : i32
    %c0_i32_2 = arith.constant 0 : i32
    return %c0_i32, %c0_i32_0, %c0_i32_1 : i32, i32, i32
  }
  func.func @transform_15(%arg0: i32) -> (i32, i32, i32) {
    %c0_i32 = arith.constant 0 : i32
    %c0_i32_0 = arith.constant 0 : i32
    %c0_i32_1 = arith.constant 0 : i32
    %c0_i32_2 = arith.constant 0 : i32
    return %c0_i32, %c0_i32_0, %c0_i32_1 : i32, i32, i32
  }
  func.func @transform_16(%arg0: i32) -> (i32, i32, i32) {
    %c0_i32 = arith.constant 0 : i32
    %c0_i32_0 = arith.constant 0 : i32
    %c0_i32_1 = arith.constant 0 : i32
    %c0_i32_2 = arith.constant 0 : i32
    return %c0_i32, %c0_i32_0, %c0_i32_1 : i32, i32, i32
  }
  func.func @transform_17(%arg0: i32) -> (i32, i32, i32) {
    %c0_i32 = arith.constant 0 : i32
    %c0_i32_0 = arith.constant 0 : i32
    %c0_i32_1 = arith.constant 0 : i32
    %c0_i32_2 = arith.constant 0 : i32
    return %c0_i32, %c0_i32_0, %c0_i32_1 : i32, i32, i32
  }
  func.func @transform_18(%arg0: i32) -> (i32, i32) {
    %c0_i32 = arith.constant 0 : i32
    %c0_i32_0 = arith.constant 0 : i32
    return %arg0, %c0_i32 : i32, i32
  }
  func.func @transform_19(%arg0: i32) -> (i32, i32) {
    %c0_i32 = arith.constant 0 : i32
    %c0_i32_0 = arith.constant 0 : i32
    return %arg0, %c0_i32 : i32, i32
  }
  func.func @transform_20(%arg0: i32) -> (i32, i32) {
    %c0_i32 = arith.constant 0 : i32
    %c0_i32_0 = arith.constant 0 : i32
    return %arg0, %c0_i32 : i32, i32
  }
  func.func @transform_21(%arg0: i32) -> (i32, i32) {
    %c0_i32 = arith.constant 0 : i32
    %c0_i32_0 = arith.constant 0 : i32
    return %arg0, %c0_i32 : i32, i32
  }
}

module attributes {stable_mosaic.version = 11 : i64} {
  func.func @_angle_head_mul_kernel(%arg0: i32, %arg1: memref<16x1xf32, #tpu.memory_space<vmem>>, %arg2: memref<16x1xf32, #tpu.memory_space<vmem>>, %arg3: memref<16x32xf32, #tpu.memory_space<vmem>>, %arg4: memref<1x6xf32, #tpu.memory_space<vmem>>, %arg5: memref<7x6x32xbf16, #tpu.memory_space<vmem>>, %arg6: memref<1x32xf32, #tpu.memory_space<vmem>>, %arg7: memref<32x32xbf16, #tpu.memory_space<vmem>>, %arg8: memref<1x32xf32, #tpu.memory_space<vmem>>, %arg9: memref<16x32xf32, #tpu.memory_space<vmem>>) attributes {dimension_semantics = [#tpu.dimension_semantics<parallel>], iteration_bounds = array<i64: 1>, scalar_prefetch = 0 : i64, scratch_operands = 0 : i64, tpu.core_type = #tpu.core_type<tc>, window_params = [{transform_indices = @transform_0, window_bounds = array<i64: 16, 1>}, {transform_indices = @transform_1, window_bounds = array<i64: 16, 1>}, {transform_indices = @transform_2, window_bounds = array<i64: 16, 32>}, {pipeline_mode = #tpu.pipeline_mode<synchronous>, transform_indices = @transform_3, window_bounds = array<i64: 1, 6>}, {pipeline_mode = #tpu.pipeline_mode<synchronous>, transform_indices = @transform_4, window_bounds = array<i64: 7, 6, 32>}, {pipeline_mode = #tpu.pipeline_mode<synchronous>, transform_indices = @transform_5, window_bounds = array<i64: 1, 32>}, {pipeline_mode = #tpu.pipeline_mode<synchronous>, transform_indices = @transform_6, window_bounds = array<i64: 32, 32>}, {pipeline_mode = #tpu.pipeline_mode<synchronous>, transform_indices = @transform_7, window_bounds = array<i64: 1, 32>}, {transform_indices = @transform_8, window_bounds = array<i64: 16, 32>}]} {
    %c0 = arith.constant 0 : index
    %c0_0 = arith.constant 0 : index
    %0 = vector.load %arg1[%c0, %c0_0] : memref<16x1xf32, #tpu.memory_space<vmem>>, vector<16x1xf32>
    %c0_1 = arith.constant 0 : index
    %c0_2 = arith.constant 0 : index
    %1 = vector.load %arg2[%c0_1, %c0_2] : memref<16x1xf32, #tpu.memory_space<vmem>>, vector<16x1xf32>
    %c0_3 = arith.constant 0 : index
    %c0_4 = arith.constant 0 : index
    %2 = vector.load %arg4[%c0_3, %c0_4] : memref<1x6xf32, #tpu.memory_space<vmem>>, vector<1x6xf32>
    %3 = vector.broadcast %0 : vector<16x1xf32> to vector<16x6xf32>
    %4 = vector.broadcast %2 : vector<1x6xf32> to vector<16x6xf32>
    %5 = arith.subf %3, %4 : vector<16x6xf32>
    %6 = arith.mulf %5, %5 : vector<16x6xf32>
    %cst = arith.constant -1.000000e+00 : f32
    %7 = vector.broadcast %cst : f32 to vector<16x6xf32>
    %8 = arith.mulf %7, %6 : vector<16x6xf32>
    %9 = math.exp %8 : vector<16x6xf32>
    %10 = arith.truncf %9 : vector<16x6xf32> to vector<16x6xbf16>
    %c0_5 = arith.constant 0 : index
    %c0_6 = arith.constant 0 : index
    %11 = vector.load %arg6[%c0_5, %c0_6] : memref<1x32xf32, #tpu.memory_space<vmem>>, vector<1x32xf32>
    %c0_7 = arith.constant 0 : index
    %c0_8 = arith.constant 0 : index
    %c0_9 = arith.constant 0 : index
    %12 = vector.load %arg5[%c0_7, %c0_8, %c0_9] : memref<7x6x32xbf16, #tpu.memory_space<vmem>>, vector<1x6x32xbf16>
    %13 = vector.shape_cast %12 : vector<1x6x32xbf16> to vector<6x32xbf16>
    %cst_10 = arith.constant dense<0.000000e+00> : vector<16x32xf32>
    %14 = tpu.matmul %10, %13, %cst_10 {dimension_numbers = #tpu.dot_dimension_numbers<[1], [0], [0], [1], [0, 0, 1, 1], [], []>} : vector<16x6xbf16>, vector<6x32xbf16>, vector<16x32xf32> -> vector<16x32xf32>
    %cst_11 = arith.constant 0.000000e+00 : f32
    %15 = vector.broadcast %cst_11 : f32 to vector<16x1xf32>
    %16 = arith.mulf %15, %1 : vector<16x1xf32>
    %17 = math.cos %16 : vector<16x1xf32>
    %18 = vector.broadcast %17 : vector<16x1xf32> to vector<16x32xf32>
    %19 = arith.mulf %18, %14 : vector<16x32xf32>
    %20 = vector.broadcast %11 : vector<1x32xf32> to vector<16x32xf32>
    %21 = arith.addf %20, %19 : vector<16x32xf32>
    %c1 = arith.constant 1 : index
    %c0_12 = arith.constant 0 : index
    %c0_13 = arith.constant 0 : index
    %22 = vector.load %arg5[%c1, %c0_12, %c0_13] : memref<7x6x32xbf16, #tpu.memory_space<vmem>>, vector<1x6x32xbf16>
    %23 = vector.shape_cast %22 : vector<1x6x32xbf16> to vector<6x32xbf16>
    %cst_14 = arith.constant dense<0.000000e+00> : vector<16x32xf32>
    %24 = tpu.matmul %10, %23, %cst_14 {dimension_numbers = #tpu.dot_dimension_numbers<[1], [0], [0], [1], [0, 0, 1, 1], [], []>} : vector<16x6xbf16>, vector<6x32xbf16>, vector<16x32xf32> -> vector<16x32xf32>
    %cst_15 = arith.constant 1.000000e+00 : f32
    %25 = vector.broadcast %cst_15 : f32 to vector<16x1xf32>
    %26 = arith.mulf %25, %1 : vector<16x1xf32>
    %27 = math.cos %26 : vector<16x1xf32>
    %28 = vector.broadcast %27 : vector<16x1xf32> to vector<16x32xf32>
    %29 = arith.mulf %28, %24 : vector<16x32xf32>
    %30 = arith.addf %21, %29 : vector<16x32xf32>
    %c2 = arith.constant 2 : index
    %c0_16 = arith.constant 0 : index
    %c0_17 = arith.constant 0 : index
    %31 = vector.load %arg5[%c2, %c0_16, %c0_17] : memref<7x6x32xbf16, #tpu.memory_space<vmem>>, vector<1x6x32xbf16>
    %32 = vector.shape_cast %31 : vector<1x6x32xbf16> to vector<6x32xbf16>
    %cst_18 = arith.constant dense<0.000000e+00> : vector<16x32xf32>
    %33 = tpu.matmul %10, %32, %cst_18 {dimension_numbers = #tpu.dot_dimension_numbers<[1], [0], [0], [1], [0, 0, 1, 1], [], []>} : vector<16x6xbf16>, vector<6x32xbf16>, vector<16x32xf32> -> vector<16x32xf32>
    %cst_19 = arith.constant 2.000000e+00 : f32
    %34 = vector.broadcast %cst_19 : f32 to vector<16x1xf32>
    %35 = arith.mulf %34, %1 : vector<16x1xf32>
    %36 = math.cos %35 : vector<16x1xf32>
    %37 = vector.broadcast %36 : vector<16x1xf32> to vector<16x32xf32>
    %38 = arith.mulf %37, %33 : vector<16x32xf32>
    %39 = arith.addf %30, %38 : vector<16x32xf32>
    %c3 = arith.constant 3 : index
    %c0_20 = arith.constant 0 : index
    %c0_21 = arith.constant 0 : index
    %40 = vector.load %arg5[%c3, %c0_20, %c0_21] : memref<7x6x32xbf16, #tpu.memory_space<vmem>>, vector<1x6x32xbf16>
    %41 = vector.shape_cast %40 : vector<1x6x32xbf16> to vector<6x32xbf16>
    %cst_22 = arith.constant dense<0.000000e+00> : vector<16x32xf32>
    %42 = tpu.matmul %10, %41, %cst_22 {dimension_numbers = #tpu.dot_dimension_numbers<[1], [0], [0], [1], [0, 0, 1, 1], [], []>} : vector<16x6xbf16>, vector<6x32xbf16>, vector<16x32xf32> -> vector<16x32xf32>
    %cst_23 = arith.constant 3.000000e+00 : f32
    %43 = vector.broadcast %cst_23 : f32 to vector<16x1xf32>
    %44 = arith.mulf %43, %1 : vector<16x1xf32>
    %45 = math.cos %44 : vector<16x1xf32>
    %46 = vector.broadcast %45 : vector<16x1xf32> to vector<16x32xf32>
    %47 = arith.mulf %46, %42 : vector<16x32xf32>
    %48 = arith.addf %39, %47 : vector<16x32xf32>
    %c4 = arith.constant 4 : index
    %c0_24 = arith.constant 0 : index
    %c0_25 = arith.constant 0 : index
    %49 = vector.load %arg5[%c4, %c0_24, %c0_25] : memref<7x6x32xbf16, #tpu.memory_space<vmem>>, vector<1x6x32xbf16>
    %50 = vector.shape_cast %49 : vector<1x6x32xbf16> to vector<6x32xbf16>
    %cst_26 = arith.constant dense<0.000000e+00> : vector<16x32xf32>
    %51 = tpu.matmul %10, %50, %cst_26 {dimension_numbers = #tpu.dot_dimension_numbers<[1], [0], [0], [1], [0, 0, 1, 1], [], []>} : vector<16x6xbf16>, vector<6x32xbf16>, vector<16x32xf32> -> vector<16x32xf32>
    %cst_27 = arith.constant 4.000000e+00 : f32
    %52 = vector.broadcast %cst_27 : f32 to vector<16x1xf32>
    %53 = arith.mulf %52, %1 : vector<16x1xf32>
    %54 = math.cos %53 : vector<16x1xf32>
    %55 = vector.broadcast %54 : vector<16x1xf32> to vector<16x32xf32>
    %56 = arith.mulf %55, %51 : vector<16x32xf32>
    %57 = arith.addf %48, %56 : vector<16x32xf32>
    %c5 = arith.constant 5 : index
    %c0_28 = arith.constant 0 : index
    %c0_29 = arith.constant 0 : index
    %58 = vector.load %arg5[%c5, %c0_28, %c0_29] : memref<7x6x32xbf16, #tpu.memory_space<vmem>>, vector<1x6x32xbf16>
    %59 = vector.shape_cast %58 : vector<1x6x32xbf16> to vector<6x32xbf16>
    %cst_30 = arith.constant dense<0.000000e+00> : vector<16x32xf32>
    %60 = tpu.matmul %10, %59, %cst_30 {dimension_numbers = #tpu.dot_dimension_numbers<[1], [0], [0], [1], [0, 0, 1, 1], [], []>} : vector<16x6xbf16>, vector<6x32xbf16>, vector<16x32xf32> -> vector<16x32xf32>
    %cst_31 = arith.constant 5.000000e+00 : f32
    %61 = vector.broadcast %cst_31 : f32 to vector<16x1xf32>
    %62 = arith.mulf %61, %1 : vector<16x1xf32>
    %63 = math.cos %62 : vector<16x1xf32>
    %64 = vector.broadcast %63 : vector<16x1xf32> to vector<16x32xf32>
    %65 = arith.mulf %64, %60 : vector<16x32xf32>
    %66 = arith.addf %57, %65 : vector<16x32xf32>
    %c6 = arith.constant 6 : index
    %c0_32 = arith.constant 0 : index
    %c0_33 = arith.constant 0 : index
    %67 = vector.load %arg5[%c6, %c0_32, %c0_33] : memref<7x6x32xbf16, #tpu.memory_space<vmem>>, vector<1x6x32xbf16>
    %68 = vector.shape_cast %67 : vector<1x6x32xbf16> to vector<6x32xbf16>
    %cst_34 = arith.constant dense<0.000000e+00> : vector<16x32xf32>
    %69 = tpu.matmul %10, %68, %cst_34 {dimension_numbers = #tpu.dot_dimension_numbers<[1], [0], [0], [1], [0, 0, 1, 1], [], []>} : vector<16x6xbf16>, vector<6x32xbf16>, vector<16x32xf32> -> vector<16x32xf32>
    %cst_35 = arith.constant 6.000000e+00 : f32
    %70 = vector.broadcast %cst_35 : f32 to vector<16x1xf32>
    %71 = arith.mulf %70, %1 : vector<16x1xf32>
    %72 = math.cos %71 : vector<16x1xf32>
    %73 = vector.broadcast %72 : vector<16x1xf32> to vector<16x32xf32>
    %74 = arith.mulf %73, %69 : vector<16x32xf32>
    %75 = arith.addf %66, %74 : vector<16x32xf32>
    %cst_36 = arith.constant 0.000000e+00 : f32
    %76 = vector.broadcast %cst_36 : f32 to vector<16x32xf32>
    %77 = arith.maximumf %75, %76 : vector<16x32xf32>
    %78 = arith.truncf %77 : vector<16x32xf32> to vector<16x32xbf16>
    %c0_37 = arith.constant 0 : index
    %c0_38 = arith.constant 0 : index
    %79 = vector.load %arg7[%c0_37, %c0_38] : memref<32x32xbf16, #tpu.memory_space<vmem>>, vector<32x32xbf16>
    %cst_39 = arith.constant dense<0.000000e+00> : vector<16x32xf32>
    %80 = tpu.matmul %78, %79, %cst_39 {dimension_numbers = #tpu.dot_dimension_numbers<[1], [0], [0], [1], [0, 0, 1, 1], [], []>} : vector<16x32xbf16>, vector<32x32xbf16>, vector<16x32xf32> -> vector<16x32xf32>
    %c0_40 = arith.constant 0 : index
    %c0_41 = arith.constant 0 : index
    %81 = vector.load %arg8[%c0_40, %c0_41] : memref<1x32xf32, #tpu.memory_space<vmem>>, vector<1x32xf32>
    %82 = vector.broadcast %81 : vector<1x32xf32> to vector<16x32xf32>
    %83 = arith.addf %80, %82 : vector<16x32xf32>
    %c0_42 = arith.constant 0 : index
    %c0_43 = arith.constant 0 : index
    %84 = vector.load %arg3[%c0_42, %c0_43] : memref<16x32xf32, #tpu.memory_space<vmem>>, vector<16x32xf32>
    %85 = arith.mulf %84, %83 : vector<16x32xf32>
    %c0_44 = arith.constant 0 : index
    %c0_45 = arith.constant 0 : index
    %86 = vector.load %arg9[%c0_44, %c0_45] : memref<16x32xf32, #tpu.memory_space<vmem>>, vector<16x32xf32>
    tpu.vector_store %arg9[%c0_44, %c0_45], %85 {strides = array<i32>} : memref<16x32xf32, #tpu.memory_space<vmem>>, vector<16x32xf32>,
    return
  }
  func.func @transform_0(%arg0: i32) -> (i32, i32) {
    %c0_i32 = arith.constant 0 : i32
    %c0_i32_0 = arith.constant 0 : i32
    return %arg0, %c0_i32 : i32, i32
  }
  func.func @transform_1(%arg0: i32) -> (i32, i32) {
    %c0_i32 = arith.constant 0 : i32
    %c0_i32_0 = arith.constant 0 : i32
    return %arg0, %c0_i32 : i32, i32
  }
  func.func @transform_2(%arg0: i32) -> (i32, i32) {
    %c0_i32 = arith.constant 0 : i32
    %c0_i32_0 = arith.constant 0 : i32
    return %arg0, %c0_i32 : i32, i32
  }
  func.func @transform_3(%arg0: i32) -> (i32, i32) {
    %c0_i32 = arith.constant 0 : i32
    %c0_i32_0 = arith.constant 0 : i32
    %c0_i32_1 = arith.constant 0 : i32
    return %c0_i32, %c0_i32_0 : i32, i32
  }
  func.func @transform_4(%arg0: i32) -> (i32, i32, i32) {
    %c0_i32 = arith.constant 0 : i32
    %c0_i32_0 = arith.constant 0 : i32
    %c0_i32_1 = arith.constant 0 : i32
    %c0_i32_2 = arith.constant 0 : i32
    return %c0_i32, %c0_i32_0, %c0_i32_1 : i32, i32, i32
  }
  func.func @transform_5(%arg0: i32) -> (i32, i32) {
    %c0_i32 = arith.constant 0 : i32
    %c0_i32_0 = arith.constant 0 : i32
    %c0_i32_1 = arith.constant 0 : i32
    return %c0_i32, %c0_i32_0 : i32, i32
  }
  func.func @transform_6(%arg0: i32) -> (i32, i32) {
    %c0_i32 = arith.constant 0 : i32
    %c0_i32_0 = arith.constant 0 : i32
    %c0_i32_1 = arith.constant 0 : i32
    return %c0_i32, %c0_i32_0 : i32, i32
  }
  func.func @transform_7(%arg0: i32) -> (i32, i32) {
    %c0_i32 = arith.constant 0 : i32
    %c0_i32_0 = arith.constant 0 : i32
    %c0_i32_1 = arith.constant 0 : i32
    return %c0_i32, %c0_i32_0 : i32, i32
  }
  func.func @transform_8(%arg0: i32) -> (i32, i32) {
    %c0_i32 = arith.constant 0 : i32
    %c0_i32_0 = arith.constant 0 : i32
    return %arg0, %c0_i32 : i32, i32
  }
}

module attributes {stable_mosaic.version = 11 : i64} {
  func.func @_single_flow_kernel(%arg0: i32, %arg1: memref<2xf32, #tpu.memory_space<smem>>, %arg2: memref<8x1xf32, #tpu.memory_space<vmem>>, %arg3: memref<8x32xbf16, #tpu.memory_space<vmem>>, %arg4: memref<8x32xbf16, #tpu.memory_space<vmem>>, %arg5: memref<8x32xbf16, #tpu.memory_space<vmem>>, %arg6: memref<32x64xbf16, #tpu.memory_space<vmem>>, %arg7: memref<32x64xbf16, #tpu.memory_space<vmem>>, %arg8: memref<32x64xbf16, #tpu.memory_space<vmem>>, %arg9: memref<1x64xf32, #tpu.memory_space<vmem>>, %arg10: memref<2x64x1xbf16, #tpu.memory_space<vmem>>, %arg11: memref<2x1x1xf32, #tpu.memory_space<vmem>>, %arg12: memref<2x64x1xbf16, #tpu.memory_space<vmem>>, %arg13: memref<2x1x1xf32, #tpu.memory_space<vmem>>, %arg14: memref<8x1xf32, #tpu.memory_space<vmem>>, %arg15: memref<8x1xf32, #tpu.memory_space<vmem>>) attributes {dimension_semantics = [#tpu.dimension_semantics<parallel>], iteration_bounds = array<i64: 1>, scalar_prefetch = 0 : i64, scratch_operands = 0 : i64, tpu.core_type = #tpu.core_type<tc>, window_params = [{transform_indices = @transform_0, window_bounds = array<i64: 2>}, {transform_indices = @transform_1, window_bounds = array<i64: 8, 1>}, {transform_indices = @transform_2, window_bounds = array<i64: 8, 32>}, {transform_indices = @transform_3, window_bounds = array<i64: 8, 32>}, {transform_indices = @transform_4, window_bounds = array<i64: 8, 32>}, {pipeline_mode = #tpu.pipeline_mode<synchronous>, transform_indices = @transform_5, window_bounds = array<i64: 32, 64>}, {pipeline_mode = #tpu.pipeline_mode<synchronous>, transform_indices = @transform_6, window_bounds = array<i64: 32, 64>}, {pipeline_mode = #tpu.pipeline_mode<synchronous>, transform_indices = @transform_7, window_bounds = array<i64: 32, 64>}, {pipeline_mode = #tpu.pipeline_mode<synchronous>, transform_indices = @transform_8, window_bounds = array<i64: 1, 64>}, {pipeline_mode = #tpu.pipeline_mode<synchronous>, transform_indices = @transform_9, window_bounds = array<i64: 2, 64, 1>}, {pipeline_mode = #tpu.pipeline_mode<synchronous>, transform_indices = @transform_10, window_bounds = array<i64: 2, 1, 1>}, {pipeline_mode = #tpu.pipeline_mode<synchronous>, transform_indices = @transform_11, window_bounds = array<i64: 2, 64, 1>}, {pipeline_mode = #tpu.pipeline_mode<synchronous>, transform_indices = @transform_12, window_bounds = array<i64: 2, 1, 1>}, {transform_indices = @transform_13, window_bounds = array<i64: 8, 1>}, {transform_indices = @transform_14, window_bounds = array<i64: 8, 1>}]} {
    %c0 = arith.constant 0 : index
    %c0_0 = arith.constant 0 : index
    %0 = vector.load %arg2[%c0, %c0_0] : memref<8x1xf32, #tpu.memory_space<vmem>>, vector<8x1xf32>
    %c0_1 = arith.constant 0 : index
    %c0_2 = arith.constant 0 : index
    %1 = vector.load %arg9[%c0_1, %c0_2] : memref<1x64xf32, #tpu.memory_space<vmem>>, vector<1x64xf32>
    %c0_3 = arith.constant 0 : index
    %c0_4 = arith.constant 0 : index
    %2 = vector.load %arg3[%c0_3, %c0_4] : memref<8x32xbf16, #tpu.memory_space<vmem>>, vector<8x32xbf16>
    %c0_5 = arith.constant 0 : index
    %c0_6 = arith.constant 0 : index
    %3 = vector.load %arg6[%c0_5, %c0_6] : memref<32x64xbf16, #tpu.memory_space<vmem>>, vector<32x64xbf16>
    %cst = arith.constant dense<0.000000e+00> : vector<8x64xf32>
    %4 = tpu.matmul %2, %3, %cst {dimension_numbers = #tpu.dot_dimension_numbers<[1], [0], [0], [1], [0, 0, 1, 1], [], []>} : vector<8x32xbf16>, vector<32x64xbf16>, vector<8x64xf32> -> vector<8x64xf32>
    %5 = vector.broadcast %1 : vector<1x64xf32> to vector<8x64xf32>
    %6 = arith.addf %5, %4 : vector<8x64xf32>
    %c0_7 = arith.constant 0 : index
    %c0_8 = arith.constant 0 : index
    %7 = vector.load %arg4[%c0_7, %c0_8] : memref<8x32xbf16, #tpu.memory_space<vmem>>, vector<8x32xbf16>
    %c0_9 = arith.constant 0 : index
    %c0_10 = arith.constant 0 : index
    %8 = vector.load %arg7[%c0_9, %c0_10] : memref<32x64xbf16, #tpu.memory_space<vmem>>, vector<32x64xbf16>
    %cst_11 = arith.constant dense<0.000000e+00> : vector<8x64xf32>
    %9 = tpu.matmul %7, %8, %cst_11 {dimension_numbers = #tpu.dot_dimension_numbers<[1], [0], [0], [1], [0, 0, 1, 1], [], []>} : vector<8x32xbf16>, vector<32x64xbf16>, vector<8x64xf32> -> vector<8x64xf32>
    %10 = arith.addf %6, %9 : vector<8x64xf32>
    %c0_12 = arith.constant 0 : index
    %c0_13 = arith.constant 0 : index
    %11 = vector.load %arg5[%c0_12, %c0_13] : memref<8x32xbf16, #tpu.memory_space<vmem>>, vector<8x32xbf16>
    %c0_14 = arith.constant 0 : index
    %c0_15 = arith.constant 0 : index
    %12 = vector.load %arg8[%c0_14, %c0_15] : memref<32x64xbf16, #tpu.memory_space<vmem>>, vector<32x64xbf16>
    %cst_16 = arith.constant dense<0.000000e+00> : vector<8x64xf32>
    %13 = tpu.matmul %11, %12, %cst_16 {dimension_numbers = #tpu.dot_dimension_numbers<[1], [0], [0], [1], [0, 0, 1, 1], [], []>} : vector<8x32xbf16>, vector<32x64xbf16>, vector<8x64xf32> -> vector<8x64xf32>
    %14 = arith.addf %10, %13 : vector<8x64xf32>
    %15 = math.tanh %14 : vector<8x64xf32>
    %16 = arith.truncf %15 : vector<8x64xf32> to vector<8x64xbf16>
    %cst_17 = arith.constant 0.000000e+00 : f32
    %17 = vector.broadcast %cst_17 : f32 to vector<8x1xf32>
    %c0_18 = arith.constant 0 : index
    %c0_19 = arith.constant 0 : index
    %c0_20 = arith.constant 0 : index
    %18 = vector.load %arg10[%c0_18, %c0_19, %c0_20] : memref<2x64x1xbf16, #tpu.memory_space<vmem>>, vector<1x64x1xbf16>
    %19 = vector.shape_cast %18 : vector<1x64x1xbf16> to vector<64x1xbf16>
    %cst_21 = arith.constant dense<0.000000e+00> : vector<8x1xf32>
    %20 = tpu.matmul %16, %19, %cst_21 {dimension_numbers = #tpu.dot_dimension_numbers<[1], [0], [0], [1], [0, 0, 1, 1], [], []>} : vector<8x64xbf16>, vector<64x1xbf16>, vector<8x1xf32> -> vector<8x1xf32>
    %c0_22 = arith.constant 0 : index
    %c0_23 = arith.constant 0 : index
    %c0_24 = arith.constant 0 : index
    %21 = vector.load %arg11[%c0_22, %c0_23, %c0_24] : memref<2x1x1xf32, #tpu.memory_space<vmem>>, vector<1x1x1xf32>
    %22 = vector.shape_cast %21 : vector<1x1x1xf32> to vector<1x1xf32>
    %23 = vector.broadcast %22 : vector<1x1xf32> to vector<8x1xf32>
    %24 = arith.addf %20, %23 : vector<8x1xf32>
    %c0_25 = arith.constant 0 : index
    %c0_26 = arith.constant 0 : index
    %c0_27 = arith.constant 0 : index
    %25 = vector.load %arg12[%c0_25, %c0_26, %c0_27] : memref<2x64x1xbf16, #tpu.memory_space<vmem>>, vector<1x64x1xbf16>
    %26 = vector.shape_cast %25 : vector<1x64x1xbf16> to vector<64x1xbf16>
    %cst_28 = arith.constant dense<0.000000e+00> : vector<8x1xf32>
    %27 = tpu.matmul %16, %26, %cst_28 {dimension_numbers = #tpu.dot_dimension_numbers<[1], [0], [0], [1], [0, 0, 1, 1], [], []>} : vector<8x64xbf16>, vector<64x1xbf16>, vector<8x1xf32> -> vector<8x1xf32>
    %c0_29 = arith.constant 0 : index
    %c0_30 = arith.constant 0 : index
    %c0_31 = arith.constant 0 : index
    %28 = vector.load %arg13[%c0_29, %c0_30, %c0_31] : memref<2x1x1xf32, #tpu.memory_space<vmem>>, vector<1x1x1xf32>
    %29 = vector.shape_cast %28 : vector<1x1x1xf32> to vector<1x1xf32>
    %30 = vector.broadcast %29 : vector<1x1xf32> to vector<8x1xf32>
    %31 = arith.addf %27, %30 : vector<8x1xf32>
    %c0_32 = arith.constant 0 : index
    %32 = memref.load %arg1[%c0_32] : memref<2xf32, #tpu.memory_space<smem>>
    %33 = math.tanh %24 : vector<8x1xf32>
    %34 = vector.broadcast %32 : f32 to vector<8x1xf32>
    %35 = arith.mulf %34, %33 : vector<8x1xf32>
    %36 = math.exp %35 : vector<8x1xf32>
    %37 = arith.addf %0, %31 : vector<8x1xf32>
    %38 = arith.mulf %37, %36 : vector<8x1xf32>
    %cst_33 = arith.constant 9.99999968E-21 : f32
    %39 = vector.broadcast %cst_33 : f32 to vector<8x1xf32>
    %40 = arith.addf %36, %39 : vector<8x1xf32>
    %41 = math.log %40 : vector<8x1xf32>
    %42 = arith.addf %17, %41 : vector<8x1xf32>
    %c1 = arith.constant 1 : index
    %c0_34 = arith.constant 0 : index
    %c0_35 = arith.constant 0 : index
    %43 = vector.load %arg10[%c1, %c0_34, %c0_35] : memref<2x64x1xbf16, #tpu.memory_space<vmem>>, vector<1x64x1xbf16>
    %44 = vector.shape_cast %43 : vector<1x64x1xbf16> to vector<64x1xbf16>
    %cst_36 = arith.constant dense<0.000000e+00> : vector<8x1xf32>
    %45 = tpu.matmul %16, %44, %cst_36 {dimension_numbers = #tpu.dot_dimension_numbers<[1], [0], [0], [1], [0, 0, 1, 1], [], []>} : vector<8x64xbf16>, vector<64x1xbf16>, vector<8x1xf32> -> vector<8x1xf32>
    %c1_37 = arith.constant 1 : index
    %c0_38 = arith.constant 0 : index
    %c0_39 = arith.constant 0 : index
    %46 = vector.load %arg11[%c1_37, %c0_38, %c0_39] : memref<2x1x1xf32, #tpu.memory_space<vmem>>, vector<1x1x1xf32>
    %47 = vector.shape_cast %46 : vector<1x1x1xf32> to vector<1x1xf32>
    %48 = vector.broadcast %47 : vector<1x1xf32> to vector<8x1xf32>
    %49 = arith.addf %45, %48 : vector<8x1xf32>
    %c1_40 = arith.constant 1 : index
    %c0_41 = arith.constant 0 : index
    %c0_42 = arith.constant 0 : index
    %50 = vector.load %arg12[%c1_40, %c0_41, %c0_42] : memref<2x64x1xbf16, #tpu.memory_space<vmem>>, vector<1x64x1xbf16>
    %51 = vector.shape_cast %50 : vector<1x64x1xbf16> to vector<64x1xbf16>
    %cst_43 = arith.constant dense<0.000000e+00> : vector<8x1xf32>
    %52 = tpu.matmul %16, %51, %cst_43 {dimension_numbers = #tpu.dot_dimension_numbers<[1], [0], [0], [1], [0, 0, 1, 1], [], []>} : vector<8x64xbf16>, vector<64x1xbf16>, vector<8x1xf32> -> vector<8x1xf32>
    %c1_44 = arith.constant 1 : index
    %c0_45 = arith.constant 0 : index
    %c0_46 = arith.constant 0 : index
    %53 = vector.load %arg13[%c1_44, %c0_45, %c0_46] : memref<2x1x1xf32, #tpu.memory_space<vmem>>, vector<1x1x1xf32>
    %54 = vector.shape_cast %53 : vector<1x1x1xf32> to vector<1x1xf32>
    %55 = vector.broadcast %54 : vector<1x1xf32> to vector<8x1xf32>
    %56 = arith.addf %52, %55 : vector<8x1xf32>
    %c1_47 = arith.constant 1 : index
    %57 = memref.load %arg1[%c1_47] : memref<2xf32, #tpu.memory_space<smem>>
    %58 = math.tanh %49 : vector<8x1xf32>
    %59 = vector.broadcast %57 : f32 to vector<8x1xf32>
    %60 = arith.mulf %59, %58 : vector<8x1xf32>
    %61 = math.exp %60 : vector<8x1xf32>
    %62 = arith.addf %38, %56 : vector<8x1xf32>
    %63 = arith.mulf %62, %61 : vector<8x1xf32>
    %cst_48 = arith.constant 9.99999968E-21 : f32
    %64 = vector.broadcast %cst_48 : f32 to vector<8x1xf32>
    %65 = arith.addf %61, %64 : vector<8x1xf32>
    %66 = math.log %65 : vector<8x1xf32>
    %67 = arith.addf %42, %66 : vector<8x1xf32>
    %c0_49 = arith.constant 0 : index
    %c0_50 = arith.constant 0 : index
    %68 = vector.load %arg14[%c0_49, %c0_50] : memref<8x1xf32, #tpu.memory_space<vmem>>, vector<8x1xf32>
    tpu.vector_store %arg14[%c0_49, %c0_50], %63 {strides = array<i32>} : memref<8x1xf32, #tpu.memory_space<vmem>>, vector<8x1xf32>,
    %c0_51 = arith.constant 0 : index
    %c0_52 = arith.constant 0 : index
    %69 = vector.load %arg15[%c0_51, %c0_52] : memref<8x1xf32, #tpu.memory_space<vmem>>, vector<8x1xf32>
    tpu.vector_store %arg15[%c0_51, %c0_52], %67 {strides = array<i32>} : memref<8x1xf32, #tpu.memory_space<vmem>>, vector<8x1xf32>,
    return
  }
  func.func @transform_0(%arg0: i32) -> i32 {
    %c0_i32 = arith.constant 0 : i32
    %c0_i32_0 = arith.constant 0 : i32
    return %c0_i32 : i32
  }
  func.func @transform_1(%arg0: i32) -> (i32, i32) {
    %c0_i32 = arith.constant 0 : i32
    %c0_i32_0 = arith.constant 0 : i32
    return %arg0, %c0_i32 : i32, i32
  }
  func.func @transform_2(%arg0: i32) -> (i32, i32) {
    %c0_i32 = arith.constant 0 : i32
    %c0_i32_0 = arith.constant 0 : i32
    return %arg0, %c0_i32 : i32, i32
  }
  func.func @transform_3(%arg0: i32) -> (i32, i32) {
    %c0_i32 = arith.constant 0 : i32
    %c0_i32_0 = arith.constant 0 : i32
    return %arg0, %c0_i32 : i32, i32
  }
  func.func @transform_4(%arg0: i32) -> (i32, i32) {
    %c0_i32 = arith.constant 0 : i32
    %c0_i32_0 = arith.constant 0 : i32
    return %arg0, %c0_i32 : i32, i32
  }
  func.func @transform_5(%arg0: i32) -> (i32, i32) {
    %c0_i32 = arith.constant 0 : i32
    %c0_i32_0 = arith.constant 0 : i32
    %c0_i32_1 = arith.constant 0 : i32
    return %c0_i32, %c0_i32_0 : i32, i32
  }
  func.func @transform_6(%arg0: i32) -> (i32, i32) {
    %c0_i32 = arith.constant 0 : i32
    %c0_i32_0 = arith.constant 0 : i32
    %c0_i32_1 = arith.constant 0 : i32
    return %c0_i32, %c0_i32_0 : i32, i32
  }
  func.func @transform_7(%arg0: i32) -> (i32, i32) {
    %c0_i32 = arith.constant 0 : i32
    %c0_i32_0 = arith.constant 0 : i32
    %c0_i32_1 = arith.constant 0 : i32
    return %c0_i32, %c0_i32_0 : i32, i32
  }
  func.func @transform_8(%arg0: i32) -> (i32, i32) {
    %c0_i32 = arith.constant 0 : i32
    %c0_i32_0 = arith.constant 0 : i32
    %c0_i32_1 = arith.constant 0 : i32
    return %c0_i32, %c0_i32_0 : i32, i32
  }
  func.func @transform_9(%arg0: i32) -> (i32, i32, i32) {
    %c0_i32 = arith.constant 0 : i32
    %c0_i32_0 = arith.constant 0 : i32
    %c0_i32_1 = arith.constant 0 : i32
    %c0_i32_2 = arith.constant 0 : i32
    return %c0_i32, %c0_i32_0, %c0_i32_1 : i32, i32, i32
  }
  func.func @transform_10(%arg0: i32) -> (i32, i32, i32) {
    %c0_i32 = arith.constant 0 : i32
    %c0_i32_0 = arith.constant 0 : i32
    %c0_i32_1 = arith.constant 0 : i32
    %c0_i32_2 = arith.constant 0 : i32
    return %c0_i32, %c0_i32_0, %c0_i32_1 : i32, i32, i32
  }
  func.func @transform_11(%arg0: i32) -> (i32, i32, i32) {
    %c0_i32 = arith.constant 0 : i32
    %c0_i32_0 = arith.constant 0 : i32
    %c0_i32_1 = arith.constant 0 : i32
    %c0_i32_2 = arith.constant 0 : i32
    return %c0_i32, %c0_i32_0, %c0_i32_1 : i32, i32, i32
  }
  func.func @transform_12(%arg0: i32) -> (i32, i32, i32) {
    %c0_i32 = arith.constant 0 : i32
    %c0_i32_0 = arith.constant 0 : i32
    %c0_i32_1 = arith.constant 0 : i32
    %c0_i32_2 = arith.constant 0 : i32
    return %c0_i32, %c0_i32_0, %c0_i32_1 : i32, i32, i32
  }
  func.func @transform_13(%arg0: i32) -> (i32, i32) {
    %c0_i32 = arith.constant 0 : i32
    %c0_i32_0 = arith.constant 0 : i32
    return %arg0, %c0_i32 : i32, i32
  }
  func.func @transform_14(%arg0: i32) -> (i32, i32) {
    %c0_i32 = arith.constant 0 : i32
    %c0_i32_0 = arith.constant 0 : i32
    return %arg0, %c0_i32 : i32, i32
  }
}

</mosaic_0001>

<bundles_post_ra>
// kernel: mul.95
= control target key start
LH: loop header
LB: loop body
LE: loop exit
PB: predicated region body
PF: predicated region fallthrough
CT: control target
= control target key end

     0   :  { %s56_s0 = inlined_call_operand.vmem [shape: f32[16,32], index: 0, kind: input, shape index: {}]   ;;  %s57_s1 = inlined_call_operand.vmem [shape: f32[16,32], index: 1, kind: input, shape index: {}]   ;;  %s58_s2 = inlined_call_operand.vmem [shape: f32[16,32], index: 2, kind: output, shape index: {}]  }
   0x1   :  { %v3_v0 = vld [vmem:[%s56_s0] sm:$0xff]  ;;  %v20_v2 = vld [vmem:[%s56_s0 + $0x8] sm:$0xff] }
   0x2   :  { %v4_v1 = vld [vmem:[%s57_s1] sm:$0xff]  ;;  %v21_v4 = vld [vmem:[%s57_s1 + $0x8] sm:$0xff] }
   0x3   :  { %v7_v3 = vmul.f32 %v4_v1, %v3_v0  ;;  %v16_v5 = vmul.f32 %v21_v4, %v20_v2 }
   0x5   :  { %9 = vst [vmem:[%s58_s2] sm:$0xff] %v7_v3  ;;  %22 = vst [vmem:[%s58_s2 + $0x8] sm:$0xff] %v16_v5 }

// kernel: graphbp_forward.6
= control target key start
LH: loop header
LB: loop body
LE: loop exit
PB: predicated region body
PF: predicated region fallthrough
CT: control target
= control target key end

     0   :  { %v231_v0 = vmov 0   ;;  %vm69_vm0 = vcmask 1042432   ;;  %v232_v3 = vmov 0.0   ;;  %vm233_vm1 = vmmov 0   ;;  %s313_s0 = inlined_call_operand.vmem [shape: f32[16,1], index: 0, kind: input, shape index: {}]   ;;  %s314_s3 = inlined_call_operand.vmem [shape: bf16[6,32], index: 3, kind: input, shape index: {}]   ;;  %s315_s2 = inlined_call_operand.vmem [shape: f32[1,6], index: 2, kind: input, shape index: {}]   ;;  %s316_s5 = inlined_call_operand.vmem [shape: bf16[32,32], index: 5, kind: input, shape index: {}]   ;;  %s317_s4 = inlined_call_operand.vmem [shape: f32[1,32], index: 4, kind: input, shape index: {}]   ;;  %s318_s6 = inlined_call_operand.vmem [shape: f32[1,32], index: 6, kind: input, shape index: {}]   ;;  %s319_s1 = inlined_call_operand.vmem [shape: f32[16,32], index: 1, kind: input, shape index: {}]   ;;  %s320_s7 = inlined_call_operand.vmem [shape: f32[16,32], index: 7, kind: output, shape index: {}]  }
   0x1   :  { %224 = vset.pattern.permute.xlu0 %v231_v0  ;;  %v27_v1 = vld [vmem:[%s313_s0] sm:$0xff]  ;;  %v28_v2 = vld [vmem:[%s313_s0 + $0x8] sm:$0xff]  ;;  %207 = vmatprep.subr.bf16.mxu0 %v232_v3  ;;  %vm65_vm2 = vcmask 48128   ;;  %vm140_vm3 = vcmask 261120  }
   0x2   :  { %32 = vperm.xlu0 %224, %v27_v1   ;;  %v57_v4 = vld [vmem:[%s314_s3] sm:$0x7]  ;;  %209 = vmatprep.mubr.msk.bf16.mxu0 %vm233_vm1, %v232_v3  ;;  %v225_v20 = vld [vmem:[%s316_s5 + $0x8] sm:$0xff]  }
   0x3   :  { %v71_v5 = vsel %vm69_vm0, %v57_v4, 0  ;;  %213 = vmatprep.subr.bf16.mxu1 %v232_v3  ;;  %217 = vmatprep.mubr.msk.bf16.mxu1 %vm233_vm1, %v232_v3  ;;  %v195_v6 = vld [vmem:[%s315_s2] ss:$0 sm:$0xff]  ;;  %v186_v39 = vld [vmem:[%s319_s1 + $0x8] sm:$0xff] }
   0x4   :  { %208 = vmatpush3.bf16.msra.mxu0 %v71_v5  ;;  %214 = vmatpush3.bf16.msra.mxu1 %v225_v20  ;;  %v226_v21 = vld [vmem:[%s316_s5] sm:$0xff]  }
   0x5   :  { %215 = vmatprep.subr.bf16.mxu1 %v232_v3  ;;  %v196_v22 = vld [vmem:[%s317_s4] ss:$0 sm:$0xff] }
   0x6   :  { %37 = vperm.xlu0 %224, %v28_v2   ;;  %v198_v32 = vld [vmem:[%s318_s6] ss:$0 sm:$0xff] }
   0x7   :  { %v185_v34 = vld [vmem:[%s319_s1] sm:$0xff] }
   0x8   :  { %216 = vmatpush3.bf16.msra.mxu1 %v226_v21 }
  0x7d   :  { %v33_v7 = vpop.permute.xlu0 %32 }
  0x7e   :  { %v46_v8 = vsub.f32 %v33_v7, %v195_v6 }
  0x80   :  { %v48_v9 = vmul.f32 %v46_v8, %v46_v8 }
  0x81   :  { %v38_v10 = vpop.permute.xlu0 %37 }
  0x82   :  { %v50_v11 = vmul.f32 -1.0, %v48_v9  ;;  %v47_v12 = vsub.f32 %v38_v10, %v195_v6 }
  0x84   :  { %v49_v13 = vmul.f32 %v47_v12, %v47_v12  ;;  %v52_v14 = vmul.f32 1.442695, %v50_v11 }
  0x86   :  { %v51_v15 = vmul.f32 -1.0, %v49_v13  ;;  %227 = vpow2.f32 %v52_v14 }
  0x88   :  { %v54_v16 = vmul.f32 1.442695, %v51_v15 }
  0x8a   :  { %229 = vpow2.f32 %v54_v16 }
  0x93   :  { %v228_v17 = vpop.eup %227 }
  0x97   :  { %v230_v18 = vpop.eup %229 }
  0x98   :  { %v56_v19 = vpack.c.bf16 %v230_v18, %v228_v17 }
  0x9a   :  { %210 = vmatmul.mubr.msk.bf16.vlgmr.msra.gmra.mxu0 %vm65_vm2, %v56_v19 }
 0x15a   :  { %v107_v23 = vpop.f32.mrf.mxu0 }
 0x15b   :  { %v108_v25 = vadd.f32 %v196_v22, %v107_v23 }
 0x15c   :  { %v211_v24 = vpop.f32.mrf.mxu0 }
 0x15d   :  { %v114_v29 = vmax.f32 %v108_v25, 0.0 }
 0x15e   :  { %v110_v26 = vpop.f32.mrf.mxu0 }
 0x15f   :  { %v111_v27 = vadd.f32 %v196_v22, %v110_v26 }
 0x160   :  { %v212_v28 = vpop.f32.mrf.mxu0 }
 0x161   :  { %v115_v30 = vmax.f32 %v111_v27, 0.0 }
 0x163   :  { %v116_v31 = vpack.c.bf16 %v115_v30, %v114_v29 }
 0x165   :  { %218 = vmatmul.mubr.msk.bf16.vlgmr.msra.gmra.mxu1 %vm140_vm3, %v116_v31 }
 0x225   :  { %v178_v33 = vpop.f32.mrf.mxu1 }
 0x226   :  { %v179_v35 = vadd.f32 %v198_v32, %v178_v33 }
 0x227   :  { %v219_v36 = vpop.f32.mrf.mxu1 }
 0x228   :  { %v187_v37 = vmul.f32 %v185_v34, %v179_v35 }
 0x229   :  { %v181_v38 = vpop.f32.mrf.mxu1 }
 0x22a   :  { %189 = vst.msk [vmem:[%s320_s7] sm:$0xff] %vm140_vm3, %v187_v37  ;;  %v182_v40 = vadd.f32 %v198_v32, %v181_v38 }
 0x22b   :  { %v220_v41 = vpop.f32.mrf.mxu1 }
 0x22c   :  { %v188_v42 = vmul.f32 %v186_v39, %v182_v40 }
 0x22e   :  { %190 = vst.msk [vmem:[%s320_s7 + $0x8] sm:$0xff] %vm140_vm3, %v188_v42 }

// kernel: graphbp_forward.7
= control target key start
LH: loop header
LB: loop body
LE: loop exit
PB: predicated region body
PF: predicated region fallthrough
CT: control target
= control target key end

     0   :  { %18 = vsyncpa [#allocation3], 0  ;;  %s935_s0 = inlined_call_operand.vmem [shape: f32[2], index: 0, kind: input, shape index: {}]   ;;  %s936_s1 = inlined_call_operand.vmem [shape: f32[8,1], index: 1, kind: input, shape index: {}]   ;;  %s937_s2 = inlined_call_operand.vmem [shape: bf16[8,32], index: 2, kind: input, shape index: {}]   ;;  %s938_s3 = inlined_call_operand.vmem [shape: bf16[8,32], index: 3, kind: input, shape index: {}]   ;;  %s939_s4 = inlined_call_operand.vmem [shape: bf16[32,64], index: 4, kind: input, shape index: {}]   ;;  %s940_s5 = inlined_call_operand.vmem [shape: bf16[32,64], index: 5, kind: input, shape index: {}]   ;;  %s941_s6 = inlined_call_operand.vmem [shape: f32[1,64], index: 6, kind: input, shape index: {}]   ;;  %s942_s7 = inlined_call_operand.vmem [shape: bf16[2,64,1], index: 7, kind: input, shape index: {}]   ;;  %s943_s8 = inlined_call_operand.vmem [shape: f32[2,1,1], index: 8, kind: input, shape index: {}]   ;;  %s944_s9 = inlined_call_operand.vmem [shape: bf16[2,64,1], index: 9, kind: input, shape index: {}]   ;;  %s945_s10 = inlined_call_operand.vmem [shape: f32[2,1,1], index: 10, kind: input, shape index: {}]   ;;  %s946_s11 = inlined_call_operand.vmem [shape: f32[8,1], index: 11, kind: output, shape index: {0}]   ;;  %s947_s12 = inlined_call_operand.vmem [shape: f32[8,1], index: 12, kind: output, shape index: {1}]  }
   0x1   :  { %s25_s23 = sshll.u32 %s935_s0, 4  ;;  %s26_s23 = int_to_ptr.vmem [resolvable:$true] %s25_s23 }
   0x2   :  { %s724_s24 = scalar_lea.vmem %s26_s23, 16  ;;  %p729_p1 = scmp.lt.s32.totalorder %s26_s23, %s26_s23 }
   0x3   :  { %p725_p0 = scmp.ne.s32.totalorder %s26_s23, %s724_s24  ;;  %p730_p2 = scmp.lt.s32.totalorder %s724_s24, %s724_s24 }
   0x5   :  { %p731_p3 = por %p730_p2, %p729_p1 }
   0x7   :  { %p732_p4 = pnand %p731_p3, %p725_p0 }
   0x9   :  { %735 = shalt.err (!%p732_p4)
}
   0xa   :  { %s738_s25 = smov [#allocation2]  }
   0xb   :  { %28 = dma.vmem_to_smem %s26_s23, 16, %s738_s25, [#allocation3]  }
   0xc   :  { %736 = dma.done.wait [#allocation3], 16  }
   0xd   :  { %737 = vsyncadd [#allocation3], 4294967280 }
   0xe   :  { %52 = sfence }
   0xf   :  { %v690_v0 = vld [vmem:[%s939_s4 + $0x8] sm:$0xff]   ;;  %v739_v1 = vmov 0.0   ;;  %v692_v3 = vld [vmem:[%s939_s4] sm:$0xff]   ;;  %vm740_vm0 = vmmov 0   ;;  %vm73_vm1 = vcmask 261120   ;;  %v694_v7 = vld [vmem:[%s942_s7 + $0x18] sm:$0xff]  }
  0x10   :  { %623 = vmatprep.subr.bf16.mxu0 %v739_v1  ;;  %631 = vmatprep.subr.bf16.mxu1 %v739_v1  ;;  %v691_v2 = vld [vmem:[%s940_s5 + $0x8] sm:$0xff]   ;;  %v693_v4 = vld [vmem:[%s940_s5] sm:$0xff]   ;;  %v695_v8 = vld [vmem:[%s944_s9 + $0x18] sm:$0xff]   ;;  %vm226_vm2 = vcmask 523264   ;;  %s596_s0 = sld [smem:[#allocation2 + $0x1]]  ;;  %vm535_vm3 = vcmask 7168  }
  0x11   :  { %624 = vmatpush3.bf16.msra.mxu0 %v690_v0  ;;  %627 = vmatprep.mubr.msk.bf16.mxu0 %vm740_vm0, %v739_v1  ;;  %v56_v5 = vld [vmem:[%s937_s2] sm:$0xf]  ;;  %v696_v9 = vld [vmem:[%s942_s7 + $0x10] sm:$0xff]   ;;  %v698_v11 = vld [vmem:[%s942_s7 + $0x8] sm:$0xff]  }
  0x12   :  { %632 = vmatpush3.bf16.msra.mxu1 %v691_v2  ;;  %625 = vmatprep.subr.bf16.mxu0 %v739_v1  ;;  %v124_v6 = vld [vmem:[%s938_s3] sm:$0xf]  ;;  %v697_v10 = vld [vmem:[%s944_s9 + $0x10] sm:$0xff]   ;;  %v699_v12 = vld [vmem:[%s944_s9 + $0x8] sm:$0xff]  }
  0x13   :  { %633 = vmatprep.subr.bf16.mxu1 %v739_v1  ;;  %635 = vmatprep.mubr.msk.bf16.mxu1 %vm740_vm0, %v739_v1  ;;  %v700_v13 = vld [vmem:[%s942_s7] sm:$0xff]   ;;  %v702_v27 = vld [vmem:[%s942_s7 + $0x38] sm:$0xff]   ;;  %v704_v30 = vld [vmem:[%s942_s7 + $0x30] sm:$0xff]  }
  0x14   :  { %v701_v14 = vld [vmem:[%s944_s9] sm:$0xff]   ;;  %v703_v28 = vld [vmem:[%s944_s9 + $0x38] sm:$0xff]   ;;  %v705_v31 = vld [vmem:[%s944_s9 + $0x30] sm:$0xff]  }
  0x15   :  { %626 = vmatpush3.bf16.msra.mxu0 %v692_v3  ;;  %v550_v15 = vld [vmem:[%s941_s6] ss:$0 sm:$0xff]  ;;  %v706_v32 = vld [vmem:[%s942_s7 + $0x28] sm:$0xff]   ;;  %v575_v46 = vld [vmem:[%s943_s8 + $0x1] ss:$0 sm:$0xff] }
  0x16   :  { %634 = vmatpush3.bf16.msra.mxu1 %v693_v4  ;;  %639 = vmatprep.subr.bf16.mxu0 %v739_v1  ;;  %v707_v33 = vld [vmem:[%s944_s9 + $0x28] sm:$0xff]   ;;  %v708_v34 = vld [vmem:[%s942_s7 + $0x20] sm:$0xff]   ;;  %s349_s7 = sld [smem:[#allocation2]]  ;;  %v525_v60 = vstv %s596_s0 }
  0x17   :  { %651 = vmatprep.subr.bf16.mxu1 %v739_v1  ;;  %v709_v35 = vld [vmem:[%s944_s9 + $0x20] sm:$0xff]  }
  0x18   :  { %628 = vmatmul.mubr.msk.bf16.vlgmr.msra.gmra.mxu0 %vm73_vm1, %v56_v5  ;;  %v554_v36 = vld [vmem:[%s943_s8] ss:$0 sm:$0xff]  ;;  %v590_v5 = vld [vmem:[%s945_s10 + $0x1] ss:$0 sm:$0xff] }
  0x19   :  { %636 = vmatmul.mubr.msk.bf16.vlgmr.msra.gmra.mxu1 %vm73_vm1, %v124_v6  ;;  %647 = vmatprep.mubr.msk.bf16.mxu0 %vm740_vm0, %v739_v1  ;;  %v560_v0 = vld [vmem:[%s945_s10] ss:$0 sm:$0xff] }
  0x1a   :  { %659 = vmatprep.mubr.msk.bf16.mxu1 %vm740_vm0, %v739_v1  ;;  %640 = vmatpush3.bf16.msra.mxu0 %v694_v7  ;;  %v54_v2 = vld [vmem:[%s936_s1] sm:$0xff] }
  0x1b   :  { %652 = vmatpush3.bf16.msra.mxu1 %v695_v8  ;;  %641 = vmatprep.subr.bf16.mxu0 %v739_v1 }
  0x1c   :  { %653 = vmatprep.subr.bf16.mxu1 %v739_v1  ;;  %v351_v51 = vstv %s349_s7 }
  0x1e   :  { %642 = vmatpush3.bf16.msra.mxu0 %v696_v9 }
  0x1f   :  { %654 = vmatpush3.bf16.msra.mxu1 %v697_v10  ;;  %643 = vmatprep.subr.bf16.mxu0 %v739_v1 }
  0x20   :  { %655 = vmatprep.subr.bf16.mxu1 %v739_v1 }
  0x22   :  { %644 = vmatpush3.bf16.msra.mxu0 %v698_v11 }
  0x23   :  { %656 = vmatpush3.bf16.msra.mxu1 %v699_v12  ;;  %645 = vmatprep.subr.bf16.mxu0 %v739_v1 }
  0x24   :  { %657 = vmatprep.subr.bf16.mxu1 %v739_v1 }
  0x26   :  { %646 = vmatpush3.bf16.msra.mxu0 %v700_v13 }
  0x27   :  { %658 = vmatpush3.bf16.msra.mxu1 %v701_v14  ;;  %663 = vmatprep.subr.bf16.mxu0 %v739_v1 }
  0x28   :  { %675 = vmatprep.subr.bf16.mxu1 %v739_v1 }
  0xd8   :  { %v111_v16 = vpop.f32.mrf.mxu0 }
  0xd9   :  { %v123_v17 = vadd.f32 %v550_v15, %v111_v16  ;;  %v178_v18 = vpop.f32.mrf.mxu1 }
  0xda   :  { %v629_v19 = vpop.f32.mrf.mxu0 }
  0xdb   :  { %v184_v20 = vadd.f32 %v178_v18, %v123_v17  ;;  %v637_v21 = vpop.f32.mrf.mxu1 }
  0xdc   :  { %v114_v22 = vpop.f32.mrf.mxu0 }
  0xdd   :  { %710 = vtanh.f32 %v184_v20  ;;  %v181_v23 = vpop.f32.mrf.mxu1 }
  0xde   :  { %v630_v24 = vpop.f32.mrf.mxu0 }
  0xdf   :  { %v638_v25 = vpop.f32.mrf.mxu1 }
  0xea   :  { %v711_v26 = vpop.eup %710 }
  0xeb   :  { %v186_v29 = vpack.c.bf16 %v711_v26, %v711_v26 }
  0xed   :  { %648 = vmatmul.mubr.msk.bf16.vlgmr.msra.gmra.mxu0 %vm226_vm2, %v186_v29  ;;  %660 = vmatmul.mubr.msk.bf16.vlgmr.msra.gmra.mxu1 %vm226_vm2, %v186_v29 }
  0xee   :  { %664 = vmatpush3.bf16.msra.mxu0 %v702_v27  ;;  %676 = vmatpush3.bf16.msra.mxu1 %v703_v28 }
  0xef   :  { %665 = vmatprep.subr.bf16.mxu0 %v739_v1  ;;  %677 = vmatprep.subr.bf16.mxu1 %v739_v1 }
  0xf0   :  { %671 = vmatprep.mubr.msk.bf16.mxu0 %vm740_vm0, %v739_v1  ;;  %683 = vmatprep.mubr.msk.bf16.mxu1 %vm740_vm0, %v739_v1 }
  0xf2   :  { %666 = vmatpush3.bf16.msra.mxu0 %v704_v30  ;;  %678 = vmatpush3.bf16.msra.mxu1 %v705_v31 }
  0xf3   :  { %667 = vmatprep.subr.bf16.mxu0 %v739_v1  ;;  %679 = vmatprep.subr.bf16.mxu1 %v739_v1 }
  0xf6   :  { %668 = vmatpush3.bf16.msra.mxu0 %v706_v32  ;;  %680 = vmatpush3.bf16.msra.mxu1 %v707_v33 }
  0xf7   :  { %669 = vmatprep.subr.bf16.mxu0 %v739_v1  ;;  %681 = vmatprep.subr.bf16.mxu1 %v739_v1 }
  0xfa   :  { %670 = vmatpush3.bf16.msra.mxu0 %v708_v34  ;;  %682 = vmatpush3.bf16.msra.mxu1 %v709_v35 }
  0xfd   :  { %672 = vmatmul.mubr.msk.bf16.vlgmr.msra.gmra.mxu0 %vm226_vm2, %v186_v29  ;;  %684 = vmatmul.mubr.msk.bf16.vlgmr.msra.gmra.mxu1 %vm226_vm2, %v186_v29 }
 0x1ad   :  { %v264_v37 = vpop.f32.mrf.mxu0  ;;  %v343_v38 = vpop.f32.mrf.mxu1 }
 0x1ae   :  { %v265_v39 = vadd.f32 %v554_v36, %v264_v37  ;;  %v344_v1 = vadd.f32 %v560_v0, %v343_v38 }
 0x1af   :  { %v649_v40 = vpop.f32.mrf.mxu0  ;;  %v661_v41 = vpop.f32.mrf.mxu1 }
 0x1b0   :  { %712 = vtanh.f32 %v265_v39  ;;  %v355_v4 = vadd.f32 %v344_v1, %v54_v2 }
 0x1b1   :  { %v267_v42 = vpop.f32.mrf.mxu0  ;;  %v346_v43 = vpop.f32.mrf.mxu1 }
 0x1b3   :  { %v650_v44 = vpop.f32.mrf.mxu0  ;;  %v662_v45 = vpop.f32.mrf.mxu1 }
 0x1bd   :  { %v436_v47 = vpop.f32.mrf.mxu0  ;;  %v517_v48 = vpop.f32.mrf.mxu1 }
 0x1be   :  { %v437_v49 = vadd.f32 %v575_v46, %v436_v47  ;;  %v713_v50 = vpop.eup %712  ;;  %v518_v8 = vadd.f32 %v590_v5, %v517_v48 }
 0x1bf   :  { %v673_v52 = vpop.f32.mrf.mxu0  ;;  %v685_v53 = vpop.f32.mrf.mxu1  ;;  %v352_v56 = vmul.f32 %v713_v50, %v351_v51 }
 0x1c0   :  { %714 = vtanh.f32 %v437_v49 }
 0x1c1   :  { %v439_v54 = vpop.f32.mrf.mxu0  ;;  %v520_v55 = vpop.f32.mrf.mxu1  ;;  %v353_v59 = vmul.f32 1.442695, %v352_v56 }
 0x1c3   :  { %v674_v57 = vpop.f32.mrf.mxu0  ;;  %v686_v58 = vpop.f32.mrf.mxu1  ;;  %716 = vpow2.f32 %v353_v59 }
 0x1cd   :  { %v715_v61 = vpop.eup %714 }
 0x1ce   :  { %v526_v62 = vmul.f32 %v715_v61, %v525_v60 }
 0x1d0   :  { %v527_v63 = vmul.f32 1.442695, %v526_v62  ;;  %v717_v3 = vpop.eup %716 }
 0x1d1   :  { %v356_v6 = vmul.f32 %v717_v3, %v355_v4  ;;  %v357_v7 = vadd.f32 1e-20, %v717_v3 }
 0x1d2   :  { %718 = vpow2.f32 %v527_v63 }
 0x1d3   :  { %v529_v9 = vadd.f32 %v518_v8, %v356_v6  ;;  %720 = vlog2.f32 %v357_v7 }
 0x1df   :  { %v719_v10 = vpop.eup %718 }
 0x1e0   :  { %v530_v11 = vmul.f32 %v719_v10, %v529_v9  ;;  %v531_v12 = vadd.f32 1e-20, %v719_v10  ;;  %v721_v13 = vpop.eup %720 }
 0x1e1   :  { %v359_v15 = vmul.f32 0.6931472, %v721_v13 }
 0x1e2   :  { %722 = vlog2.f32 %v531_v12  ;;  %536 = vst.msk [vmem:[%s946_s11] sm:$0xff] %vm535_vm3, %v530_v11 }
 0x1ef   :  { %v723_v14 = vpop.eup %722 }
 0x1f0   :  { %v533_v16 = vmul.f32 0.6931472, %v723_v14 }
 0x1f2   :  { %v534_v17 = vadd.f32 %v533_v16, %v359_v15 }
 0x1f4   :  { %537 = vst.msk [vmem:[%s947_s12] sm:$0xff] %vm535_vm3, %v534_v17 }
 0x1f5   :  { %546 = vsyncpa [#allocation3], 1 }

// kernel: graphbp_forward.8
= control target key start
LH: loop header
LB: loop body
LE: loop exit
PB: predicated region body
PF: predicated region fallthrough
CT: control target
= control target key end

     0   :  { %v467_v0 = vmov 0.0   ;;  %vm468_vm0 = vmmov 0   ;;  %vm66_vm1 = vcmask 261120   ;;  %vm151_vm2 = vcmask 523264   ;;  %s593_s1 = inlined_call_operand.vmem [shape: bf16[32,64], index: 1, kind: input, shape index: {}]   ;;  %s594_s6 = inlined_call_operand.vmem [shape: bf16[32,64], index: 6, kind: input, shape index: {}]   ;;  %s595_s0 = inlined_call_operand.vmem [shape: bf16[8,32], index: 0, kind: input, shape index: {}]   ;;  %s596_s5 = inlined_call_operand.vmem [shape: bf16[8,32], index: 5, kind: input, shape index: {}]   ;;  %s597_s3 = inlined_call_operand.vmem [shape: bf16[64,1], index: 3, kind: input, shape index: {}]   ;;  %s598_s8 = inlined_call_operand.vmem [shape: bf16[64,1], index: 8, kind: input, shape index: {}]   ;;  %s599_s4 = inlined_call_operand.<no memory space> [shape: f32[1,1], index: 4, kind: input, shape index: {}]   ;;  %s600_s2 = inlined_call_operand.vmem [shape: f32[1,64], index: 2, kind: input, shape index: {}]   ;;  %s601_s7 = inlined_call_operand.vmem [shape: f32[1,64], index: 7, kind: input, shape index: {}]   ;;  %s602_s9 = inlined_call_operand.<no memory space> [shape: f32[1,1], index: 9, kind: input, shape index: {}]   ;;  %s603_s10 = inlined_call_operand.vmem [shape: f32[8,1], index: 10, kind: output, shape index: {0}]   ;;  %s604_s11 = inlined_call_operand.vmem [shape: f32[8,1], index: 11, kind: output, shape index: {1}]  }
   0x1   :  { %405 = vmatprep.subr.bf16.mxu1 %v467_v0  ;;  %425 = vmatprep.subr.bf16.mxu0 %v467_v0  ;;  %v447_v1 = vld [vmem:[%s593_s1 + $0x8] sm:$0xff]   ;;  %v449_v3 = vld [vmem:[%s593_s1] sm:$0xff]   ;;  %v451_v7 = vld [vmem:[%s597_s3 + $0x18] sm:$0xff]   ;;  %v17_v15 = vstv %s599_s4  ;;  %vm201_vm3 = vcmask 7168  }
   0x2   :  { %v448_v2 = vld [vmem:[%s594_s6 + $0x8] sm:$0xff]   ;;  %409 = vmatprep.mubr.msk.bf16.mxu1 %vm468_vm0, %v467_v0  ;;  %429 = vmatprep.mubr.msk.bf16.mxu0 %vm468_vm0, %v467_v0  ;;  %v450_v4 = vld [vmem:[%s594_s6] sm:$0xff]   ;;  %v452_v8 = vld [vmem:[%s598_s8 + $0x18] sm:$0xff]   ;;  %18 = vst [vmem:[#allocation2] sm:$0x1] %v17_v15  ;;  %v19_v32 = vstv %s602_s9 }
   0x3   :  { %406 = vmatpush3.bf16.msra.mxu1 %v447_v1  ;;  %426 = vmatpush3.bf16.msra.mxu0 %v448_v2  ;;  %v42_v5 = vld [vmem:[%s595_s0] sm:$0xf]  ;;  %v453_v9 = vld [vmem:[%s597_s3 + $0x10] sm:$0xff]   ;;  %v455_v11 = vld [vmem:[%s597_s3 + $0x8] sm:$0xff]   ;;  %20 = vst [vmem:[#allocation3] sm:$0x1] %v19_v32 }
   0x4   :  { %407 = vmatprep.subr.bf16.mxu1 %v467_v0  ;;  %427 = vmatprep.subr.bf16.mxu0 %v467_v0  ;;  %v203_v6 = vld [vmem:[%s596_s5] sm:$0xf]  ;;  %v454_v10 = vld [vmem:[%s598_s8 + $0x10] sm:$0xff]   ;;  %v456_v12 = vld [vmem:[%s598_s8 + $0x8] sm:$0xff]  }
   0x5   :  { %v457_v13 = vld [vmem:[%s597_s3] sm:$0xff]  }
   0x6   :  { %v458_v14 = vld [vmem:[%s598_s8] sm:$0xff]  }
   0x7   :  { %408 = vmatpush3.bf16.msra.mxu1 %v449_v3  ;;  %428 = vmatpush3.bf16.msra.mxu0 %v450_v4  ;;  %v369_v16 = vld [vmem:[%s600_s2] ss:$0 sm:$0xff] }
   0x8   :  { %413 = vmatprep.subr.bf16.mxu1 %v467_v0  ;;  %433 = vmatprep.subr.bf16.mxu0 %v467_v0  ;;  %v379_v17 = vld [vmem:[%s601_s7] ss:$0 sm:$0xff] }
   0x9   :  { %v373_v33 = vld [vmem:[#allocation2] ss:$0 sm:$0xff] }
   0xa   :  { %410 = vmatmul.mubr.msk.bf16.vlgmr.msra.gmra.mxu1 %vm66_vm1, %v42_v5  ;;  %430 = vmatmul.mubr.msk.bf16.vlgmr.msra.gmra.mxu0 %vm66_vm1, %v203_v6  ;;  %v383_v34 = vld [vmem:[#allocation3] ss:$0 sm:$0xff] }
   0xb   :  { %414 = vmatpush3.bf16.msra.mxu1 %v451_v7  ;;  %434 = vmatpush3.bf16.msra.mxu0 %v452_v8 }
   0xc   :  { %415 = vmatprep.subr.bf16.mxu1 %v467_v0  ;;  %435 = vmatprep.subr.bf16.mxu0 %v467_v0 }
   0xd   :  { %421 = vmatprep.mubr.msk.bf16.mxu1 %vm468_vm0, %v467_v0  ;;  %441 = vmatprep.mubr.msk.bf16.mxu0 %vm468_vm0, %v467_v0 }
   0xf   :  { %416 = vmatpush3.bf16.msra.mxu1 %v453_v9  ;;  %436 = vmatpush3.bf16.msra.mxu0 %v454_v10 }
  0x10   :  { %417 = vmatprep.subr.bf16.mxu1 %v467_v0  ;;  %437 = vmatprep.subr.bf16.mxu0 %v467_v0 }
  0x13   :  { %418 = vmatpush3.bf16.msra.mxu1 %v455_v11  ;;  %438 = vmatpush3.bf16.msra.mxu0 %v456_v12 }
  0x14   :  { %419 = vmatprep.subr.bf16.mxu1 %v467_v0  ;;  %439 = vmatprep.subr.bf16.mxu0 %v467_v0 }
  0x17   :  { %420 = vmatpush3.bf16.msra.mxu1 %v457_v13  ;;  %440 = vmatpush3.bf16.msra.mxu0 %v458_v14 }
  0xca   :  { %v104_v18 = vpop.f32.mrf.mxu1  ;;  %v264_v20 = vpop.f32.mrf.mxu0 }
  0xcb   :  { %v105_v19 = vadd.f32 %v369_v16, %v104_v18  ;;  %v265_v21 = vadd.f32 %v379_v17, %v264_v20 }
  0xcc   :  { %v411_v22 = vpop.f32.mrf.mxu1  ;;  %v431_v24 = vpop.f32.mrf.mxu0 }
  0xcd   :  { %v110_v23 = vmax.f32 %v105_v19, 0.0  ;;  %v270_v25 = vmax.f32 %v265_v21, 0.0 }
  0xce   :  { %v107_v26 = vpop.f32.mrf.mxu1  ;;  %v267_v28 = vpop.f32.mrf.mxu0 }
  0xcf   :  { %v111_v27 = vpack.c.bf16 %v110_v23, %v110_v23  ;;  %v271_v29 = vpack.c.bf16 %v270_v25, %v270_v25 }
  0xd0   :  { %v412_v30 = vpop.f32.mrf.mxu1  ;;  %v432_v31 = vpop.f32.mrf.mxu0 }
  0xd1   :  { %422 = vmatmul.mubr.msk.bf16.vlgmr.msra.gmra.mxu1 %vm151_vm2, %v111_v27  ;;  %442 = vmatmul.mubr.msk.bf16.vlgmr.msra.gmra.mxu0 %vm151_vm2, %v271_v29 }
 0x191   :  { %v189_v35 = vpop.f32.mrf.mxu1  ;;  %v348_v37 = vpop.f32.mrf.mxu0 }
 0x192   :  { %v190_v36 = vadd.f32 %v373_v33, %v189_v35  ;;  %v349_v38 = vadd.f32 %v383_v34, %v348_v37 }
 0x193   :  { %v423_v39 = vpop.f32.mrf.mxu1  ;;  %v443_v41 = vpop.f32.mrf.mxu0 }
 0x194   :  { %v195_v40 = vsub.f32 0.0, %v190_v36  ;;  %v354_v42 = vsub.f32 0.0, %v349_v38 }
 0x195   :  { %v192_v43 = vpop.f32.mrf.mxu1  ;;  %v351_v45 = vpop.f32.mrf.mxu0 }
 0x196   :  { %v196_v44 = vmul.f32 1.442695, %v195_v40  ;;  %v355_v46 = vmul.f32 1.442695, %v354_v42 }
 0x197   :  { %v424_v47 = vpop.f32.mrf.mxu1  ;;  %v444_v48 = vpop.f32.mrf.mxu0 }
 0x198   :  { %459 = vpow2.f32 %v196_v44 }
 0x199   :  { %461 = vpow2.f32 %v355_v46 }
 0x1a5   :  { %v460_v49 = vpop.eup %459 }
 0x1a6   :  { %v462_v50 = vpop.eup %461  ;;  %v198_v51 = vadd.f32 1.0, %v460_v49 }
 0x1a7   :  { %v357_v52 = vadd.f32 1.0, %v462_v50 }
 0x1a8   :  { %463 = vrcp.f32 %v198_v51 }
 0x1a9   :  { %465 = vrcp.f32 %v357_v52 }
 0x1b5   :  { %v464_v53 = vpop.eup %463 }
 0x1b6   :  { %v466_v54 = vpop.eup %465  ;;  %202 = vst.msk [vmem:[%s603_s10] sm:$0xff] %vm201_vm3, %v464_v53 }
 0x1b7   :  { %360 = vst.msk [vmem:[%s604_s11] sm:$0xff] %vm201_vm3, %v466_v54 }

// kernel: graphbp_forward.10
= control target key start
LH: loop header
LB: loop body
LE: loop exit
PB: predicated region body
PF: predicated region fallthrough
CT: control target
= control target key end

     0   :  { %v2301_v0 = vmov 0   ;;  %v2302_v31 = vmov 683565275   ;;  %v2303_v33 = vmov 2475754826   ;;  %s3589_s0 = inlined_call_operand.vmem [shape: f32[16,1], index: 0, kind: input, shape index: {}]   ;;  %s3590_s1 = inlined_call_operand.vmem [shape: f32[16,1], index: 1, kind: input, shape index: {}]   ;;  %s3591_s4 = inlined_call_operand.vmem [shape: bf16[7,6,32], index: 4, kind: input, shape index: {}]   ;;  %s3592_s3 = inlined_call_operand.vmem [shape: f32[1,6], index: 3, kind: input, shape index: {}]   ;;  %s3593_s5 = inlined_call_operand.vmem [shape: f32[1,32], index: 5, kind: input, shape index: {}]   ;;  %s3594_s6 = inlined_call_operand.vmem [shape: bf16[32,32], index: 6, kind: input, shape index: {}]   ;;  %s3595_s7 = inlined_call_operand.vmem [shape: f32[1,32], index: 7, kind: input, shape index: {}]   ;;  %s3596_s2 = inlined_call_operand.vmem [shape: f32[16,32], index: 2, kind: input, shape index: {}]   ;;  %s3597_s8 = inlined_call_operand.vmem [shape: f32[16,32], index: 8, kind: output, shape index: {}]  }
   0x1   :  { %2235 = vset.pattern.permute.xlu0 %v2301_v0  ;;  %v30_v1 = vld [vmem:[%s3589_s0] sm:$0xff]  ;;  %2236 = vset.pattern.permute.xlu1 %v2301_v0  ;;  %v31_v3 = vld [vmem:[%s3589_s0 + $0x8] sm:$0xff]  ;;  %v2304_v35 = vmov 2131351028   ;;  %v2305_v37 = vmov 2102212464  }
   0x2   :  { %v2361_v2 = vld [vmem:[%s3590_s1] sm:$0xff]  ;;  %37 = vperm.xlu0 %2235, %v30_v1   ;;  %v2306_v39 = vmov 920167782   ;;  %v2307_v46 = vmov 1326507024  }
   0x3   :  { %v387_v4 = vand.u32 2147483647, %v2361_v2  ;;  %v390_v5 = vand.u32 2139095040, %v2361_v2  ;;  %v2369_v6 = vmul.f32 2.0, %v2361_v2  ;;  %v2372_v7 = vmul.f32 3.0, %v2361_v2 }
   0x4   :  { %v2383_v26 = vmul.f32 4.0, %v2361_v2  ;;  %vm389_vm13 = vcmp.lt.s32.totalorder %v2361_v2, 0 }
   0x5   :  { %v391_v8 = vshrl.u32 %v390_v5, 23  ;;  %v394_v9 = vand.u32 8388607, %v387_v4  ;;  %v655_v10 = vand.u32 2147483647, %v2369_v6  ;;  %v658_v11 = vand.u32 2139095040, %v2369_v6 }
   0x6   :  { %42 = vperm.xlu0 %2235, %v31_v3   ;;  %v926_v13 = vand.u32 2139095040, %v2372_v7  ;;  %v923_v25 = vand.u32 2147483647, %v2372_v7 }
   0x7   :  { %v2041_v12 = vadd.s32 4294967169, %v391_v8  ;;  %v659_v14 = vshrl.u32 %v658_v11, 23  ;;  %v662_v15 = vand.u32 8388607, %v655_v10  ;;  %v395_v17 = vor.u32 8388608, %v394_v9 }
   0x8   :  { %v927_v20 = vshrl.u32 %v926_v13, 23 }
   0x9   :  { %v397_v16 = vadd.s32 1, %v2041_v12  ;;  %v2051_v18 = vadd.s32 4294967169, %v659_v14  ;;  %v663_v19 = vor.u32 8388608, %v662_v15  ;;  %v2385_v27 = vshll.u32 %v395_v17, 8 }
   0xa   :  { %v2389_v29 = vadd.s32 4294967169, %v927_v20 }
   0xb   :  { %vm398_vm0 = vcmp.gt.s32.totalorder %v397_v16, 0  ;;  %v665_v22 = vadd.s32 1, %v2051_v18  ;;  %v2387_v28 = vshll.u32 %v663_v19, 8 }
   0xc   :  { %v399_v21 = vsel %vm398_vm0, %v397_v16, 0 }
   0xd   :  { %v400_v23 = vshrl.u32 %v399_v21, 5  ;;  %v401_v24 = vand.u32 31, %v399_v21  ;;  %vm666_vm1 = vcmp.gt.s32.totalorder %v665_v22, 0 }
   0xe   :  { %v667_v51 = vsel %vm666_vm1, %v665_v22, 0 }
   0xf   :  { %v402_v30 = vsub.s32 32, %v401_v24  ;;  %v404_v32 = vshll.u32 %v2302_v31, %v401_v24  ;;  %v407_v34 = vshll.u32 %v2303_v33, %v401_v24  ;;  %v410_v36 = vshll.u32 %v2304_v35, %v401_v24 }
  0x10   :  { %v413_v38 = vshll.u32 %v2305_v37, %v401_v24  ;;  %v416_v40 = vshll.u32 %v2306_v39, %v401_v24  ;;  %vm419_vm2 = vcmp.lt.s32.totalorder %v400_v23, 1  ;;  %vm420_vm3 = vcmp.lt.s32.totalorder %v400_v23, 2 }
  0x11   :  { %v403_v41 = vshrl.u32 %v2302_v31, %v402_v30  ;;  %v405_v42 = vshrl.u32 %v2303_v33, %v402_v30  ;;  %v408_v43 = vshrl.u32 %v2304_v35, %v402_v30  ;;  %v411_v44 = vshrl.u32 %v2305_v37, %v402_v30 }
  0x12   :  { %v414_v45 = vshrl.u32 %v2306_v39, %v402_v30  ;;  %v417_v47 = vshrl.u32 %v2307_v46, %v402_v30  ;;  %vm421_vm4 = vcmp.lt.s32.totalorder %v400_v23, 3  ;;  %vm422_vm5 = vcmp.lt.s32.totalorder %v400_v23, 4 }
  0x13   :  { %v406_v48 = vor.u32 %v405_v42, %v404_v32  ;;  %v409_v49 = vor.u32 %v408_v43, %v407_v34  ;;  %v412_v50 = vor.u32 %v411_v44, %v410_v36  ;;  %v668_v54 = vshrl.u32 %v667_v51, 5 }
  0x14   :  { %v415_v52 = vor.u32 %v414_v45, %v413_v38  ;;  %v418_v53 = vor.u32 %v417_v47, %v416_v40  ;;  %v669_v55 = vand.u32 31, %v667_v51  ;;  %v933_v38 = vadd.s32 1, %v2389_v29 }
  0x15   :  { %v423_v56 = vsel %vm419_vm2, %v403_v41, %v406_v48  ;;  %v424_v57 = vsel %vm422_vm5, %v412_v50, 2102212464  ;;  %v427_v58 = vsel %vm419_vm2, %v406_v48, %v409_v49  ;;  %v431_v59 = vsel %vm419_vm2, %v409_v49, %v412_v50 }
  0x16   :  { %v425_v60 = vsel %vm421_vm4, %v409_v49, %v424_v57  ;;  %v428_v61 = vsel %vm422_vm5, %v415_v52, 920167782  ;;  %v432_v62 = vsel %vm422_vm5, %v418_v53, 1326507024  ;;  %v670_v63 = vsub.s32 32, %v669_v55 }
  0x17   :  { %v426_v0 = vsel %vm420_vm3, %v423_v56, %v425_v60  ;;  %v429_v1 = vsel %vm421_vm4, %v412_v50, %v428_v61  ;;  %v433_v3 = vsel %vm421_vm4, %v415_v52, %v432_v62  ;;  %v672_v5 = vshll.u32 %v2302_v31, %v669_v55 }
  0x18   :  { %v430_v8 = vsel %vm420_vm3, %v427_v58, %v429_v1  ;;  %v434_v9 = vsel %vm420_vm3, %v431_v59, %v433_v3  ;;  %v442_v11 = vmul.u32 %v2385_v27, %v426_v0  ;;  %v671_v12 = vshrl.u32 %v2302_v31, %v670_v63 }
  0x19   :  { %v2416_v13 = vmul.u32.u64.low %v2385_v27, %v434_v9  ;;  %v2417_v14 = vmul.u32.u64.high %v2385_v27, %v434_v9, %v2416_v13  ;;  %v2420_v15 = vmul.u32.u64.low %v2385_v27, %v430_v8  ;;  %v2421_v16 = vmul.u32.u64.high %v2385_v27, %v430_v8, %v2420_v15 }
  0x1a   :  { %v673_v17 = vshrl.u32 %v2303_v33, %v670_v63  ;;  %v675_v18 = vshll.u32 %v2303_v33, %v669_v55  ;;  %v676_v19 = vshrl.u32 %v2304_v35, %v670_v63  ;;  %v678_v20 = vshll.u32 %v2304_v35, %v669_v55 }
  0x1b   :  { %v679_v21 = vshrl.u32 %v2305_v37, %v670_v63  ;;  %v681_v22 = vshll.u32 %v2305_v37, %v669_v55  ;;  %v682_v23 = vshrl.u32 %v2306_v39, %v670_v63  ;;  %v684_v24 = vshll.u32 %v2306_v39, %v669_v55 }
  0x1c   :  { %v674_v30 = vor.u32 %v673_v17, %v672_v5  ;;  %v677_v27 = vor.u32 %v676_v19, %v675_v18  ;;  %v685_v32 = vshrl.u32 %v2307_v46, %v670_v63  ;;  %vm687_vm6 = vcmp.lt.s32.totalorder %v668_v54, 1 }
  0x1d   :  { %vm444_vm7 = vc.u32 %v2417_v14, %v2420_v15  ;;  %v445_v34 = vadd.s32 1, %v2421_v16  ;;  %v680_v36 = vor.u32 %v679_v21, %v678_v20  ;;  %v683_v40 = vor.u32 %v682_v23, %v681_v22 }
  0x1e   :  { %v686_v41 = vor.u32 %v685_v32, %v684_v24  ;;  %vm688_vm8 = vcmp.lt.s32.totalorder %v668_v54, 2  ;;  %vm689_vm9 = vcmp.lt.s32.totalorder %v668_v54, 3  ;;  %vm690_vm10 = vcmp.lt.s32.totalorder %v668_v54, 4 }
  0x1f   :  { %v446_v42 = vsel %vm444_vm7, %v445_v34, %v2421_v16  ;;  %v691_v43 = vsel %vm687_vm6, %v671_v12, %v674_v30  ;;  %v695_v44 = vsel %vm687_vm6, %v674_v30, %v677_v27  ;;  %v692_v47 = vsel %vm690_vm10, %v680_v36, 2102212464 }
  0x20   :  { %v447_v45 = vadd.s32 %v446_v42, %v442_v11  ;;  %v696_v48 = vsel %vm690_vm10, %v683_v40, 920167782  ;;  %v699_v49 = vsel %vm687_vm6, %v677_v27, %v680_v36  ;;  %v693_v50 = vsel %vm689_vm9, %v677_v27, %v692_v47 }
  0x21   :  { %v697_v51 = vsel %vm689_vm9, %v680_v36, %v696_v48  ;;  %v700_v52 = vsel %vm690_vm10, %v686_v41, 1326507024  ;;  %vm934_vm11 = vcmp.gt.s32.totalorder %v933_v38, 0  ;;  %v930_v56 = vand.u32 8388607, %v923_v25 }
  0x22   :  { %v448_v29 = vadd.s32 536870912, %v447_v45  ;;  %v698_v53 = vsel %vm688_vm8, %v695_v44, %v697_v51  ;;  %v701_v55 = vsel %vm689_vm9, %v683_v40, %v700_v52  ;;  %v694_v57 = vsel %vm688_vm8, %v691_v43, %v693_v50 }
  0x23   :  { %v702_v58 = vsel %vm688_vm8, %v699_v49, %v701_v55  ;;  %v2447_v59 = vmul.u32.u64.low %v2387_v28, %v698_v53  ;;  %v2448_v60 = vmul.u32.u64.high %v2387_v28, %v698_v53, %v2447_v59  ;;  %v935_v0 = vsel %vm934_vm11, %v933_v38, 0 }
  0x24   :  { %v2451_v61 = vshrl.u32 %v448_v29, 30  ;;  %v2454_v62 = vmul.u32.u64.low %v2387_v28, %v702_v58  ;;  %v2455_v63 = vmul.u32.u64.high %v2387_v28, %v702_v58, %v2454_v62  ;;  %v937_v1 = vand.u32 31, %v935_v0 }
  0x25   :  { %v710_v5 = vmul.u32 %v2387_v28, %v694_v57  ;;  %v713_v54 = vadd.s32 1, %v2448_v60  ;;  %v931_v11 = vor.u32 8388608, %v930_v56  ;;  %v1194_v12 = vand.u32 2139095040, %v2383_v26 }
  0x26   :  { %v450_v3 = vshll.u32 %v2451_v61, 30  ;;  %v938_v8 = vsub.s32 32, %v937_v1  ;;  %vm712_vm12 = vc.u32 %v2455_v63, %v2447_v59  ;;  %v940_v16 = vshll.u32 %v2302_v31, %v937_v1 }
  0x27   :  { %v714_v13 = vsel %vm712_vm12, %v713_v54, %v2448_v60  ;;  %v1191_v17 = vand.u32 2147483647, %v2383_v26  ;;  %v2469_v18 = vmul.f32 5.0, %v2361_v2  ;;  %v943_v21 = vshll.u32 %v2303_v33, %v937_v1 }
  0x28   :  { %v2460_v9 = vsub.s32 %v447_v45, %v450_v3  ;;  %v715_v19 = vadd.s32 %v714_v13, %v710_v5  ;;  %v941_v20 = vshrl.u32 %v2303_v33, %v938_v8  ;;  %v944_v22 = vshrl.u32 %v2304_v35, %v938_v8 }
  0x29   :  { %v946_v23 = vshll.u32 %v2304_v35, %v937_v1  ;;  %v947_v24 = vshrl.u32 %v2305_v37, %v938_v8  ;;  %v949_v30 = vshll.u32 %v2305_v37, %v937_v1  ;;  %v936_v32 = vshrl.u32 %v935_v0, 5 }
  0x2a   :  { %v453_v28 = vsub.s32 0, %v2460_v9  ;;  %v2479_v34 = vshll.u32 %v931_v11, 8  ;;  %v1195_v36 = vshrl.u32 %v1194_v12, 23  ;;  %v443_v38 = vadd.s32 %v2420_v15, %v2417_v14 }
  0x2b   :  { %v716_v40 = vadd.s32 536870912, %v715_v19  ;;  %v939_v41 = vshrl.u32 %v2302_v31, %v938_v8  ;;  %v950_v42 = vshrl.u32 %v2306_v39, %v938_v8  ;;  %v942_v44 = vor.u32 %v941_v20, %v940_v16 }
  0x2c   :  { %v2042_v27 = vmin.u32 %v453_v28, %v2460_v9  ;;  %v952_v45 = vshll.u32 %v2306_v39, %v937_v1  ;;  %v953_v47 = vshrl.u32 %v2307_v46, %v938_v8  ;;  %v945_v49 = vor.u32 %v944_v22, %v943_v21 }
  0x2d   :  { %v2488_v48 = vshrl.u32 %v716_v40, 30  ;;  %v948_v50 = vor.u32 %v947_v24, %v946_v23  ;;  %v951_v51 = vor.u32 %v950_v42, %v949_v30  ;;  %vm955_vm14 = vcmp.lt.s32.totalorder %v936_v32, 1 }
  0x2e   :  { %v455_v43 = vclz %v2042_v27  ;;  %vm958_vm15 = vcmp.lt.s32.totalorder %v936_v32, 4  ;;  %v2071_v14 = vadd.s32 4294967169, %v1195_v36  ;;  %v473_v15 = vsub.s32 4, %v2451_v61 }
  0x2f   :  { %v718_v29 = vshll.u32 %v2488_v48, 30  ;;  %v954_v53 = vor.u32 %v953_v47, %v952_v45  ;;  %v960_v55 = vsel %vm958_vm15, %v948_v50, 2102212464  ;;  %vm956_vm1 = vcmp.lt.s32.totalorder %v936_v32, 2 }
  0x30   :  { %v2043_v52 = vadd.s32 4294967294, %v455_v43  ;;  %vm957_vm2 = vcmp.lt.s32.totalorder %v936_v32, 3  ;;  %v964_v56 = vsel %vm958_vm15, %v951_v51, 920167782  ;;  %v959_v60 = vsel %vm955_vm14, %v939_v41, %v942_v44 }
  0x31   :  { %v2494_v58 = vsub.s32 %v715_v19, %v718_v29  ;;  %v963_v62 = vsel %vm955_vm14, %v942_v44, %v945_v49  ;;  %v961_v5 = vsel %vm957_vm2, %v945_v49, %v960_v55  ;;  %v965_v8 = vsel %vm957_vm2, %v948_v50, %v964_v56 }
  0x32   :  { %vm2044_vm0 = vcmp.lt.s32.totalorder %v2043_v52, 0  ;;  %v967_v11 = vsel %vm955_vm14, %v945_v49, %v948_v50  ;;  %v968_v12 = vsel %vm958_vm15, %v954_v53, 1326507024  ;;  %vm2506_vm3 = vcmp.le.f32.partialorder %v387_v4, 0.7853982 }
  0x33   :  { %v458_v57 = vsel %vm2044_vm0, 0, %v2043_v52  ;;  %v721_v54 = vsub.s32 0, %v2494_v58  ;;  %v474_v19 = vsel %vm389_vm13, %v473_v15, %v2451_v61  ;;  %v966_v21 = vsel %vm956_vm1, %v963_v62, %v965_v8 }
  0x34   :  { %v459_v0 = vsub.s32 32, %v458_v57  ;;  %v460_v1 = vshll.u32 %v2460_v9, %v458_v57  ;;  %v463_v3 = vsub.s32 4294967266, %v458_v57  ;;  %v969_v9 = vsel %vm957_vm2, %v951_v51, %v968_v12 }
  0x35   :  { %v2052_v20 = vmin.u32 %v721_v54, %v2494_v58  ;;  %v2518_v22 = vand.u32 8388607, %v1191_v17  ;;  %v962_v24 = vsel %vm956_vm1, %v959_v60, %v961_v5  ;;  %v970_v30 = vsel %vm956_vm1, %v967_v11, %v969_v9 }
  0x36   :  { %v461_v16 = vshrl.u32 %v443_v38, %v459_v0  ;;  %v464_v28 = vadd.s32 127, %v463_v3  ;;  %v2523_v36 = vmul.u32.u64.low %v2479_v34, %v970_v30  ;;  %v2524_v38 = vmul.u32.u64.high %v2479_v34, %v970_v30, %v2523_v36 }
  0x37   :  { %v723_v27 = vclz %v2052_v20  ;;  %v1201_v61 = vadd.s32 1, %v2071_v14  ;;  %v2527_v42 = vmul.u32.u64.low %v2479_v34, %v966_v21  ;;  %v2528_v43 = vmul.u32.u64.high %v2479_v34, %v966_v21, %v2527_v42 }
  0x38   :  { %v462_v4 = vor.u32 %v461_v16, %v460_v1  ;;  %v465_v23 = vshll.u32 %v464_v28, 23  ;;  %vm657_vm4 = vcmp.lt.s32.totalorder %v2369_v6, 0  ;;  %v1199_v45 = vor.u32 8388608, %v2518_v22 }
  0x39   :  { %v2053_v44 = vadd.s32 4294967294, %v723_v27  ;;  %vm1202_vm5 = vcmp.gt.s32.totalorder %v1201_v61, 0  ;;  %v476_v47 = vsel %vm2506_vm3, 0, %v474_v19  ;;  %v711_v49 = vadd.s32 %v2447_v59, %v2455_v63 }
  0x3a   :  { %v466_v40 = vor.u32 4788187, %v465_v23  ;;  %v469_v41 = vcvt.s32.f32 %v462_v4  ;;  %v1203_v50 = vsel %vm1202_vm5, %v1201_v61, 0  ;;  %v741_v51 = vsub.s32 4, %v2488_v48 }
  0x3b   :  { %vm2054_vm6 = vcmp.lt.s32.totalorder %v2053_v44, 0  ;;  %v978_v52 = vmul.u32 %v2479_v34, %v962_v24  ;;  %vm980_vm7 = vc.u32 %v2524_v38, %v2527_v42  ;;  %v981_v29 = vadd.s32 1, %v2528_v43 }
  0x3c   :  { %v467_v32 = vand.u32 2147483647, %v466_v40  ;;  %v726_v15 = vsel %vm2054_vm6, 0, %v2053_v44  ;;  %v1205_v53 = vand.u32 31, %v1203_v50  ;;  %v1459_v59 = vand.u32 2147483647, %v2469_v18 }
  0x3d   :  { %v727_v55 = vsub.s32 32, %v726_v15  ;;  %v728_v56 = vshll.u32 %v2494_v58, %v726_v15  ;;  %v731_v57 = vsub.s32 4294967266, %v726_v15  ;;  %v2544_v60 = vand.u32 3, %v476_v47 }
  0x3e   :  { %v470_v14 = vmul.f32 %v469_v41, %v467_v32  ;;  %v982_v62 = vsel %vm980_vm7, %v981_v29, %v2528_v43  ;;  %v1206_v34 = vsub.s32 32, %v1205_v53  ;;  %v2550_v3 = vsel %vm657_vm4, %v741_v51, %v2488_v48 }
  0x3f   :  { %v729_v0 = vshrl.u32 %v711_v49, %v727_v55  ;;  %v732_v1 = vadd.s32 127, %v731_v57  ;;  %v983_v5 = vadd.s32 %v982_v62, %v978_v52  ;;  %v2554_v54 = vshrl.u32 %v1203_v50, 5 }
  0x40   :  { %v471_v63 = vxor.u32 2147483648, %v470_v14  ;;  %v1208_v8 = vshll.u32 %v2302_v31, %v1205_v53  ;;  %v1211_v11 = vshll.u32 %v2303_v33, %v1205_v53  ;;  %vm2563_vm8 = vcmp.le.f32.partialorder %v655_v10, 0.7853982 }
  0x41   :  { %v730_v48 = vor.u32 %v729_v0, %v728_v56  ;;  %v733_v28 = vshll.u32 %v732_v1, 23  ;;  %v984_v9 = vadd.s32 536870912, %v983_v5  ;;  %v1209_v19 = vshrl.u32 %v2303_v33, %v1206_v34 }
  0x42   :  { %v472_v58 = vsel %vm389_vm13, %v471_v63, %v470_v14  ;;  %v1212_v20 = vshrl.u32 %v2304_v35, %v1206_v34  ;;  %v1214_v21 = vshll.u32 %v2304_v35, %v1205_v53  ;;  %v1215_v10 = vshrl.u32 %v2305_v37, %v1206_v34 }
  0x43   :  { %v475_v12 = vsel %vm2506_vm3, %v2361_v2, %v472_v58  ;;  %v734_v4 = vor.u32 4788187, %v733_v28  ;;  %v737_v13 = vcvt.s32.f32 %v730_v48  ;;  %v2570_v23 = vshrl.u32 %v984_v9, 30 }
  0x44   :  { %2239 = vcosq.f32 %v475_v12  ;;  %v1217_v24 = vshll.u32 %v2305_v37, %v1205_v53  ;;  %v1218_v30 = vshrl.u32 %v2306_v39, %v1206_v34  ;;  %v1220_v27 = vshll.u32 %v2306_v39, %v1205_v53 }
  0x45   :  { %2241 = vsinq.f32 %v475_v12  ;;  %v735_v36 = vand.u32 2147483647, %v734_v4  ;;  %v986_v61 = vshll.u32 %v2570_v23, 30  ;;  %v1207_v40 = vshrl.u32 %v2302_v31, %v1206_v34 }
  0x46   :  { %v1221_v41 = vshrl.u32 %v2307_v46, %v1206_v34  ;;  %v1210_v43 = vor.u32 %v1209_v19, %v1208_v8  ;;  %v1213_v44 = vor.u32 %v1212_v20, %v1211_v11  ;;  %v1219_v32 = vor.u32 %v1218_v30, %v1217_v24 }
  0x47   :  { %vm1223_vm9 = vcmp.lt.s32.totalorder %v2554_v54, 1  ;;  %v738_v47 = vmul.f32 %v737_v13, %v735_v36  ;;  %v2580_v49 = vsub.s32 %v983_v5, %v986_v61  ;;  %v1216_v50 = vor.u32 %v1215_v10, %v1214_v21 }
  0x48   :  { %v1222_v51 = vor.u32 %v1221_v41, %v1220_v27  ;;  %vm482_vm10 = vcmp.eq.s32.totalorder %v2544_v60, 0  ;;  %vm1224_vm11 = vcmp.lt.s32.totalorder %v2554_v54, 2  ;;  %vm1225_vm12 = vcmp.lt.s32.totalorder %v2554_v54, 3 }
  0x49   :  { %vm1226_vm13 = vcmp.lt.s32.totalorder %v2554_v54, 4  ;;  %v1239_v52 = vshll.u32 %v1199_v45, 8  ;;  %vm481_vm14 = vcmp.lt.s32.totalorder %v2544_v60, 2  ;;  %v739_v14 = vxor.u32 2147483648, %v738_v47 }
  0x4a   :  { %v989_v15 = vsub.s32 0, %v2580_v49  ;;  %v1227_v29 = vsel %vm1223_vm9, %v1207_v40, %v1210_v43  ;;  %v1228_v53 = vsel %vm1226_vm13, %v1216_v50, 2102212464  ;;  %vm479_vm15 = vweird.f32 %v2361_v2 }
  0x4b   :  { %v1229_v55 = vsel %vm1225_vm12, %v1213_v44, %v1228_v53  ;;  %v1231_v56 = vsel %vm1223_vm9, %v1210_v43, %v1213_v44  ;;  %v1232_v57 = vsel %vm1226_vm13, %v1219_v32, 920167782  ;;  %v1236_v22 = vsel %vm1226_vm13, %v1222_v51, 1326507024 }
  0x4c   :  { %v740_v45 = vsel %vm657_vm4, %v739_v14, %v738_v47  ;;  %v744_v63 = vsel %vm2563_vm8, 0, %v2550_v3  ;;  %vm925_vm0 = vcmp.lt.s32.totalorder %v2372_v7, 0  ;;  %v2062_v62 = vmin.u32 %v989_v15, %v2580_v49 }
  0x4d   :  { %v1235_v34 = vsel %vm1223_vm9, %v1213_v44, %v1216_v50  ;;  %v743_v0 = vsel %vm2563_vm8, %v2369_v6, %v740_v45  ;;  %v1230_v1 = vsel %vm1224_vm11, %v1227_v29, %v1229_v55  ;;  %v1233_v5 = vsel %vm1225_vm12, %v1216_v50, %v1232_v57 }
  0x4e   :  { %v1462_v58 = vand.u32 2139095040, %v2469_v18  ;;  %2243 = vcosq.f32 %v743_v0  ;;  %v991_v3 = vclz %v2062_v62  ;;  %v1234_v8 = vsel %vm1224_vm11, %v1231_v56, %v1233_v5 }
  0x4f   :  { %v1237_v11 = vsel %vm1225_vm12, %v1219_v32, %v1236_v22  ;;  %2245 = vsinq.f32 %v743_v0  ;;  %v2620_v16 = vmul.u32.u64.low %v1239_v52, %v1234_v8  ;;  %v2621_v48 = vmul.u32.u64.high %v1239_v52, %v1234_v8, %v2620_v16 }
  0x50   :  { %v1238_v12 = vsel %vm1224_vm11, %v1235_v34, %v1237_v11  ;;  %vm485_vm1 = vcmp.eq.s32.totalorder %v2544_v60, 2  ;;  %v2063_v9 = vadd.s32 4294967294, %v991_v3  ;;  %v2628_v13 = vand.u32 3, %v744_v63 }
  0x51   :  { %v2240_v28 = vpop.eup %2239  ;;  %v2625_v19 = vmul.u32.u64.low %v1239_v52, %v1238_v12  ;;  %v2626_v20 = vmul.u32.u64.high %v1239_v52, %v1238_v12, %v2625_v19  ;;  %v1009_v10 = vsub.s32 4, %v2570_v23  ;;  %v1463_v24 = vshrl.u32 %v1462_v58, 23 }
  0x52   :  { %v2242_v21 = vpop.eup %2241  ;;  %v486_v4 = vxor.u32 2147483648, %v2240_v28  ;;  %v979_v30 = vadd.s32 %v2527_v42, %v2524_v38  ;;  %vm2064_vm2 = vcmp.lt.s32.totalorder %v2063_v9, 0  ;;  %v1246_v27 = vmul.u32 %v1239_v52, %v1230_v1 }
  0x53   :  { %v483_v54 = vxor.u32 2147483648, %v2242_v21  ;;  %v994_v61 = vsel %vm2064_vm2, 0, %v2063_v9  ;;  %v1249_v40 = vadd.s32 1, %v2621_v48  ;;  %v2081_v41 = vadd.s32 4294967169, %v1463_v24 }
  0x54   :  { %v487_v36 = vsel %vm485_vm1, %v486_v4, %v2242_v21  ;;  %v995_v44 = vsub.s32 32, %v994_v61  ;;  %v996_v32 = vshll.u32 %v2580_v49, %v994_v61  ;;  %v999_v47 = vsub.s32 4294967266, %v994_v61 }
  0x55   :  { %v484_v43 = vsel %vm482_vm10, %v2240_v28, %v483_v54  ;;  %v1010_v38 = vsel %vm925_vm0, %v1009_v10, %v2570_v23  ;;  %vm1248_vm3 = vc.u32 %v2626_v20, %v2620_v16  ;;  %v1466_v42 = vand.u32 8388607, %v1459_v59 }
  0x56   :  { %v488_v50 = vsel %vm481_vm14, %v484_v43, %v487_v36  ;;  %v997_v52 = vshrl.u32 %v979_v30, %v995_v44  ;;  %v1000_v14 = vadd.s32 127, %v999_v47  ;;  %v1250_v49 = vsel %vm1248_vm3, %v1249_v40, %v2621_v48 }
  0x57   :  { %v489_v51 = vsel %vm479_vm15, nan, %v488_v50  ;;  %vm747_vm4 = vweird.f32 %v2369_v6  ;;  %v1251_v60 = vadd.s32 %v1250_v49, %v1246_v27  ;;  %v1469_v15 = vadd.s32 1, %v2081_v41 }
  0x58   :  { %595 = vperm.xlu0 %2235, %v489_v51   ;;  %v2651_v23 = vmul.f32 6.0, %v2361_v2  ;;  %vm749_vm5 = vcmp.lt.s32.totalorder %v2628_v13, 2  ;;  %vm2656_vm6 = vcmp.le.f32.partialorder %v923_v25, 0.7853982  ;;  %v998_v53 = vor.u32 %v997_v52, %v996_v32 }
  0x59   :  { %v1001_v55 = vshll.u32 %v1000_v14, 23  ;;  %v1012_v56 = vsel %vm2656_vm6, 0, %v1010_v38  ;;  %v1252_v57 = vadd.s32 536870912, %v1251_v60  ;;  %vm1470_vm7 = vcmp.gt.s32.totalorder %v1469_v15, 0 }
  0x5a   :  { %v1005_v45 = vcvt.s32.f32 %v998_v53  ;;  %v1467_v63 = vor.u32 8388608, %v1466_v42  ;;  %v1471_v2 = vsel %vm1470_vm7, %v1469_v15, 0  ;;  %v2308_v62 = vmov 0.0  }
  0x5b   :  { %v1002_v22 = vor.u32 4788187, %v1001_v55  ;;  %2120 = vmatprep.subr.bf16.mxu0 %v2308_v62  ;;  %2126 = vmatprep.subr.bf16.mxu1 %v2308_v62  ;;  %v2244_v25 = vpop.eup %2243  ;;  %vm753_vm8 = vcmp.eq.s32.totalorder %v2628_v13, 2  ;;  %v2665_v34 = vshrl.u32 %v1252_v57, 30  ;;  %v1473_v0 = vand.u32 31, %v1471_v2 }
  0x5c   :  { %v1730_v1 = vand.u32 2139095040, %v2651_v23  ;;  %v2246_v5 = vpop.eup %2245  ;;  %vm750_vm9 = vcmp.eq.s32.totalorder %v2628_v13, 0  ;;  %v754_v58 = vxor.u32 2147483648, %v2244_v25  ;;  %v2669_v8 = vand.u32 3, %v1012_v56 }
  0x5d   :  { %v1003_v3 = vand.u32 2147483647, %v1002_v22  ;;  %v751_v11 = vxor.u32 2147483648, %v2246_v5  ;;  %v1254_v12 = vshll.u32 %v2665_v34, 30  ;;  %v1474_v48 = vsub.s32 32, %v1473_v0 }
  0x5e   :  { %v1727_v28 = vand.u32 2147483647, %v2651_v23  ;;  %v755_v9 = vsel %vm753_vm8, %v754_v58, %v2246_v5  ;;  %v2675_v21 = vadd.s32 %v2620_v16, %v2626_v20  ;;  %v2677_v4 = vshll.u32 %v1467_v63, 8 }
  0x5f   :  { %v1006_v19 = vmul.f32 %v1005_v45, %v1003_v3  ;;  %v752_v10 = vsel %vm750_vm9, %v2244_v25, %v751_v11  ;;  %v2679_v24 = vsub.s32 %v1251_v60, %v1254_v12  ;;  %v1476_v54 = vshll.u32 %v2302_v31, %v1473_v0 }
  0x60   :  { %v1731_v30 = vshrl.u32 %v1730_v1, 23  ;;  %v756_v27 = vsel %vm749_vm5, %v752_v10, %v755_v9  ;;  %v1477_v61 = vshrl.u32 %v2303_v33, %v1474_v48  ;;  %v1479_v40 = vshll.u32 %v2303_v33, %v1473_v0  ;;  %v63_v9 = vld [vmem:[%s3591_s4] sm:$0x7] }
  0x61   :  { %v1007_v36 = vxor.u32 2147483648, %v1006_v19  ;;  %v757_v16 = vsel %vm747_vm4, nan, %v756_v27  ;;  %v1257_v20 = vsub.s32 0, %v2679_v24  ;;  %v1480_v41 = vshrl.u32 %v2304_v35, %v1474_v48 }
  0x62   :  { %v2692_v43 = vand.u32 8388607, %v1727_v28  ;;  %863 = vperm.xlu0 %2235, %v757_v16   ;;  %v1472_v44 = vshrl.u32 %v1471_v2, 5  ;;  %v1482_v32 = vshll.u32 %v2304_v35, %v1473_v0  ;;  %v1483_v47 = vshrl.u32 %v2305_v37, %v1474_v48 }
  0x63   :  { %v1008_v13 = vsel %vm925_vm0, %v1007_v36, %v1006_v19  ;;  %v2072_v50 = vmin.u32 %v1257_v20, %v2679_v24  ;;  %v2091_v38 = vadd.s32 4294967169, %v1731_v30  ;;  %vm68_vm10 = vcmask 1042432  }
  0x64   :  { %v1011_v6 = vsel %vm2656_vm6, %v2372_v7, %v1008_v13  ;;  %v1475_v42 = vshrl.u32 %v2302_v31, %v1474_v48  ;;  %v1478_v51 = vor.u32 %v1477_v61, %v1476_v54  ;;  %v1481_v52 = vor.u32 %v1480_v41, %v1479_v40 }
  0x65   :  { %2247 = vcosq.f32 %v1011_v6  ;;  %v1259_v14 = vclz %v2072_v50  ;;  %v1485_v49 = vshll.u32 %v2305_v37, %v1473_v0  ;;  %v1486_v60 = vshrl.u32 %v2306_v39, %v1474_v48 }
  0x66   :  { %2249 = vsinq.f32 %v1011_v6  ;;  %v1484_v15 = vor.u32 %v1483_v47, %v1482_v32  ;;  %v1488_v53 = vshll.u32 %v2306_v39, %v1473_v0  ;;  %v1489_v29 = vshrl.u32 %v2307_v46, %v1474_v48 }
  0x67   :  { %vm1491_vm11 = vcmp.lt.s32.totalorder %v1472_v44, 1  ;;  %v2073_v55 = vadd.s32 4294967294, %v1259_v14  ;;  %v1487_v56 = vor.u32 %v1486_v60, %v1485_v49  ;;  %vm1493_vm12 = vcmp.lt.s32.totalorder %v1472_v44, 3 }
  0x68   :  { %vm1494_vm13 = vcmp.lt.s32.totalorder %v1472_v44, 4  ;;  %v1490_v57 = vor.u32 %v1489_v29, %v1488_v53  ;;  %vm1492_vm14 = vcmp.lt.s32.totalorder %v1472_v44, 2  ;;  %v1499_v45 = vsel %vm1491_vm11, %v1478_v51, %v1481_v52 }
  0x69   :  { %v1496_v22 = vsel %vm1494_vm13, %v1484_v15, 2102212464  ;;  %vm2074_vm15 = vcmp.lt.s32.totalorder %v2073_v55, 0  ;;  %v1495_v63 = vsel %vm1491_vm11, %v1475_v42, %v1478_v51  ;;  %v1500_v25 = vsel %vm1494_vm13, %v1487_v56, 920167782 }
  0x6a   :  { %v1497_v2 = vsel %vm1493_vm12, %v1481_v52, %v1496_v22  ;;  %v1262_v1 = vsel %vm2074_vm15, 0, %v2073_v55  ;;  %v1501_v0 = vsel %vm1493_vm12, %v1484_v15, %v1500_v25  ;;  %v1503_v5 = vsel %vm1491_vm11, %v1481_v52, %v1484_v15 }
  0x6b   :  { %v1504_v58 = vsel %vm1494_vm13, %v1490_v57, 1326507024  ;;  %vm1017_vm0 = vcmp.lt.s32.totalorder %v2669_v8, 2  ;;  %vm1193_vm1 = vcmp.lt.s32.totalorder %v2383_v26, 0  ;;  %v1263_v3 = vsub.s32 32, %v1262_v1 }
  0x6c   :  { %v1264_v11 = vshll.u32 %v2679_v24, %v1262_v1  ;;  %v1267_v12 = vsub.s32 4294967266, %v1262_v1  ;;  %v1502_v48 = vsel %vm1492_vm14, %v1499_v45, %v1501_v0  ;;  %vm1015_vm2 = vweird.f32 %v2372_v7  ;;  %v2039_v24 = vld [vmem:[%s3591_s4 + $0x4] sm:$0x7] }
  0x6d   :  { %v1498_v19 = vsel %vm1492_vm14, %v1495_v63, %v1497_v2  ;;  %v1505_v10 = vsel %vm1493_vm12, %v1487_v56, %v1504_v58  ;;  %v2723_v54 = vmul.u32.u64.low %v2677_v4, %v1502_v48  ;;  %v2724_v30 = vmul.u32.u64.high %v2677_v4, %v1502_v48, %v2723_v54 }
  0x6e   :  { %v1265_v27 = vshrl.u32 %v2675_v21, %v1263_v3  ;;  %v1268_v36 = vadd.s32 127, %v1267_v12  ;;  %v1506_v61 = vsel %vm1492_vm14, %v1503_v5, %v1505_v10  ;;  %v1737_v40 = vadd.s32 1, %v2091_v38 }
  0x6f   :  { %v1277_v16 = vsub.s32 4, %v2665_v34  ;;  %v2734_v20 = vmul.u32.u64.low %v2677_v4, %v1506_v61  ;;  %v2735_v41 = vmul.u32.u64.high %v2677_v4, %v1506_v61, %v2734_v20  ;;  %v70_v13 = vsel %vm68_vm10, %v63_v9, 0 }
  0x70   :  { %vm2740_vm3 = vcmp.le.f32.partialorder %v1191_v17, 0.7853982  ;;  %v1266_v47 = vor.u32 %v1265_v27, %v1264_v11  ;;  %v1269_v21 = vshll.u32 %v1268_v36, 23  ;;  %vm1738_vm4 = vcmp.gt.s32.totalorder %v1737_v40, 0  ;;  %2121 = vmatpush3.bf16.msra.mxu0 %v70_v13 }
  0x71   :  { %v344_v44 = vsel %vm68_vm10, %v2039_v24, 0  ;;  %v1514_v6 = vmul.u32 %v2677_v4, %v1498_v19  ;;  %v1517_v50 = vadd.s32 1, %v2724_v30  ;;  %v1739_v38 = vsel %vm1738_vm4, %v1737_v40, 0  ;;  %2132 = vmatprep.subr.bf16.mxu0 %v2308_v62 }
  0x72   :  { %2127 = vmatpush3.bf16.msra.mxu1 %v344_v44  ;;  %v2248_v42 = vpop.eup %2247  ;;  %vm1021_vm5 = vcmp.eq.s32.totalorder %v2669_v8, 2  ;;  %v1270_v17 = vor.u32 4788187, %v1269_v21  ;;  %v1273_v51 = vcvt.s32.f32 %v1266_v47  ;;  %v1741_v52 = vand.u32 31, %v1739_v38 }
  0x73   :  { %vm2309_vm6 = vmmov 0   ;;  %v2250_v4 = vpop.eup %2249  ;;  %vm1018_vm7 = vcmp.eq.s32.totalorder %v2669_v8, 0  ;;  %v1022_v14 = vxor.u32 2147483648, %v2248_v42  ;;  %vm1516_vm8 = vc.u32 %v2735_v41, %v2723_v54  ;;  %2138 = vmatprep.subr.bf16.mxu1 %v2308_v62 }
  0x74   :  { %2122 = vmatprep.mubr.msk.bf16.mxu0 %vm2309_vm6, %v2308_v62  ;;  %2128 = vmatprep.mubr.msk.bf16.mxu1 %vm2309_vm6, %v2308_v62  ;;  %v1735_v49 = vor.u32 8388608, %v2692_v43  ;;  %v1019_v60 = vxor.u32 2147483648, %v2250_v4  ;;  %v1271_v15 = vand.u32 2147483647, %v1270_v17  ;;  %v1518_v53 = vsel %vm1516_vm8, %v1517_v50, %v2724_v30 }
  0x75   :  { %v1742_v29 = vsub.s32 32, %v1741_v52  ;;  %v1023_v55 = vsel %vm1021_vm5, %v1022_v14, %v2250_v4  ;;  %v1278_v56 = vsel %vm1193_vm1, %v1277_v16, %v2665_v34  ;;  %v1519_v57 = vadd.s32 %v1518_v53, %v1514_v6  ;;  %v2028_v6 = vld [vmem:[%s3592_s3] ss:$0 sm:$0xff] }
  0x76   :  { %v1740_v22 = vshrl.u32 %v1739_v38, 5  ;;  %v1020_v45 = vsel %vm1018_vm7, %v2248_v42, %v1019_v60  ;;  %v1274_v63 = vmul.f32 %v1273_v51, %v1271_v15  ;;  %v1744_v43 = vshll.u32 %v2302_v31, %v1741_v52 }
  0x77   :  { %v1745_v2 = vshrl.u32 %v2303_v33, %v1742_v29  ;;  %v1024_v25 = vsel %vm1017_vm0, %v1020_v45, %v1023_v55  ;;  %v1520_v1 = vadd.s32 536870912, %v1519_v57  ;;  %v1747_v0 = vshll.u32 %v2303_v33, %v1741_v52 }
  0x78   :  { %v1748_v5 = vshrl.u32 %v2304_v35, %v1742_v29  ;;  %v1025_v58 = vsel %vm1015_vm2, nan, %v1024_v25  ;;  %v1275_v34 = vxor.u32 2147483648, %v1274_v63  ;;  %v1750_v3 = vshll.u32 %v2304_v35, %v1741_v52 }
  0x79   :  { %v1751_v11 = vshrl.u32 %v2305_v37, %v1742_v29  ;;  %1131 = vperm.xlu0 %2235, %v1025_v58   ;;  %v2774_v12 = vshrl.u32 %v1520_v1, 30  ;;  %v1743_v48 = vshrl.u32 %v2302_v31, %v1742_v29  ;;  %v1753_v8 = vshll.u32 %v2305_v37, %v1741_v52 }
  0x7a   :  { %v1754_v9 = vshrl.u32 %v2306_v39, %v1742_v29  ;;  %v1276_v19 = vsel %vm1193_vm1, %v1275_v34, %v1274_v63  ;;  %v1746_v10 = vor.u32 %v1745_v2, %v1744_v43  ;;  %v1756_v7 = vshll.u32 %v2306_v39, %v1741_v52 }
  0x7b   :  { %v1757_v30 = vshrl.u32 %v2307_v46, %v1742_v29  ;;  %v1279_v24 = vsel %vm2740_vm3, %v2383_v26, %v1276_v19  ;;  %v1522_v27 = vshll.u32 %v2774_v12, 30  ;;  %v1749_v36 = vor.u32 %v1748_v5, %v1747_v0 }
  0x7c   :  { %v1755_v61 = vor.u32 %v1754_v9, %v1753_v8  ;;  %2251 = vcosq.f32 %v1279_v24  ;;  %v1752_v40 = vor.u32 %v1751_v11, %v1750_v3  ;;  %vm1759_vm9 = vcmp.lt.s32.totalorder %v1740_v22, 1 }
  0x7d   :  { %v1758_v16 = vor.u32 %v1757_v30, %v1756_v7  ;;  %v1280_v20 = vsel %vm2740_vm3, 0, %v1278_v56  ;;  %2253 = vsinq.f32 %v1279_v24  ;;  %v2789_v13 = vsub.s32 %v1519_v57, %v1522_v27  ;;  %v38_v47 = vpop.permute.xlu0 %37 }
  0x7e   :  { %vm1761_vm11 = vcmp.lt.s32.totalorder %v1740_v22, 3  ;;  %vm1760_vm12 = vcmp.lt.s32.totalorder %v1740_v22, 2  ;;  %vm1762_vm13 = vcmp.lt.s32.totalorder %v1740_v22, 4  ;;  %v1763_v21 = vsel %vm1759_vm9, %v1743_v48, %v1746_v10 }
  0x7f   :  { %v1775_v44 = vshll.u32 %v1735_v49, 8  ;;  %v1525_v50 = vsub.s32 0, %v2789_v13  ;;  %v1764_v38 = vsel %vm1762_vm13, %v1752_v40, 2102212464  ;;  %v1767_v32 = vsel %vm1759_vm9, %v1746_v10, %v1749_v36 }
  0x80   :  { %v1768_v42 = vsel %vm1762_vm13, %v1755_v61, 920167782  ;;  %v1765_v17 = vsel %vm1761_vm11, %v1749_v36, %v1764_v38  ;;  %v1771_v52 = vsel %vm1759_vm9, %v1749_v36, %v1752_v40  ;;  %v1772_v4 = vsel %vm1762_vm13, %v1758_v16, 1326507024 }
  0x81   :  { %v1769_v51 = vsel %vm1761_vm11, %v1752_v40, %v1768_v42  ;;  %v1284_v14 = vand.u32 3, %v1280_v20  ;;  %v2082_v49 = vmin.u32 %v1525_v50, %v2789_v13  ;;  %v1766_v60 = vsel %vm1760_vm12, %v1763_v21, %v1765_v17  ;;  %v43_v55 = vpop.permute.xlu0 %42 }
  0x82   :  { %v1770_v15 = vsel %vm1760_vm12, %v1767_v32, %v1769_v51  ;;  %v1773_v53 = vsel %vm1761_vm11, %v1755_v61, %v1772_v4  ;;  %v51_v29 = vsub.f32 %v38_v47, %v2028_v6  ;;  %vm1283_vm14 = vweird.f32 %v2383_v26 }
  0x83   :  { %v1527_v56 = vclz %v2082_v49  ;;  %v1774_v57 = vsel %vm1760_vm12, %v1771_v52, %v1773_v53  ;;  %v2805_v45 = vmul.u32.u64.low %v1775_v44, %v1770_v15  ;;  %v2806_v63 = vmul.u32.u64.high %v1775_v44, %v1770_v15, %v2805_v45  ;;  %v2049_v15 = vld [vmem:[%s3591_s4 + $0x8] sm:$0x7] }
  0x84   :  { %v2810_v43 = vmul.u32.u64.low %v1775_v44, %v1774_v57  ;;  %v2811_v2 = vmul.u32.u64.high %v1775_v44, %v1774_v57, %v2810_v43  ;;  %v53_v25 = vmul.f32 %v51_v29, %v51_v29  ;;  %vm1285_vm15 = vcmp.lt.s32.totalorder %v1284_v14, 2  ;;  %v2059_v29 = vld [vmem:[%s3591_s4 + $0xc] sm:$0x7] }
  0x85   :  { %vm1461_vm0 = vcmp.lt.s32.totalorder %v2469_v18, 0  ;;  %v2083_v1 = vadd.s32 4294967294, %v1527_v56  ;;  %v52_v0 = vsub.f32 %v43_v55, %v2028_v6  ;;  %vm1286_vm1 = vcmp.eq.s32.totalorder %v1284_v14, 0  ;;  %v2299_v55 = vld [vmem:[%s3590_s1] sm:$0xff] }
  0x86   :  { %v1545_v5 = vsub.s32 4, %v2774_v12  ;;  %v1782_v22 = vmul.u32 %v1775_v44, %v1766_v60  ;;  %v55_v58 = vmul.f32 -1.0, %v53_v25  ;;  %v1515_v34 = vadd.s32 %v2723_v54, %v2735_v41  ;;  %v2825_v54 = vld [vmem:[%s3590_s1 + $0x8] sm:$0xff] }
  0x87   :  { %vm2084_vm2 = vcmp.lt.s32.totalorder %v2083_v1, 0  ;;  %v1785_v3 = vadd.s32 1, %v2806_v63  ;;  %v54_v11 = vmul.f32 %v52_v0, %v52_v0  ;;  %vm1289_vm3 = vcmp.eq.s32.totalorder %v1284_v14, 2  ;;  %v2079_v0 = vld [vmem:[%s3591_s4 + $0x14] sm:$0x7] }
  0x88   :  { %v1530_v48 = vsel %vm2084_vm2, 0, %v2083_v1  ;;  %vm1784_vm4 = vc.u32 %v2811_v2, %v2805_v45  ;;  %v57_v8 = vmul.f32 1.442695, %v55_v58  ;;  %v1546_v27 = vsel %vm1461_vm0, %v1545_v5, %v2774_v12 }
  0x89   :  { %v2252_v9 = vpop.eup %2251  ;;  %v1531_v19 = vsub.s32 32, %v1530_v48  ;;  %v1532_v10 = vshll.u32 %v2789_v13, %v1530_v48  ;;  %v1535_v7 = vsub.s32 4294967266, %v1530_v48  ;;  %v1786_v30 = vsel %vm1784_vm4, %v1785_v3, %v2806_v63  ;;  %v2069_v63 = vld [vmem:[%s3591_s4 + $0x10] sm:$0x7] }
  0x8a   :  { %v2254_v41 = vpop.eup %2253  ;;  %v1290_v24 = vxor.u32 2147483648, %v2252_v9  ;;  %v1787_v36 = vadd.s32 %v1786_v30, %v1782_v22  ;;  %v56_v61 = vmul.f32 -1.0, %v54_v11  ;;  %v490_v13 = vand.u32 2147483647, %v2825_v54 }
  0x8b   :  { %v1287_v40 = vxor.u32 2147483648, %v2254_v41  ;;  %v1533_v16 = vshrl.u32 %v1515_v34, %v1531_v19  ;;  %v1536_v20 = vadd.s32 127, %v1535_v7  ;;  %v493_v6 = vand.u32 2139095040, %v2825_v54 }
  0x8c   :  { %v1291_v47 = vsel %vm1289_vm3, %v1290_v24, %v2254_v41  ;;  %v1788_v21 = vadd.s32 536870912, %v1787_v36  ;;  %v59_v44 = vmul.f32 1.442695, %v56_v61  ;;  %2255 = vpow2.f32 %v57_v8 }
  0x8d   :  { %v1288_v50 = vsel %vm1286_vm1, %v2252_v9, %v1287_v40  ;;  %v1534_v38 = vor.u32 %v1533_v16, %v1532_v10  ;;  %v1537_v32 = vshll.u32 %v1536_v20, 23  ;;  %v494_v17 = vshrl.u32 %v493_v6, 23 }
  0x8e   :  { %v1292_v12 = vsel %vm1285_vm15, %v1288_v50, %v1291_v47  ;;  %v1789_v42 = vshrl.u32 %v1788_v21, 30  ;;  %2257 = vpow2.f32 %v59_v44  ;;  %v497_v49 = vand.u32 8388607, %v490_v13 }
  0x8f   :  { %v1293_v51 = vsel %vm1283_vm14, nan, %v1292_v12  ;;  %v1538_v52 = vor.u32 4788187, %v1537_v32  ;;  %v1541_v4 = vcvt.s32.f32 %v1534_v38  ;;  %vm2841_vm5 = vcmp.le.f32.partialorder %v1459_v59, 0.7853982 }
  0x90   :  { %1399 = vperm.xlu0 %2235, %v1293_v51   ;;  %v1790_v14 = vshll.u32 %v1789_v42, 30  ;;  %v2045_v53 = vadd.s32 4294967169, %v494_v17  ;;  %v2854_v56 = vmul.f32 0.0, %v2299_v55  ;;  %v1548_v59 = vsel %vm2841_vm5, 0, %v1546_v27 }
  0x91   :  { %v1539_v26 = vand.u32 2147483647, %v1538_v52  ;;  %vm1729_vm7 = vcmp.lt.s32.totalorder %v2651_v23, 0  ;;  %v1813_v1 = vsub.s32 4, %v1789_v42  ;;  %vm64_vm8 = vcmask 48128  }
  0x92   :  { %v2859_v57 = vsub.s32 %v1787_v36, %v1790_v14  ;;  %v500_v43 = vadd.s32 1, %v2045_v53  ;;  %v498_v5 = vor.u32 8388608, %v497_v49  ;;  %v610_v58 = vsel %vm68_vm10, %v2049_v15, 0 }
  0x93   :  { %v1542_v25 = vmul.f32 %v1541_v4, %v1539_v26  ;;  %v118_v34 = vand.u32 2139095040, %v2854_v56  ;;  %v2870_v11 = vand.u32 3, %v1548_v59  ;;  %v878_v48 = vsel %vm68_vm10, %v2059_v29, 0 }
  0x94   :  { %v1793_v22 = vsub.s32 0, %v2859_v57  ;;  %vm501_vm9 = vcmp.gt.s32.totalorder %v500_v43, 0  ;;  %v1783_v9 = vadd.s32 %v2805_v45, %v2811_v2  ;;  %v2877_v10 = vsel %vm68_vm10, %v2069_v63, 0 }
  0x95   :  { %v1543_v3 = vxor.u32 2147483648, %v1542_v25  ;;  %v502_v8 = vsel %vm501_vm9, %v500_v43, 0  ;;  %v2880_v7 = vsel %vm68_vm10, %v2079_v0, 0  ;;  %v2886_v41 = vsel %vm1729_vm7, %v1813_v1, %v1789_v42 }
  0x96   :  { %v2092_v19 = vmin.u32 %v1793_v22, %v2859_v57  ;;  %v504_v24 = vand.u32 31, %v502_v8  ;;  %v2888_v27 = vshll.u32 %v498_v5, 8  ;;  %v2893_v36 = vshrl.u32 %v502_v8, 5 }
  0x97   :  { %v1544_v30 = vsel %vm1461_vm0, %v1543_v3, %v1542_v25  ;;  %v2895_v61 = vshrl.u32 %v118_v34, 23  ;;  %vm1557_vm12 = vcmp.eq.s32.totalorder %v2870_v11, 2  ;;  %vm2917_vm13 = vcmp.le.f32.partialorder %v1727_v28, 0.7853982 }
  0x98   :  { %v1547_v45 = vsel %vm2841_vm5, %v2469_v18, %v1544_v30  ;;  %v1795_v2 = vclz %v2092_v19  ;;  %v505_v40 = vsub.s32 32, %v504_v24  ;;  %v507_v16 = vshll.u32 %v2302_v31, %v504_v24 }
  0x99   :  { %2259 = vcosq.f32 %v1547_v45  ;;  %v510_v20 = vshll.u32 %v2303_v33, %v504_v24  ;;  %v2256_v47 = vpop.eup %2255  ;;  %v513_v44 = vshll.u32 %v2304_v35, %v504_v24  ;;  %v516_v6 = vshll.u32 %v2305_v37, %v504_v24 }
  0x9a   :  { %2261 = vsinq.f32 %v1547_v45  ;;  %v2093_v21 = vadd.s32 4294967294, %v1795_v2  ;;  %v506_v38 = vshrl.u32 %v2302_v31, %v505_v40  ;;  %v508_v32 = vshrl.u32 %v2303_v33, %v505_v40 }
  0x9b   :  { %v2258_v50 = vpop.eup %2257  ;;  %v511_v12 = vshrl.u32 %v2304_v35, %v505_v40  ;;  %v514_v42 = vshrl.u32 %v2305_v37, %v505_v40  ;;  %v517_v51 = vshrl.u32 %v2306_v39, %v505_v40  ;;  %v519_v52 = vshll.u32 %v2306_v39, %v504_v24 }
  0x9c   :  { %vm2094_vm11 = vcmp.lt.s32.totalorder %v2093_v21, 0  ;;  %v2905_v17 = vpack.c.bf16 %v2258_v50, %v2256_v47  ;;  %v509_v49 = vor.u32 %v508_v32, %v507_v16  ;;  %v520_v59 = vshrl.u32 %v2307_v46, %v505_v40 }
  0x9d   :  { %v1798_v4 = vsel %vm2094_vm11, 0, %v2093_v21  ;;  %v512_v60 = vor.u32 %v511_v12, %v510_v20  ;;  %v515_v14 = vor.u32 %v514_v42, %v513_v44  ;;  %v518_v29 = vor.u32 %v517_v51, %v516_v6 }
  0x9e   :  { %v1799_v15 = vsub.s32 32, %v1798_v4  ;;  %v1800_v53 = vshll.u32 %v2859_v57, %v1798_v4  ;;  %v1803_v26 = vsub.s32 4294967266, %v1798_v4  ;;  %2123 = vmatmul.mubr.msk.bf16.vlgmr.msra.gmra.mxu0 %vm64_vm8, %v2905_v17  ;;  %2129 = vmatmul.mubr.msk.bf16.vlgmr.msra.gmra.mxu1 %vm64_vm8, %v2905_v17  ;;  %vm522_vm14 = vcmp.lt.s32.totalorder %v2893_v36, 1 }
  0x9f   :  { %2133 = vmatpush3.bf16.msra.mxu0 %v610_v58  ;;  %2139 = vmatpush3.bf16.msra.mxu1 %v878_v48  ;;  %vm523_vm15 = vcmp.lt.s32.totalorder %v2893_v36, 2  ;;  %vm524_vm0 = vcmp.lt.s32.totalorder %v2893_v36, 3  ;;  %vm525_vm1 = vcmp.lt.s32.totalorder %v2893_v36, 4  ;;  %v526_v28 = vsel %vm522_vm14, %v506_v38, %v509_v49 }
  0xa0   :  { %v1801_v57 = vshrl.u32 %v1783_v9, %v1799_v15  ;;  %v1804_v63 = vadd.s32 127, %v1803_v26  ;;  %2134 = vmatprep.mubr.msk.bf16.mxu0 %vm2309_vm6, %v2308_v62  ;;  %2140 = vmatprep.mubr.msk.bf16.mxu1 %vm2309_vm6, %v2308_v62  ;;  %vm1551_vm2 = vweird.f32 %v2469_v18  ;;  %v521_v43 = vor.u32 %v520_v59, %v519_v52 }
  0xa1   :  { %2144 = vmatprep.subr.bf16.mxu0 %v2308_v62  ;;  %2150 = vmatprep.subr.bf16.mxu1 %v2308_v62  ;;  %v527_v25 = vsel %vm525_vm1, %v515_v14, 2102212464  ;;  %v530_v1 = vsel %vm522_vm14, %v509_v49, %v512_v60  ;;  %v531_v0 = vsel %vm525_vm1, %v518_v29, 920167782  ;;  %v534_v48 = vsel %vm522_vm14, %v512_v60, %v515_v14 }
  0xa2   :  { %v1802_v5 = vor.u32 %v1801_v57, %v1800_v53  ;;  %v1805_v22 = vshll.u32 %v1804_v63, 23  ;;  %v528_v58 = vsel %vm524_vm0, %v512_v60, %v527_v25  ;;  %v532_v34 = vsel %vm524_vm0, %v515_v14, %v531_v0 }
  0xa3   :  { %v533_v3 = vsel %vm523_vm15, %v530_v1, %v532_v34  ;;  %v535_v8 = vsel %vm525_vm1, %v521_v43, 1326507024  ;;  %v115_v9 = vand.u32 2147483647, %v2854_v56  ;;  %v529_v24 = vsel %vm523_vm15, %v526_v28, %v528_v58 }
  0xa4   :  { %v1806_v19 = vor.u32 4788187, %v1805_v22  ;;  %v1809_v30 = vcvt.s32.f32 %v1802_v5  ;;  %v536_v45 = vsel %vm524_vm0, %v518_v29, %v535_v8  ;;  %v2030_v20 = vadd.s32 4294967169, %v2895_v61 }
  0xa5   :  { %v537_v2 = vsel %vm523_vm15, %v534_v48, %v536_v45  ;;  %v2953_v40 = vmul.u32.u64.low %v2888_v27, %v533_v3  ;;  %v2954_v16 = vmul.u32.u64.high %v2888_v27, %v533_v3, %v2953_v40  ;;  %v2967_v36 = vmul.f32 0.0, %v2825_v54 }
  0xa6   :  { %v2260_v47 = vpop.eup %2259  ;;  %v1807_v21 = vand.u32 2147483647, %v1806_v19  ;;  %2135 = vmatmul.mubr.msk.bf16.vlgmr.msra.gmra.mxu0 %vm64_vm8, %v2905_v17  ;;  %2141 = vmatmul.mubr.msk.bf16.vlgmr.msra.gmra.mxu1 %vm64_vm8, %v2905_v17  ;;  %v2963_v44 = vmul.u32.u64.low %v2888_v27, %v537_v2  ;;  %v2964_v6 = vmul.u32.u64.high %v2888_v27, %v537_v2, %v2963_v44  ;;  %vm1553_vm3 = vcmp.lt.s32.totalorder %v2870_v11, 2 }
  0xa7   :  { %v2262_v50 = vpop.eup %2261  ;;  %vm1554_vm4 = vcmp.eq.s32.totalorder %v2870_v11, 0  ;;  %v1558_v61 = vxor.u32 2147483648, %v2260_v47  ;;  %2145 = vmatpush3.bf16.msra.mxu0 %v2877_v10  ;;  %2151 = vmatpush3.bf16.msra.mxu1 %v2880_v7  ;;  %v125_v38 = vadd.s32 1, %v2030_v20  ;;  %v1816_v42 = vsel %vm2917_vm13, 0, %v2886_v41  ;;  %v2089_v7 = vld [vmem:[%s3591_s4 + $0x18] sm:$0x7] }
  0xa8   :  { %v1555_v32 = vxor.u32 2147483648, %v2262_v50  ;;  %v1810_v12 = vmul.f32 %v1809_v30, %v1807_v21  ;;  %2146 = vmatprep.mubr.msk.bf16.mxu0 %vm2309_vm6, %v2308_v62  ;;  %2152 = vmatprep.mubr.msk.bf16.mxu1 %vm2309_vm6, %v2308_v62  ;;  %v545_v51 = vmul.u32 %v2888_v27, %v529_v24  ;;  %v548_v52 = vadd.s32 1, %v2954_v16 }
  0xa9   :  { %v1559_v10 = vsel %vm1557_vm12, %v1558_v61, %v2262_v50  ;;  %2156 = vmatprep.subr.bf16.mxu0 %v2308_v62  ;;  %v122_v41 = vand.u32 8388607, %v115_v9  ;;  %vm126_vm5 = vcmp.gt.s32.totalorder %v125_v38, 0  ;;  %2162 = vmatprep.subr.bf16.mxu1 %v2308_v62  ;;  %vm547_vm9 = vc.u32 %v2964_v6, %v2953_v40 }
  0xaa   :  { %v1556_v27 = vsel %vm1554_vm4, %v2260_v47, %v1555_v32  ;;  %v1811_v4 = vxor.u32 2147483648, %v1810_v12  ;;  %v221_v49 = vand.u32 2139095040, %v2967_v36  ;;  %v549_v14 = vsel %vm547_vm9, %v548_v52, %v2954_v16 }
  0xab   :  { %v1560_v60 = vsel %vm1553_vm3, %v1556_v27, %v1559_v10  ;;  %v127_v15 = vsel %vm126_vm5, %v125_v38, 0  ;;  %v1682_v29 = vsel %vm68_vm10, %v2089_v7, 0  ;;  %v550_v59 = vadd.s32 %v549_v14, %v545_v51 }
  0xac   :  { %v1561_v53 = vsel %vm1551_vm2, nan, %v1560_v60  ;;  %v1812_v26 = vsel %vm1729_vm7, %v1811_v4, %v1810_v12  ;;  %v3007_v63 = vand.u32 3, %v1816_v42  ;;  %v123_v11 = vor.u32 8388608, %v122_v41 }
  0xad   :  { %1667 = vperm.xlu0 %2235, %v1561_v53   ;;  %v1815_v57 = vsel %vm2917_vm13, %v2651_v23, %v1812_v26  ;;  %v129_v28 = vand.u32 31, %v127_v15  ;;  %v551_v18 = vadd.s32 536870912, %v550_v59  ;;  %v128_v43 = vshrl.u32 %v127_v15, 5 }
  0xae   :  { %2263 = vcosq.f32 %v1815_v57  ;;  %2147 = vmatmul.mubr.msk.bf16.vlgmr.msra.gmra.mxu0 %vm64_vm8, %v2905_v17  ;;  %2153 = vmatmul.mubr.msk.bf16.vlgmr.msra.gmra.mxu1 %vm64_vm8, %v2905_v17  ;;  %v222_v25 = vshrl.u32 %v221_v49, 23  ;;  %v3031_v2 = vshll.u32 %v123_v11, 8  ;;  %vm1819_vm12 = vweird.f32 %v2651_v23 }
  0xaf   :  { %2265 = vsinq.f32 %v1815_v57  ;;  %2157 = vmatpush3.bf16.msra.mxu0 %v1682_v29  ;;  %2158 = vmatprep.mubr.msk.bf16.mxu0 %vm2309_vm6, %v2308_v62  ;;  %v130_v55 = vsub.s32 32, %v129_v28  ;;  %v132_v1 = vshll.u32 %v2302_v31, %v129_v28  ;;  %v135_v0 = vshll.u32 %v2303_v33, %v129_v28 }
  0xb0   :  { %v3017_v5 = vshrl.u32 %v551_v18, 30  ;;  %v138_v22 = vshll.u32 %v2304_v35, %v129_v28  ;;  %v141_v58 = vshll.u32 %v2305_v37, %v129_v28  ;;  %v144_v34 = vshll.u32 %v2306_v39, %v129_v28  ;;  %2166 = vmatprep.mubr.msk.bf16.mxu1 %vm2309_vm6, %v2308_v62 }
  0xb1   :  { %v131_v3 = vshrl.u32 %v2302_v31, %v130_v55  ;;  %v133_v48 = vshrl.u32 %v2303_v33, %v130_v55  ;;  %v136_v8 = vshrl.u32 %v2304_v35, %v130_v55  ;;  %v139_v19 = vshrl.u32 %v2305_v37, %v130_v55 }
  0xb2   :  { %v553_v30 = vshll.u32 %v3017_v5, 30  ;;  %v142_v24 = vshrl.u32 %v2306_v39, %v130_v55  ;;  %v145_v45 = vshrl.u32 %v2307_v46, %v130_v55  ;;  %vm147_vm10 = vcmp.lt.s32.totalorder %v128_v43, 1 }
  0xb3   :  { %v134_v16 = vor.u32 %v133_v48, %v132_v1  ;;  %v137_v20 = vor.u32 %v136_v8, %v135_v0  ;;  %v140_v47 = vor.u32 %v139_v19, %v138_v22  ;;  %vm149_vm6 = vcmp.lt.s32.totalorder %v128_v43, 3 }
  0xb4   :  { %v3033_v21 = vsub.s32 %v550_v59, %v553_v30  ;;  %v143_v44 = vor.u32 %v142_v24, %v141_v58  ;;  %v146_v50 = vor.u32 %v145_v45, %v144_v34  ;;  %vm148_vm7 = vcmp.lt.s32.totalorder %v128_v43, 2 }
  0xb5   :  { %vm150_vm11 = vcmp.lt.s32.totalorder %v128_v43, 4  ;;  %v151_v61 = vsel %vm147_vm10, %v131_v3, %v134_v16  ;;  %v2034_v38 = vadd.s32 4294967169, %v222_v25  ;;  %v155_v42 = vsel %vm147_vm10, %v134_v16, %v137_v20 }
  0xb6   :  { %2159 = vmatmul.mubr.msk.bf16.vlgmr.msra.gmra.mxu0 %vm64_vm8, %v2905_v17  ;;  %v556_v32 = vsub.s32 0, %v3033_v21  ;;  %v152_v12 = vsel %vm150_vm11, %v140_v47, 2102212464  ;;  %v156_v51 = vsel %vm150_vm11, %v143_v44, 920167782  ;;  %v159_v52 = vsel %vm147_vm10, %v137_v20, %v140_v47 }
  0xb7   :  { %v153_v10 = vsel %vm149_vm6, %v137_v20, %v152_v12  ;;  %v157_v7 = vsel %vm149_vm6, %v140_v47, %v156_v51  ;;  %v160_v41 = vsel %vm150_vm11, %v146_v50, 1326507024  ;;  %vm1821_vm13 = vcmp.lt.s32.totalorder %v3007_v63, 2 }
  0xb8   :  { %v2046_v27 = vmin.u32 %v556_v32, %v3033_v21  ;;  %v154_v17 = vsel %vm148_vm7, %v151_v61, %v153_v10  ;;  %v158_v4 = vsel %vm148_vm7, %v155_v42, %v157_v7  ;;  %v161_v49 = vsel %vm149_vm6, %v143_v44, %v160_v41 }
  0xb9   :  { %v162_v14 = vsel %vm148_vm7, %v159_v52, %v161_v49  ;;  %v3051_v15 = vmul.u32.u64.low %v3031_v2, %v158_v4  ;;  %v3052_v53 = vmul.u32.u64.high %v3031_v2, %v158_v4, %v3051_v15  ;;  %vm1825_vm8 = vcmp.eq.s32.totalorder %v3007_v63, 2 }
  0xba   :  { %v558_v60 = vclz %v2046_v27  ;;  %v3057_v29 = vmul.u32.u64.low %v3031_v2, %v162_v14  ;;  %v3058_v59 = vmul.u32.u64.high %v3031_v2, %v162_v14, %v3057_v29  ;;  %v228_v57 = vadd.s32 1, %v2034_v38 }
  0xbb   :  { %v2264_v26 = vpop.eup %2263  ;;  %vm1822_vm14 = vcmp.eq.s32.totalorder %v3007_v63, 0  ;;  %v218_v43 = vand.u32 2147483647, %v2967_v36  ;;  %v546_v55 = vadd.s32 %v2953_v40, %v2964_v6  ;;  %v170_v1 = vmul.u32 %v3031_v2, %v154_v17 }
  0xbc   :  { %v2266_v11 = vpop.eup %2265  ;;  %v1826_v28 = vxor.u32 2147483648, %v2264_v26  ;;  %v2047_v18 = vadd.s32 4294967294, %v558_v60  ;;  %vm229_vm15 = vcmp.gt.s32.totalorder %v228_v57, 0  ;;  %v173_v22 = vadd.s32 1, %v3052_v53 }
  0xbd   :  { %v1823_v25 = vxor.u32 2147483648, %v2266_v11  ;;  %v230_v58 = vsel %vm229_vm15, %v228_v57, 0  ;;  %vm492_vm1 = vcmp.lt.s32.totalorder %v2825_v54, 0  ;;  %vm172_vm2 = vc.u32 %v3058_v59, %v3051_v15 }
  0xbe   :  { %v1827_v0 = vsel %vm1825_vm8, %v1826_v28, %v2266_v11  ;;  %vm2048_vm0 = vcmp.lt.s32.totalorder %v2047_v18, 0  ;;  %v174_v30 = vsel %vm172_vm2, %v173_v22, %v3052_v53  ;;  %v225_v24 = vand.u32 8388607, %v218_v43 }
  0xbf   :  { %v1824_v34 = vsel %vm1822_vm14, %v2264_v26, %v1823_v25  ;;  %v561_v3 = vsel %vm2048_vm0, 0, %v2047_v18  ;;  %v232_v45 = vand.u32 31, %v230_v58  ;;  %v576_v20 = vsub.s32 4, %v3017_v5 }
  0xc0   :  { %v1828_v48 = vsel %vm1821_vm13, %v1824_v34, %v1827_v0  ;;  %v562_v8 = vsub.s32 32, %v561_v3  ;;  %v563_v40 = vshll.u32 %v3033_v21, %v561_v3  ;;  %v566_v6 = vsub.s32 4294967266, %v561_v3 }
  0xc1   :  { %v1829_v19 = vsel %vm1819_vm12, nan, %v1828_v48  ;;  %v175_v63 = vadd.s32 %v174_v30, %v170_v1  ;;  %v3078_v47 = vshrl.u32 %v230_v58, 5  ;;  %v233_v44 = vsub.s32 32, %v232_v45 }
  0xc2   :  { %1935 = vperm.xlu0 %2235, %v1829_v19   ;;  %v564_v2 = vshrl.u32 %v546_v55, %v562_v8  ;;  %v567_v16 = vadd.s32 127, %v566_v6  ;;  %v235_v21 = vshll.u32 %v2302_v31, %v232_v45  ;;  %v238_v23 = vshll.u32 %v2303_v33, %v232_v45 }
  0xc3   :  { %vm3084_vm3 = vcmp.le.f32.partialorder %v490_v13, 0.7853982  ;;  %v176_v32 = vadd.s32 536870912, %v175_v63  ;;  %v241_v12 = vshll.u32 %v2304_v35, %v232_v45  ;;  %v236_v42 = vshrl.u32 %v2303_v33, %v233_v44 }
  0xc4   :  { %v565_v61 = vor.u32 %v564_v2, %v563_v40  ;;  %v568_v38 = vshll.u32 %v567_v16, 23  ;;  %v239_v51 = vshrl.u32 %v2304_v35, %v233_v44  ;;  %v242_v10 = vshrl.u32 %v2305_v37, %v233_v44 }
  0xc5   :  { %v244_v7 = vshll.u32 %v2305_v37, %v232_v45  ;;  %v177_v27 = vshrl.u32 %v176_v32, 30  ;;  %v245_v13 = vshrl.u32 %v2306_v39, %v233_v44  ;;  %v577_v17 = vsel %vm492_vm1, %v576_v20, %v3017_v5 }
  0xc6   :  { %v569_v52 = vor.u32 4788187, %v568_v38  ;;  %v572_v41 = vcvt.s32.f32 %v565_v61  ;;  %v226_v4 = vor.u32 8388608, %v225_v24  ;;  %v247_v49 = vshll.u32 %v2306_v39, %v232_v45 }
  0xc7   :  { %v3099_v60 = vmul.f32 2.0, %v2825_v54  ;;  %v178_v53 = vshll.u32 %v177_v27, 30  ;;  %v234_v26 = vshrl.u32 %v2302_v31, %v233_v44  ;;  %v237_v29 = vor.u32 %v236_v42, %v235_v21 }
  0xc8   :  { %v570_v14 = vand.u32 2147483647, %v569_v52  ;;  %v240_v57 = vor.u32 %v239_v51, %v238_v23  ;;  %v243_v11 = vor.u32 %v242_v10, %v241_v12  ;;  %v246_v28 = vor.u32 %v245_v13, %v244_v7 }
  0xc9   :  { %v248_v18 = vshrl.u32 %v2307_v46, %v233_v44  ;;  %v179_v55 = vsub.s32 %v175_v63, %v178_v53  ;;  %vm250_vm4 = vcmp.lt.s32.totalorder %v3078_v47, 1  ;;  %vm253_vm5 = vcmp.lt.s32.totalorder %v3078_v47, 4 }
  0xca   :  { %v573_v25 = vmul.f32 %v572_v41, %v570_v14  ;;  %v266_v1 = vshll.u32 %v226_v4, 8  ;;  %v758_v0 = vand.u32 2147483647, %v3099_v60  ;;  %v761_v22 = vand.u32 2139095040, %v3099_v60 }
  0xcb   :  { %v249_v5 = vor.u32 %v248_v18, %v247_v49  ;;  %v181_v34 = vsub.s32 0, %v179_v55  ;;  %vm252_vm9 = vcmp.lt.s32.totalorder %v3078_v47, 3  ;;  %v255_v3 = vsel %vm253_vm5, %v243_v11, 2102212464 }
  0xcc   :  { %v574_v58 = vxor.u32 2147483648, %v573_v25  ;;  %v201_v48 = vsub.s32 4, %v177_v27  ;;  %vm251_vm10 = vcmp.lt.s32.totalorder %v3078_v47, 2  ;;  %v258_v8 = vsel %vm250_vm4, %v237_v29, %v240_v57 }
  0xcd   :  { %v259_v40 = vsel %vm253_vm5, %v246_v28, 920167782  ;;  %v2031_v19 = vmin.u32 %v181_v34, %v179_v55  ;;  %v254_v30 = vsel %vm250_vm4, %v234_v26, %v237_v29  ;;  %v262_v24 = vsel %vm250_vm4, %v240_v57, %v243_v11 }
  0xce   :  { %v575_v6 = vsel %vm492_vm1, %v574_v58, %v573_v25  ;;  %v256_v2 = vsel %vm252_vm9, %v240_v57, %v255_v3  ;;  %v260_v16 = vsel %vm252_vm9, %v243_v11, %v259_v40  ;;  %v263_v20 = vsel %vm253_vm5, %v249_v5, 1326507024 }
  0xcf   :  { %v578_v45 = vsel %vm3084_vm3, %v2825_v54, %v575_v6  ;;  %v183_v63 = vclz %v2031_v19  ;;  %v261_v44 = vsel %vm251_vm10, %v258_v8, %v260_v16  ;;  %v264_v21 = vsel %vm252_vm9, %v246_v28, %v263_v20 }
  0xd0   :  { %2267 = vcosq.f32 %v578_v45  ;;  %v265_v23 = vsel %vm251_vm10, %v262_v24, %v264_v21  ;;  %v3136_v61 = vmul.u32.u64.low %v266_v1, %v261_v44  ;;  %v3137_v38 = vmul.u32.u64.high %v266_v1, %v261_v44, %v3136_v61 }
  0xd1   :  { %2269 = vsinq.f32 %v578_v45  ;;  %v2032_v32 = vadd.s32 4294967294, %v183_v63  ;;  %v257_v12 = vsel %vm251_vm10, %v254_v30, %v256_v2  ;;  %vm117_vm6 = vcmp.lt.s32.totalorder %v2854_v56, 0 }
  0xd2   :  { %v3141_v42 = vmul.u32.u64.low %v266_v1, %v265_v23  ;;  %v3142_v51 = vmul.u32.u64.high %v266_v1, %v265_v23, %v3141_v42  ;;  %v762_v10 = vshrl.u32 %v761_v22, 23  ;;  %v579_v7 = vsel %vm3084_vm3, 0, %v577_v17 }
  0xd3   :  { %v171_v52 = vadd.s32 %v3051_v15, %v3058_v59  ;;  %vm2033_vm7 = vcmp.lt.s32.totalorder %v2032_v32, 0  ;;  %v202_v41 = vsel %vm117_vm6, %v201_v48, %v177_v27  ;;  %v273_v4 = vmul.u32 %v266_v1, %v257_v12 }
  0xd4   :  { %v186_v13 = vsel %vm2033_vm7, 0, %v2032_v32  ;;  %v276_v47 = vadd.s32 1, %v3137_v38  ;;  %v2055_v49 = vadd.s32 4294967169, %v762_v10  ;;  %v765_v29 = vand.u32 8388607, %v758_v0 }
  0xd5   :  { %v187_v14 = vsub.s32 32, %v186_v13  ;;  %v188_v53 = vshll.u32 %v179_v55, %v186_v13  ;;  %v191_v26 = vsub.s32 4294967266, %v186_v13  ;;  %v583_v50 = vand.u32 3, %v579_v7 }
  0xd6   :  { %vm275_vm11 = vc.u32 %v3142_v51, %v3136_v61  ;;  %v768_v17 = vadd.s32 1, %v2055_v49  ;;  %vm3157_vm12 = vcmp.le.f32.partialorder %v115_v9, 0.7853982  ;;  %vm582_vm13 = vweird.f32 %v2825_v54 }
  0xd7   :  { %v189_v59 = vshrl.u32 %v171_v52, %v187_v14  ;;  %v192_v27 = vadd.s32 127, %v191_v26  ;;  %v277_v57 = vsel %vm275_vm11, %v276_v47, %v3137_v38  ;;  %v204_v11 = vsel %vm3157_vm12, 0, %v202_v41 }
  0xd8   :  { %v278_v28 = vadd.s32 %v277_v57, %v273_v4  ;;  %vm769_vm8 = vcmp.gt.s32.totalorder %v768_v17, 0  ;;  %v766_v55 = vor.u32 8388608, %v765_v29  ;;  %vm584_vm14 = vcmp.lt.s32.totalorder %v583_v50, 2 }
  0xd9   :  { %v190_v18 = vor.u32 %v189_v59, %v188_v53  ;;  %v193_v25 = vshll.u32 %v192_v27, 23  ;;  %v770_v5 = vsel %vm769_vm8, %v768_v17, 0  ;;  %v3166_v22 = vmul.f32 3.0, %v2825_v54 }
  0xda   :  { %v279_v9 = vadd.s32 536870912, %v278_v28  ;;  %v772_v1 = vand.u32 31, %v770_v5  ;;  %vm585_vm15 = vcmp.eq.s32.totalorder %v583_v50, 0  ;;  %vm588_vm0 = vcmp.eq.s32.totalorder %v583_v50, 2 }
  0xdb   :  { %v194_v58 = vor.u32 4788187, %v193_v25  ;;  %v197_v34 = vcvt.s32.f32 %v190_v18  ;;  %v3168_v48 = vand.u32 3, %v204_v11  ;;  %v3171_v8 = vadd.s32 %v3136_v61, %v3142_v51 }
  0xdc   :  { %v3173_v40 = vshrl.u32 %v279_v9, 30  ;;  %v773_v6 = vsub.s32 32, %v772_v1  ;;  %v3175_v45 = vshll.u32 %v766_v55, 8  ;;  %v1026_v2 = vand.u32 2147483647, %v3166_v22 }
  0xdd   :  { %v2268_v3 = vpop.eup %2267  ;;  %v195_v24 = vand.u32 2147483647, %v194_v58  ;;  %v775_v63 = vshll.u32 %v2302_v31, %v772_v1  ;;  %v1029_v44 = vand.u32 2139095040, %v3166_v22  ;;  %v778_v61 = vshll.u32 %v2303_v33, %v772_v1 }
  0xde   :  { %v2270_v19 = vpop.eup %2269  ;;  %v589_v30 = vxor.u32 2147483648, %v2268_v3  ;;  %v281_v20 = vshll.u32 %v3173_v40, 30  ;;  %v781_v38 = vshll.u32 %v2304_v35, %v772_v1  ;;  %v776_v42 = vshrl.u32 %v2303_v33, %v773_v6 }
  0xdf   :  { %v586_v16 = vxor.u32 2147483648, %v2270_v19  ;;  %v198_v23 = vmul.f32 %v197_v34, %v195_v24  ;;  %v779_v51 = vshrl.u32 %v2304_v35, %v773_v6  ;;  %v782_v52 = vshrl.u32 %v2305_v37, %v773_v6 }
  0xe0   :  { %v590_v21 = vsel %vm588_vm0, %v589_v30, %v2270_v19  ;;  %v3185_v12 = vsub.s32 %v278_v28, %v281_v20  ;;  %v784_v41 = vshll.u32 %v2305_v37, %v772_v1  ;;  %v771_v47 = vshrl.u32 %v770_v5, 5 }
  0xe1   :  { %v587_v32 = vsel %vm585_vm15, %v2268_v3, %v586_v16  ;;  %v199_v7 = vxor.u32 2147483648, %v198_v23  ;;  %v1030_v49 = vshrl.u32 %v1029_v44, 23  ;;  %v774_v53 = vshrl.u32 %v2302_v31, %v773_v6 }
  0xe2   :  { %v591_v10 = vsel %vm584_vm14, %v587_v32, %v590_v21  ;;  %v284_v4 = vsub.s32 0, %v3185_v12  ;;  %v785_v26 = vshrl.u32 %v2306_v39, %v773_v6  ;;  %v787_v29 = vshll.u32 %v2306_v39, %v772_v1 }
  0xe3   :  { %v592_v13 = vsel %vm582_vm13, nan, %v591_v10  ;;  %v200_v14 = vsel %vm117_vm6, %v199_v7, %v198_v23  ;;  %v777_v59 = vor.u32 %v776_v42, %v775_v63  ;;  %v780_v27 = vor.u32 %v779_v51, %v778_v61 }
  0xe4   :  { %600 = vperm.xlu1 %2236, %v592_v13   ;;  %v203_v50 = vsel %vm3157_vm12, %v2854_v56, %v200_v14  ;;  %v2035_v17 = vmin.u32 %v284_v4, %v3185_v12  ;;  %v783_v57 = vor.u32 %v782_v52, %v781_v38  ;;  %v786_v11 = vor.u32 %v785_v26, %v784_v41 }
  0xe5   :  { %2271 = vcosq.f32 %v203_v50  ;;  %v788_v28 = vshrl.u32 %v2307_v46, %v773_v6  ;;  %vm790_vm1 = vcmp.lt.s32.totalorder %v771_v47, 1  ;;  %vm791_vm2 = vcmp.lt.s32.totalorder %v771_v47, 2 }
  0xe6   :  { %2273 = vsinq.f32 %v203_v50  ;;  %v286_v18 = vclz %v2035_v17  ;;  %vm792_vm3 = vcmp.lt.s32.totalorder %v771_v47, 3  ;;  %vm793_vm4 = vcmp.lt.s32.totalorder %v771_v47, 4 }
  0xe7   :  { %v789_v25 = vor.u32 %v788_v28, %v787_v29  ;;  %v794_v55 = vsel %vm790_vm1, %v774_v53, %v777_v59  ;;  %v795_v15 = vsel %vm793_vm4, %v783_v57, 2102212464  ;;  %v798_v9 = vsel %vm790_vm1, %v777_v59, %v780_v27 }
  0xe8   :  { %v2036_v5 = vadd.s32 4294967294, %v286_v18  ;;  %v799_v1 = vsel %vm793_vm4, %v786_v11, 920167782  ;;  %v796_v58 = vsel %vm792_vm3, %v780_v27, %v795_v15  ;;  %v802_v3 = vsel %vm790_vm1, %v780_v27, %v783_v57 }
  0xe9   :  { %v800_v34 = vsel %vm792_vm3, %v783_v57, %v799_v1  ;;  %v803_v19 = vsel %vm793_vm4, %v789_v25, 1326507024  ;;  %v304_v30 = vsub.s32 4, %v3173_v40  ;;  %v797_v38 = vsel %vm791_vm2, %v794_v55, %v796_v58 }
  0xea   :  { %vm2037_vm5 = vcmp.lt.s32.totalorder %v2036_v5, 0  ;;  %v801_v6 = vsel %vm791_vm2, %v798_v9, %v800_v34  ;;  %v804_v24 = vsel %vm792_vm3, %v786_v11, %v803_v19  ;;  %vm220_vm9 = vcmp.lt.s32.totalorder %v2967_v36, 0 }
  0xeb   :  { %v289_v16 = vsel %vm2037_vm5, 0, %v2036_v5  ;;  %v805_v20 = vsel %vm791_vm2, %v802_v3, %v804_v24  ;;  %v3209_v63 = vmul.u32.u64.low %v3175_v45, %v801_v6  ;;  %v3210_v44 = vmul.u32.u64.high %v3175_v45, %v801_v6, %v3209_v63 }
  0xec   :  { %v290_v21 = vsub.s32 32, %v289_v16  ;;  %v291_v23 = vshll.u32 %v3185_v12, %v289_v16  ;;  %v294_v61 = vsub.s32 4294967266, %v289_v16  ;;  %v2065_v51 = vadd.s32 4294967169, %v1030_v49 }
  0xed   :  { %v3217_v32 = vmul.u32.u64.low %v3175_v45, %v805_v20  ;;  %v3218_v42 = vmul.u32.u64.high %v3175_v45, %v805_v20, %v3217_v32  ;;  %vm207_vm10 = vweird.f32 %v2854_v56  ;;  %v305_v52 = vsel %vm220_vm9, %v304_v30, %v3173_v40 }
  0xee   :  { %v292_v10 = vshrl.u32 %v3171_v8, %v290_v21  ;;  %v295_v7 = vadd.s32 127, %v294_v61  ;;  %vm3227_vm6 = vcmp.le.f32.partialorder %v218_v43, 0.7853982  ;;  %v813_v41 = vmul.u32 %v3175_v45, %v797_v38 }
  0xef   :  { %v816_v13 = vadd.s32 1, %v3210_v44  ;;  %v1036_v4 = vadd.s32 1, %v2065_v51  ;;  %vm213_vm7 = vcmp.eq.s32.totalorder %v3168_v48, 2  ;;  %v1033_v49 = vand.u32 8388607, %v1026_v2 }
  0xf0   :  { %v293_v47 = vor.u32 %v292_v10, %v291_v23  ;;  %v296_v8 = vshll.u32 %v295_v7, 23  ;;  %v307_v40 = vsel %vm3227_vm6, 0, %v305_v52  ;;  %vm815_vm11 = vc.u32 %v3218_v42, %v3209_v63 }
  0xf1   :  { %vm1037_vm12 = vcmp.gt.s32.totalorder %v1036_v4, 0  ;;  %v3241_v43 = vmul.f32 4.0, %v2825_v54  ;;  %v817_v26 = vsel %vm815_vm11, %v816_v13, %v3210_v44  ;;  %vm210_vm13 = vcmp.eq.s32.totalorder %v3168_v48, 0 }
  0xf2   :  { %v2272_v45 = vpop.eup %2271  ;;  %v297_v14 = vor.u32 4788187, %v296_v8  ;;  %v300_v53 = vcvt.s32.f32 %v293_v47  ;;  %v1038_v29 = vsel %vm1037_vm12, %v1036_v4, 0  ;;  %v818_v59 = vadd.s32 %v817_v26, %v813_v41 }
  0xf3   :  { %v2274_v50 = vpop.eup %2273  ;;  %v214_v17 = vxor.u32 2147483648, %v2272_v45  ;;  %v1040_v27 = vand.u32 31, %v1038_v29  ;;  %vm209_vm8 = vcmp.lt.s32.totalorder %v3168_v48, 2  ;;  %v1034_v28 = vor.u32 8388608, %v1033_v49 }
  0xf4   :  { %v211_v57 = vxor.u32 2147483648, %v2274_v50  ;;  %v298_v11 = vand.u32 2147483647, %v297_v14  ;;  %v3248_v18 = vand.u32 3, %v307_v40  ;;  %v819_v25 = vadd.s32 536870912, %v818_v59 }
  0xf5   :  { %v215_v54 = vsel %vm213_vm7, %v214_v17, %v2274_v50  ;;  %v1041_v55 = vsub.s32 32, %v1040_v27  ;;  %v1039_v9 = vshrl.u32 %v1038_v29, 5  ;;  %v1297_v1 = vand.u32 2139095040, %v3241_v43 }
  0xf6   :  { %v212_v5 = vsel %vm210_vm13, %v2272_v45, %v211_v57  ;;  %v301_v15 = vmul.f32 %v300_v53, %v298_v11  ;;  %v3251_v34 = vshrl.u32 %v819_v25, 30  ;;  %v1043_v3 = vshll.u32 %v2302_v31, %v1040_v27 }
  0xf7   :  { %v216_v58 = vsel %vm209_vm8, %v212_v5, %v215_v54  ;;  %v1044_v19 = vshrl.u32 %v2303_v33, %v1041_v55  ;;  %v1046_v6 = vshll.u32 %v2303_v33, %v1040_v27  ;;  %v1047_v24 = vshrl.u32 %v2304_v35, %v1041_v55 }
  0xf8   :  { %v217_v48 = vsel %vm207_vm10, nan, %v216_v58  ;;  %v302_v30 = vxor.u32 2147483648, %v301_v15  ;;  %v821_v16 = vshll.u32 %v3251_v34, 30  ;;  %v1049_v20 = vshll.u32 %v2304_v35, %v1040_v27 }
  0xf9   :  { %323 = vperm.xlu1 %2236, %v217_v48   ;;  %v1050_v44 = vshrl.u32 %v2305_v37, %v1041_v55  ;;  %v1052_v21 = vshll.u32 %v2305_v37, %v1040_v27  ;;  %v1042_v56 = vshrl.u32 %v2302_v31, %v1041_v55  ;;  %v1053_v61 = vshrl.u32 %v2306_v39, %v1041_v55 }
  0xfa   :  { %v303_v23 = vsel %vm220_vm9, %v302_v30, %v301_v15  ;;  %v1298_v38 = vshrl.u32 %v1297_v1, 23  ;;  %v3270_v51 = vsub.s32 %v818_v59, %v821_v16  ;;  %v1045_v10 = vor.u32 %v1044_v19, %v1043_v3 }
  0xfb   :  { %v306_v32 = vsel %vm3227_vm6, %v2967_v36, %v303_v23  ;;  %v1055_v7 = vshll.u32 %v2306_v39, %v1040_v27  ;;  %v1048_v52 = vor.u32 %v1047_v24, %v1046_v6  ;;  %v1054_v41 = vor.u32 %v1053_v61, %v1052_v21 }
  0xfc   :  { %2275 = vcosq.f32 %v306_v32  ;;  %v1056_v13 = vshrl.u32 %v2307_v46, %v1041_v55  ;;  %v824_v4 = vsub.s32 0, %v3270_v51  ;;  %v1051_v47 = vor.u32 %v1050_v44, %v1049_v20 }
  0xfd   :  { %2277 = vsinq.f32 %v306_v32  ;;  %vm1058_vm14 = vcmp.lt.s32.totalorder %v1039_v9, 1  ;;  %vm1060_vm15 = vcmp.lt.s32.totalorder %v1039_v9, 3  ;;  %vm1061_vm0 = vcmp.lt.s32.totalorder %v1039_v9, 4 }
  0xfe   :  { %v1057_v8 = vor.u32 %v1056_v13, %v1055_v7  ;;  %v2075_v12 = vadd.s32 4294967169, %v1298_v38  ;;  %v2056_v49 = vmin.u32 %v824_v4, %v3270_v51  ;;  %vm1059_vm1 = vcmp.lt.s32.totalorder %v1039_v9, 2 }
  0xff   :  { %v1074_v40 = vshll.u32 %v1034_v28, 8  ;;  %v1294_v45 = vand.u32 2147483647, %v3241_v43  ;;  %v1062_v14 = vsel %vm1058_vm14, %v1042_v56, %v1045_v10  ;;  %v1063_v53 = vsel %vm1061_vm0, %v1051_v47, 2102212464 }
 0x100   :  { %v1066_v26 = vsel %vm1058_vm14, %v1045_v10, %v1048_v52  ;;  %v1067_v29 = vsel %vm1061_vm0, %v1054_v41, 920167782  ;;  %v826_v50 = vclz %v2056_v49  ;;  %v1064_v17 = vsel %vm1060_vm15, %v1048_v52, %v1063_v53 }
 0x101   :  { %v1068_v59 = vsel %vm1060_vm15, %v1051_v47, %v1067_v29  ;;  %v1070_v27 = vsel %vm1058_vm14, %v1048_v52, %v1051_v47  ;;  %v1065_v57 = vsel %vm1059_vm1, %v1062_v14, %v1064_v17  ;;  %v1071_v28 = vsel %vm1061_vm0, %v1057_v8, 1326507024 }
 0x102   :  { %v1069_v11 = vsel %vm1059_vm1, %v1066_v26, %v1068_v59  ;;  %v1304_v54 = vadd.s32 1, %v2075_v12  ;;  %v2057_v25 = vadd.s32 4294967294, %v826_v50  ;;  %v1072_v55 = vsel %vm1060_vm15, %v1054_v41, %v1071_v28 }
 0x103   :  { %v3288_v5 = vmul.u32.u64.low %v1074_v40, %v1069_v11  ;;  %v3289_v15 = vmul.u32.u64.high %v1074_v40, %v1069_v11, %v3288_v5  ;;  %vm310_vm2 = vweird.f32 %v2967_v36  ;;  %v814_v1 = vadd.s32 %v3209_v63, %v3218_v42 }
 0x104   :  { %v1073_v58 = vsel %vm1059_vm1, %v1070_v27, %v1072_v55  ;;  %v3298_v3 = vand.u32 8388607, %v1294_v45  ;;  %vm1305_vm3 = vcmp.gt.s32.totalorder %v1304_v54, 0  ;;  %vm2058_vm4 = vcmp.lt.s32.totalorder %v2057_v25, 0 }
 0x105   :  { %v3300_v19 = vmul.u32.u64.low %v1074_v40, %v1073_v58  ;;  %v3301_v48 = vmul.u32.u64.high %v1074_v40, %v1073_v58, %v3300_v19  ;;  %v1306_v30 = vsel %vm1305_vm3, %v1304_v54, 0  ;;  %vm312_vm5 = vcmp.lt.s32.totalorder %v3248_v18, 2 }
 0x106   :  { %v829_v6 = vsel %vm2058_vm4, 0, %v2057_v25  ;;  %v1081_v24 = vmul.u32 %v1074_v40, %v1065_v57  ;;  %v1308_v16 = vand.u32 31, %v1306_v30  ;;  %v1084_v9 = vadd.s32 1, %v3289_v15 }
 0x107   :  { %v830_v20 = vsub.s32 32, %v829_v6  ;;  %v831_v63 = vshll.u32 %v3270_v51, %v829_v6  ;;  %v834_v42 = vsub.s32 4294967266, %v829_v6  ;;  %vm313_vm9 = vcmp.eq.s32.totalorder %v3248_v18, 0 }
 0x108   :  { %vm316_vm10 = vcmp.eq.s32.totalorder %v3248_v18, 2  ;;  %v1302_v44 = vor.u32 8388608, %v3298_v3  ;;  %v1309_v21 = vsub.s32 32, %v1308_v16  ;;  %vm1083_vm6 = vc.u32 %v3301_v48, %v3288_v5 }
 0x109   :  { %v2276_v23 = vpop.eup %2275  ;;  %v832_v56 = vshrl.u32 %v814_v1, %v830_v20  ;;  %v835_v61 = vadd.s32 127, %v834_v42  ;;  %v1311_v38 = vshll.u32 %v2302_v31, %v1308_v16  ;;  %vm760_vm7 = vcmp.lt.s32.totalorder %v3099_v60, 0 }
 0x10a   :  { %v2278_v32 = vpop.eup %2277  ;;  %v317_v51 = vxor.u32 2147483648, %v2276_v23  ;;  %v1085_v10 = vsel %vm1083_vm6, %v1084_v9, %v3289_v15  ;;  %v1314_v7 = vshll.u32 %v2303_v33, %v1308_v16  ;;  %v1317_v52 = vshll.u32 %v2304_v35, %v1308_v16 }
 0x10b   :  { %v314_v41 = vxor.u32 2147483648, %v2278_v32  ;;  %vm3318_vm11 = vcmp.le.f32.partialorder %v758_v0, 0.7853982  ;;  %v833_v4 = vor.u32 %v832_v56, %v831_v63  ;;  %v836_v47 = vshll.u32 %v835_v61, 23 }
 0x10c   :  { %v1086_v8 = vadd.s32 %v1085_v10, %v1081_v24  ;;  %v318_v12 = vsel %vm316_vm10, %v317_v51, %v2278_v32  ;;  %v1312_v49 = vshrl.u32 %v2303_v33, %v1309_v21  ;;  %v1315_v40 = vshrl.u32 %v2304_v35, %v1309_v21 }
 0x10d   :  { %v1318_v14 = vshrl.u32 %v2305_v37, %v1309_v21  ;;  %v315_v53 = vsel %vm313_vm9, %v2276_v23, %v314_v41  ;;  %v837_v26 = vor.u32 4788187, %v836_v47  ;;  %v840_v0 = vcvt.s32.f32 %v833_v4 }
 0x10e   :  { %v1087_v29 = vadd.s32 536870912, %v1086_v8  ;;  %v319_v50 = vsel %vm312_vm5, %v315_v53, %v318_v12  ;;  %v1307_v17 = vshrl.u32 %v1306_v30, 5  ;;  %v1310_v59 = vshrl.u32 %v2302_v31, %v1309_v21 }
 0x10f   :  { %v1320_v27 = vshll.u32 %v2305_v37, %v1308_v16  ;;  %v320_v57 = vsel %vm310_vm2, nan, %v319_v50  ;;  %v838_v11 = vand.u32 2147483647, %v837_v26  ;;  %v1321_v54 = vshrl.u32 %v2306_v39, %v1309_v21 }
 0x110   :  { %v3335_v28 = vshrl.u32 %v1087_v29, 30  ;;  %328 = vperm.xlu1 %2236, %v320_v57   ;;  %v1313_v25 = vor.u32 %v1312_v49, %v1311_v38  ;;  %v1316_v55 = vor.u32 %v1315_v40, %v1314_v7  ;;  %v1323_v15 = vshll.u32 %v2306_v39, %v1308_v16  ;;  %v2300_v7 = vld [vmem:[%s3590_s1 + $0x8] sm:$0xff] }
 0x111   :  { %v1324_v18 = vshrl.u32 %v2307_v46, %v1309_v21  ;;  %v841_v1 = vmul.f32 %v840_v0, %v838_v11  ;;  %v1319_v3 = vor.u32 %v1318_v14, %v1317_v52  ;;  %v1322_v19 = vor.u32 %v1321_v54, %v1320_v27 }
 0x112   :  { %v1089_v58 = vshll.u32 %v3335_v28, 30  ;;  %v844_v36 = vsub.s32 4, %v3251_v34  ;;  %vm1326_vm12 = vcmp.lt.s32.totalorder %v1307_v17, 1  ;;  %vm1329_vm13 = vcmp.lt.s32.totalorder %v1307_v17, 4 }
 0x113   :  { %v1325_v30 = vor.u32 %v1324_v18, %v1323_v15  ;;  %v842_v6 = vxor.u32 2147483648, %v841_v1  ;;  %vm1328_vm8 = vcmp.lt.s32.totalorder %v1307_v17, 3  ;;  %v1331_v20 = vsel %vm1329_vm13, %v1319_v3, 2102212464 }
 0x114   :  { %v3342_v24 = vsub.s32 %v1086_v8, %v1089_v58  ;;  %vm1327_vm14 = vcmp.lt.s32.totalorder %v1307_v17, 2  ;;  %v1330_v16 = vsel %vm1326_vm12, %v1310_v59, %v1313_v25  ;;  %v1335_v63 = vsel %vm1329_vm13, %v1322_v19, 920167782 }
 0x115   :  { %v1342_v42 = vshll.u32 %v1302_v44, 8  ;;  %v843_v9 = vsel %vm760_vm7, %v842_v6, %v841_v1  ;;  %v1332_v23 = vsel %vm1328_vm8, %v1316_v55, %v1331_v20  ;;  %v1334_v56 = vsel %vm1326_vm12, %v1313_v25, %v1316_v55 }
 0x116   :  { %v1092_v21 = vsub.s32 0, %v3342_v24  ;;  %v846_v61 = vsel %vm3318_vm11, %v3099_v60, %v843_v9  ;;  %v1336_v38 = vsel %vm1328_vm8, %v1319_v3, %v1335_v63  ;;  %v1338_v32 = vsel %vm1326_vm12, %v1316_v55, %v1319_v3 }
 0x117   :  { %v1339_v51 = vsel %vm1329_vm13, %v1325_v30, 1326507024  ;;  %v845_v44 = vsel %vm760_vm7, %v844_v36, %v3251_v34  ;;  %2279 = vcosq.f32 %v846_v61  ;;  %v3365_v52 = vmul.f32 5.0, %v2300_v7 }
 0x118   :  { %v2066_v10 = vmin.u32 %v1092_v21, %v3342_v24  ;;  %2281 = vsinq.f32 %v846_v61  ;;  %v1333_v41 = vsel %vm1327_vm14, %v1330_v16, %v1332_v23  ;;  %v1337_v4 = vsel %vm1327_vm14, %v1334_v56, %v1336_v38 }
 0x119   :  { %v1340_v47 = vsel %vm1328_vm8, %v1322_v19, %v1339_v51  ;;  %v3371_v34 = vmul.u32.u64.low %v1342_v42, %v1337_v4  ;;  %v3372_v49 = vmul.u32.u64.high %v1342_v42, %v1337_v4, %v3371_v34  ;;  %v847_v53 = vsel %vm3318_vm11, 0, %v845_v44 }
 0x11a   :  { %v1094_v8 = vclz %v2066_v10  ;;  %v1341_v12 = vsel %vm1327_vm14, %v1338_v32, %v1340_v47  ;;  %v1565_v0 = vand.u32 2139095040, %v3365_v52  ;;  %vm1028_vm15 = vcmp.lt.s32.totalorder %v3166_v22, 0 }
 0x11b   :  { %v3375_v40 = vmul.u32.u64.low %v1342_v42, %v1341_v12  ;;  %v3376_v14 = vmul.u32.u64.high %v1342_v42, %v1341_v12, %v3375_v40  ;;  %v1112_v29 = vsub.s32 4, %v3335_v28  ;;  %v1349_v50 = vmul.u32 %v1342_v42, %v1333_v41 }
 0x11c   :  { %v2067_v26 = vadd.s32 4294967294, %v1094_v8  ;;  %v3383_v17 = vmul.f32 6.0, %v2300_v7  ;;  %v1082_v59 = vadd.s32 %v3288_v5, %v3301_v48  ;;  %v1352_v27 = vadd.s32 1, %v3372_v49 }
 0x11d   :  { %v1566_v57 = vshrl.u32 %v1565_v0, 23  ;;  %v851_v11 = vand.u32 3, %v847_v53  ;;  %vm1351_vm1 = vc.u32 %v3376_v14, %v3371_v34  ;;  %v1562_v54 = vand.u32 2147483647, %v3365_v52 }
 0x11e   :  { %vm2068_vm0 = vcmp.lt.s32.totalorder %v2067_v26, 0  ;;  %v1353_v18 = vsel %vm1351_vm1, %v1352_v27, %v3372_v49  ;;  %v1113_v5 = vsel %vm1028_vm15, %v1112_v29, %v3335_v28  ;;  %v1833_v58 = vand.u32 2139095040, %v3383_v17 }
 0x11f   :  { %v1097_v13 = vsel %vm2068_vm0, 0, %v2067_v26  ;;  %v1354_v48 = vadd.s32 %v1353_v18, %v1349_v50  ;;  %v2085_v1 = vadd.s32 4294967169, %v1566_v57  ;;  %vm850_vm2 = vweird.f32 %v3099_v60 }
 0x120   :  { %v1098_v25 = vsub.s32 32, %v1097_v13  ;;  %v1099_v55 = vshll.u32 %v3342_v24, %v1097_v13  ;;  %v1102_v15 = vsub.s32 4294967266, %v1097_v13  ;;  %vm3400_vm3 = vcmp.le.f32.partialorder %v1026_v2, 0.7853982 }
 0x121   :  { %vm852_vm4 = vcmp.lt.s32.totalorder %v851_v11, 2  ;;  %v1355_v30 = vadd.s32 536870912, %v1354_v48  ;;  %v1569_v6 = vand.u32 8388607, %v1562_v54  ;;  %v1572_v28 = vadd.s32 1, %v2085_v1 }
 0x122   :  { %v1100_v19 = vshrl.u32 %v1082_v59, %v1098_v25  ;;  %v1103_v36 = vadd.s32 127, %v1102_v15  ;;  %vm853_vm5 = vcmp.eq.s32.totalorder %v851_v11, 0  ;;  %v1115_v16 = vsel %vm3400_vm3, 0, %v1113_v5 }
 0x123   :  { %vm856_vm9 = vcmp.eq.s32.totalorder %v851_v11, 2  ;;  %v3408_v2 = vshrl.u32 %v1355_v30, 30  ;;  %vm1573_vm10 = vcmp.gt.s32.totalorder %v1572_v28, 0  ;;  %v1834_v42 = vshrl.u32 %v1833_v58, 23 }
 0x124   :  { %v1101_v24 = vor.u32 %v1100_v19, %v1099_v55  ;;  %v1104_v20 = vshll.u32 %v1103_v36, 23  ;;  %v2280_v63 = vpop.eup %2279  ;;  %v1574_v61 = vsel %vm1573_vm10, %v1572_v28, 0  ;;  %v3410_v32 = vand.u32 3, %v1115_v16 }
 0x125   :  { %v2282_v9 = vpop.eup %2281  ;;  %v857_v21 = vxor.u32 2147483648, %v2280_v63  ;;  %v1357_v51 = vshll.u32 %v3408_v2, 30  ;;  %v1570_v44 = vor.u32 8388608, %v1569_v6  ;;  %v1576_v41 = vand.u32 31, %v1574_v61 }
 0x126   :  { %v1105_v23 = vor.u32 4788187, %v1104_v20  ;;  %v1108_v56 = vcvt.s32.f32 %v1101_v24  ;;  %v854_v38 = vxor.u32 2147483648, %v2282_v9  ;;  %v1830_v4 = vand.u32 2147483647, %v3383_v17 }
 0x127   :  { %v858_v10 = vsel %vm856_vm9, %v857_v21, %v2282_v9  ;;  %v3415_v8 = vsub.s32 %v1354_v48, %v1357_v51  ;;  %v1575_v12 = vshrl.u32 %v1574_v61, 5  ;;  %v2095_v49 = vadd.s32 4294967169, %v1834_v42 }
 0x128   :  { %v1106_v7 = vand.u32 2147483647, %v1105_v23  ;;  %v855_v47 = vsel %vm853_vm5, %v2280_v63, %v854_v38  ;;  %v1350_v26 = vadd.s32 %v3371_v34, %v3376_v14  ;;  %v1577_v0 = vsub.s32 32, %v1576_v41 }
 0x129   :  { %v859_v40 = vsel %vm852_vm4, %v855_v47, %v858_v10  ;;  %v1360_v50 = vsub.s32 0, %v3415_v8  ;;  %v1579_v59 = vshll.u32 %v2302_v31, %v1576_v41  ;;  %v3424_v27 = vshll.u32 %v1570_v44, 8 }
 0x12a   :  { %v1109_v53 = vmul.f32 %v1108_v56, %v1106_v7  ;;  %v860_v29 = vsel %vm850_vm2, nan, %v859_v40  ;;  %v1580_v13 = vshrl.u32 %v2303_v33, %v1577_v0  ;;  %v1582_v11 = vshll.u32 %v2303_v33, %v1576_v41 }
 0x12b   :  { %868 = vperm.xlu1 %2236, %v860_v29   ;;  %v3430_v25 = vand.u32 8388607, %v1830_v4  ;;  %v2076_v34 = vmin.u32 %v1360_v50, %v3415_v8  ;;  %v1578_v60 = vshrl.u32 %v2302_v31, %v1577_v0  ;;  %vm1594_vm6 = vcmp.lt.s32.totalorder %v1575_v12, 1 }
 0x12c   :  { %v1110_v57 = vxor.u32 2147483648, %v1109_v53  ;;  %v1840_v14 = vadd.s32 1, %v2095_v49  ;;  %v1581_v15 = vor.u32 %v1580_v13, %v1579_v59  ;;  %v1583_v18 = vshrl.u32 %v2304_v35, %v1577_v0 }
 0x12d   :  { %v1585_v5 = vshll.u32 %v2304_v35, %v1576_v41  ;;  %v1362_v1 = vclz %v2076_v34  ;;  %v1586_v58 = vshrl.u32 %v2305_v37, %v1577_v0  ;;  %v1588_v19 = vshll.u32 %v2305_v37, %v1576_v41 }
 0x12e   :  { %v1111_v55 = vsel %vm1028_vm15, %v1110_v57, %v1109_v53  ;;  %v1584_v36 = vor.u32 %v1583_v18, %v1582_v11  ;;  %v1589_v30 = vshrl.u32 %v2306_v39, %v1577_v0  ;;  %v1591_v6 = vshll.u32 %v2306_v39, %v1576_v41 }
 0x12f   :  { %v1114_v48 = vsel %vm3400_vm3, %v3166_v22, %v1111_v55  ;;  %v2077_v28 = vadd.s32 4294967294, %v1362_v1  ;;  %v1587_v24 = vor.u32 %v1586_v58, %v1585_v5  ;;  %v1592_v20 = vshrl.u32 %v2307_v46, %v1577_v0 }
 0x130   :  { %2283 = vcosq.f32 %v1114_v48  ;;  %v1590_v16 = vor.u32 %v1589_v30, %v1588_v19  ;;  %vm1595_vm7 = vcmp.lt.s32.totalorder %v1575_v12, 2  ;;  %vm1596_vm11 = vcmp.lt.s32.totalorder %v1575_v12, 3 }
 0x131   :  { %2285 = vsinq.f32 %v1114_v48  ;;  %vm1597_vm12 = vcmp.lt.s32.totalorder %v1575_v12, 4  ;;  %vm2078_vm13 = vcmp.lt.s32.totalorder %v2077_v28, 0  ;;  %v1593_v3 = vor.u32 %v1592_v20, %v1591_v6 }
 0x132   :  { %v1598_v63 = vsel %vm1594_vm6, %v1578_v60, %v1581_v15  ;;  %v1599_v42 = vsel %vm1597_vm12, %v1587_v24, 2102212464  ;;  %v1365_v9 = vsel %vm2078_vm13, 0, %v2077_v28  ;;  %v1602_v23 = vsel %vm1594_vm6, %v1581_v15, %v1584_v36 }
 0x133   :  { %v1600_v21 = vsel %vm1596_vm11, %v1584_v36, %v1599_v42  ;;  %v1603_v56 = vsel %vm1597_vm12, %v1590_v16, 920167782  ;;  %v1366_v61 = vsub.s32 32, %v1365_v9  ;;  %v1367_v38 = vshll.u32 %v3415_v8, %v1365_v9 }
 0x134   :  { %v1370_v51 = vsub.s32 4294967266, %v1365_v9  ;;  %vm1841_vm8 = vcmp.gt.s32.totalorder %v1840_v14, 0  ;;  %v1601_v44 = vsel %vm1595_vm7, %v1598_v63, %v1600_v21  ;;  %v1604_v10 = vsel %vm1596_vm11, %v1587_v24, %v1603_v56 }
 0x135   :  { %v1606_v7 = vsel %vm1594_vm6, %v1584_v36, %v1587_v24  ;;  %v1607_v41 = vsel %vm1597_vm12, %v1593_v3, 1326507024  ;;  %v1368_v47 = vshrl.u32 %v1350_v26, %v1366_v61  ;;  %v1605_v40 = vsel %vm1595_vm7, %v1602_v23, %v1604_v10 }
 0x136   :  { %v1371_v49 = vadd.s32 127, %v1370_v51  ;;  %v1608_v53 = vsel %vm1596_vm11, %v1590_v16, %v1607_v41  ;;  %vm1118_vm14 = vweird.f32 %v3166_v22  ;;  %v1842_v50 = vsel %vm1841_vm8, %v1840_v14, 0 }
 0x137   :  { %v1609_v8 = vsel %vm1595_vm7, %v1606_v7, %v1608_v53  ;;  %v3461_v0 = vmul.u32.u64.low %v3424_v27, %v1605_v40  ;;  %v3462_v29 = vmul.u32.u64.high %v3424_v27, %v1605_v40, %v3461_v0  ;;  %v1369_v59 = vor.u32 %v1368_v47, %v1367_v38 }
 0x138   :  { %v1372_v57 = vshll.u32 %v1371_v49, 23  ;;  %v3466_v13 = vmul.u32.u64.low %v3424_v27, %v1609_v8  ;;  %v3467_v26 = vmul.u32.u64.high %v3424_v27, %v1609_v8, %v3466_v13  ;;  %vm1120_vm15 = vcmp.lt.s32.totalorder %v3410_v32, 2 }
 0x139   :  { %vm3472_vm0 = vcmp.le.f32.partialorder %v1294_v45, 0.7853982  ;;  %vm1296_vm1 = vcmp.lt.s32.totalorder %v3241_v43, 0  ;;  %v1844_v12 = vand.u32 31, %v1842_v50  ;;  %vm1121_vm2 = vcmp.eq.s32.totalorder %v3410_v32, 0 }
 0x13a   :  { %v1373_v34 = vor.u32 4788187, %v1372_v57  ;;  %v1376_v60 = vcvt.s32.f32 %v1369_v59  ;;  %v1617_v14 = vmul.u32 %v3424_v27, %v1601_v44  ;;  %vm1124_vm3 = vcmp.eq.s32.totalorder %v3410_v32, 2 }
 0x13b   :  { %v1620_v55 = vadd.s32 1, %v3462_v29  ;;  %v1845_v15 = vsub.s32 32, %v1844_v12  ;;  %v1847_v18 = vshll.u32 %v2302_v31, %v1844_v12  ;;  %vm1619_vm4 = vc.u32 %v3467_v26, %v3461_v0 }
 0x13c   :  { %v1374_v5 = vand.u32 2147483647, %v1373_v34  ;;  %v1838_v48 = vor.u32 8388608, %v3430_v25  ;;  %v1843_v1 = vshrl.u32 %v1842_v50, 5  ;;  %v1850_v30 = vshll.u32 %v2303_v33, %v1844_v12 }
 0x13d   :  { %v2284_v45 = vpop.eup %2283  ;;  %v1621_v36 = vsel %vm1619_vm4, %v1620_v55, %v3462_v29  ;;  %v1848_v27 = vshrl.u32 %v2303_v33, %v1845_v15  ;;  %v1851_v20 = vshrl.u32 %v2304_v35, %v1845_v15  ;;  %v1853_v25 = vshll.u32 %v2304_v35, %v1844_v12 }
 0x13e   :  { %v2286_v58 = vpop.eup %2285  ;;  %v1125_v19 = vxor.u32 2147483648, %v2284_v45  ;;  %v1377_v28 = vmul.f32 %v1376_v60, %v1374_v5  ;;  %v1622_v24 = vadd.s32 %v1621_v36, %v1617_v14  ;;  %v1856_v63 = vshll.u32 %v2305_v37, %v1844_v12 }
 0x13f   :  { %v1122_v6 = vxor.u32 2147483648, %v2286_v58  ;;  %v1849_v3 = vor.u32 %v1848_v27, %v1847_v18  ;;  %v1854_v33 = vshrl.u32 %v2305_v37, %v1845_v15  ;;  %v1852_v56 = vor.u32 %v1851_v20, %v1850_v30 }
 0x140   :  { %v1126_v16 = vsel %vm1124_vm3, %v1125_v19, %v2286_v58  ;;  %v1378_v9 = vxor.u32 2147483648, %v1377_v28  ;;  %v1623_v21 = vadd.s32 536870912, %v1622_v24  ;;  %v1857_v61 = vshrl.u32 %v2306_v39, %v1845_v15 }
 0x141   :  { %v1123_v42 = vsel %vm1121_vm2, %v2284_v45, %v1122_v6  ;;  %v1859_v38 = vshll.u32 %v2306_v39, %v1844_v12  ;;  %v1860_v10 = vshrl.u32 %v2307_v46, %v1845_v15  ;;  %v1380_v37 = vsub.s32 4, %v3408_v2 }
 0x142   :  { %v1127_v23 = vsel %vm1120_vm15, %v1123_v42, %v1126_v16  ;;  %v1379_v51 = vsel %vm1296_vm1, %v1378_v9, %v1377_v28  ;;  %v3504_v44 = vshrl.u32 %v1623_v21, 30  ;;  %v1858_v7 = vor.u32 %v1857_v61, %v1856_v63 }
 0x143   :  { %v1128_v35 = vsel %vm1118_vm14, nan, %v1127_v23  ;;  %v1382_v32 = vsel %vm3472_vm0, %v3241_v43, %v1379_v51  ;;  %vm1862_vm5 = vcmp.lt.s32.totalorder %v1843_v1, 1  ;;  %v1855_v22 = vor.u32 %v1854_v33, %v1853_v25 }
 0x144   :  { %1136 = vperm.xlu1 %2236, %v1128_v35   ;;  %2287 = vcosq.f32 %v1382_v32  ;;  %v1625_v39 = vshll.u32 %v3504_v44, 30  ;;  %v1861_v41 = vor.u32 %v1860_v10, %v1859_v38  ;;  %vm1864_vm9 = vcmp.lt.s32.totalorder %v1843_v1, 3 }
 0x145   :  { %2289 = vsinq.f32 %v1382_v32  ;;  %vm1865_vm10 = vcmp.lt.s32.totalorder %v1843_v1, 4  ;;  %v1846_v46 = vshrl.u32 %v2302_v31, %v1845_v15  ;;  %vm1863_vm6 = vcmp.lt.s32.totalorder %v1843_v1, 2 }
 0x146   :  { %v1626_v47 = vsub.s32 %v1622_v24, %v1625_v39  ;;  %v1870_v49 = vsel %vm1862_vm5, %v1849_v3, %v1852_v56  ;;  %v1381_v40 = vsel %vm1296_vm1, %v1380_v37, %v3408_v2  ;;  %v1867_v53 = vsel %vm1865_vm10, %v1855_v22, 2102212464 }
 0x147   :  { %v1871_v8 = vsel %vm1865_vm10, %v1858_v7, 920167782  ;;  %v1878_v29 = vshll.u32 %v1838_v48, 8  ;;  %v1874_v13 = vsel %vm1862_vm5, %v1852_v56, %v1855_v22  ;;  %v1875_v12 = vsel %vm1865_vm10, %v1861_v41, 1326507024 }
 0x148   :  { %v1628_v50 = vsub.s32 0, %v1626_v47  ;;  %v1872_v59 = vsel %vm1864_vm9, %v1855_v22, %v1871_v8  ;;  %v1383_v31 = vsel %vm3472_vm0, 0, %v1381_v40  ;;  %v1866_v60 = vsel %vm1862_vm5, %v1846_v46, %v1849_v3 }
 0x149   :  { %v1873_v57 = vsel %vm1863_vm6, %v1870_v49, %v1872_v59  ;;  %v1868_v14 = vsel %vm1864_vm9, %v1852_v56, %v1867_v53  ;;  %v1876_v2 = vsel %vm1864_vm9, %v1858_v7, %v1875_v12  ;;  %v1387_v5 = vand.u32 3, %v1383_v31 }
 0x14a   :  { %v2086_v34 = vmin.u32 %v1628_v50, %v1626_v47  ;;  %v3525_v55 = vmul.u32.u64.low %v1878_v29, %v1873_v57  ;;  %v3526_v15 = vmul.u32.u64.high %v1878_v29, %v1873_v57, %v3525_v55  ;;  %v1877_v45 = vsel %vm1863_vm6, %v1874_v13, %v1876_v2 }
 0x14b   :  { %v1869_v48 = vsel %vm1863_vm6, %v1866_v60, %v1868_v14  ;;  %v3530_v58 = vmul.u32.u64.low %v1878_v29, %v1877_v45  ;;  %v3531_v19 = vmul.u32.u64.high %v1878_v29, %v1877_v45, %v3530_v58  ;;  %v1618_v27 = vadd.s32 %v3461_v0, %v3467_v26 }
 0x14c   :  { %v1630_v18 = vclz %v2086_v34  ;;  %v1888_v36 = vadd.s32 1, %v3526_v15  ;;  %v1885_v30 = vmul.u32 %v1878_v29, %v1869_v48  ;;  %vm1389_vm11 = vcmp.eq.s32.totalorder %v1387_v5, 0 }
 0x14d   :  { %vm1392_vm12 = vcmp.eq.s32.totalorder %v1387_v5, 2  ;;  %vm1887_vm13 = vc.u32 %v3531_v19, %v3525_v55  ;;  %vm1386_vm8 = vweird.f32 %v3241_v43  ;;  %vm1388_vm14 = vcmp.lt.s32.totalorder %v1387_v5, 2 }
 0x14e   :  { %v2087_v11 = vadd.s32 4294967294, %v1630_v18  ;;  %v1889_v63 = vsel %vm1887_vm13, %v1888_v36, %v3526_v15  ;;  %vm1564_vm15 = vcmp.lt.s32.totalorder %v3365_v52, 0  ;;  %vm3543_vm0 = vcmp.le.f32.partialorder %v1562_v54, 0.7853982 }
 0x14f   :  { %v1890_v9 = vadd.s32 %v1889_v63, %v1885_v30  ;;  %v1648_v49 = vsub.s32 4, %v3504_v44  ;;  %v1886_v54 = vadd.s32 %v3525_v55, %v3531_v19  ;;  %vm1654_vm5 = vweird.f32 %v3365_v52 }
 0x150   :  { %vm2088_vm7 = vcmp.lt.s32.totalorder %v2087_v11, 0  ;;  %vm1832_vm9 = vcmp.lt.s32.totalorder %v3383_v17, 0  ;;  %vm1831_vm10 = vcmp.le.f32.partialorder %v1830_v4, 0.7853982  ;;  %vm1973_vm13 = vcmask 261120  }
 0x151   :  { %v2288_v6 = vpop.eup %2287  ;;  %v1633_v28 = vsel %vm2088_vm7, 0, %v2087_v11  ;;  %v1891_v61 = vadd.s32 536870912, %v1890_v9  ;;  %v1649_v29 = vsel %vm1564_vm15, %v1648_v49, %v3504_v44 }
 0x152   :  { %v2290_v24 = vpop.eup %2289  ;;  %v1393_v1 = vxor.u32 2147483648, %v2288_v6  ;;  %v1634_v20 = vsub.s32 32, %v1633_v28  ;;  %v1635_v16 = vshll.u32 %v1626_v47, %v1633_v28  ;;  %v1638_v3 = vsub.s32 4294967266, %v1633_v28 }
 0x153   :  { %v1390_v25 = vxor.u32 2147483648, %v2290_v24  ;;  %v1892_v10 = vshrl.u32 %v1891_v61, 30  ;;  %v1651_v59 = vsel %vm3543_vm0, 0, %v1649_v29 }
 0x154   :  { %v1394_v0 = vsel %vm1392_vm12, %v1393_v1, %v2290_v24  ;;  %v1636_v26 = vshrl.u32 %v1618_v27, %v1634_v20  ;;  %v1639_v42 = vadd.s32 127, %v1638_v3  ;;  %v1655_v60 = vand.u32 3, %v1651_v59 }
 0x155   :  { %v1391_v21 = vsel %vm1389_vm11, %v2288_v6, %v1390_v25  ;;  %v1893_v37 = vshll.u32 %v1892_v10, 30  ;;  %v1916_v28 = vsub.s32 4, %v1892_v10  ;;  %vm1922_vm12 = vweird.f32 %v3383_v17 }
 0x156   :  { %v1395_v33 = vsel %vm1388_vm14, %v1391_v21, %v1394_v0  ;;  %v1637_v23 = vor.u32 %v1636_v26, %v1635_v16  ;;  %v1640_v56 = vshll.u32 %v1639_v42, 23  ;;  %vm1660_vm2 = vcmp.eq.s32.totalorder %v1655_v60, 2  ;;  %v596_v16 = vpop.permute.xlu0 %595 }
 0x157   :  { %v1396_v38 = vsel %vm1386_vm8, nan, %v1395_v33  ;;  %v1894_v7 = vsub.s32 %v1890_v9, %v1893_v37  ;;  %vm1657_vm3 = vcmp.eq.s32.totalorder %v1655_v60, 0  ;;  %vm1656_vm4 = vcmp.lt.s32.totalorder %v1655_v60, 2 }
 0x158   :  { %1404 = vperm.xlu1 %2236, %v1396_v38   ;;  %v1641_v35 = vor.u32 4788187, %v1640_v56  ;;  %v1644_v51 = vcvt.s32.f32 %v1637_v23  ;;  %v1917_v1 = vsel %vm1832_vm9, %v1916_v28, %v1892_v10  ;;  %v2038_v23 = vld [vmem:[%s3593_s5] ss:$0 sm:$0xff] }
 0x159   :  { %v1896_v41 = vsub.s32 0, %v1894_v7 }
 0x15a   :  { %v1642_v43 = vand.u32 2147483647, %v1641_v35  ;;  %v864_v26 = vpop.permute.xlu0 %863 }
 0x15b   :  { %v2096_v46 = vmin.u32 %v1896_v41, %v1894_v7 }
 0x15c   :  { %v1645_v32 = vmul.f32 %v1644_v51, %v1642_v43 }
 0x15d   :  { %v1898_v53 = vclz %v2096_v46 }
 0x15e   :  { %v1646_v22 = vxor.u32 2147483648, %v1645_v32  ;;  %v106_v9 = vpop.f32.mrf.mxu0  ;;  %v380_v21 = vpop.f32.mrf.mxu1 }
 0x15f   :  { %v2097_v8 = vadd.s32 4294967294, %v1898_v53  ;;  %v601_v20 = vpop.permute.xlu1 %600  ;;  %v603_v43 = vmul.f32 %v596_v16, %v380_v21 }
 0x160   :  { %v1647_v47 = vsel %vm1564_vm15, %v1646_v22, %v1645_v32  ;;  %v2124_v38 = vpop.f32.mrf.mxu0  ;;  %v2130_v35 = vpop.f32.mrf.mxu1 }
 0x161   :  { %v1650_v40 = vsel %vm3543_vm0, %v3365_v52, %v1647_v47  ;;  %vm2098_vm1 = vcmp.lt.s32.totalorder %v2097_v8, 0  ;;  %v1919_v52 = vsel %vm1831_vm10, 0, %v1917_v1 }
 0x162   :  { %2291 = vcosq.f32 %v1650_v40  ;;  %v1901_v50 = vsel %vm2098_vm1, 0, %v2097_v8  ;;  %v1923_v3 = vand.u32 3, %v1919_v52  ;;  %v383_v41 = vpop.f32.mrf.mxu1  ;;  %v2237_v8 = vld [vmem:[%s3594_s6 + $0x8] sm:$0xff]  }
 0x163   :  { %2293 = vsinq.f32 %v1650_v40  ;;  %v1902_v57 = vsub.s32 32, %v1901_v50  ;;  %v1903_v13 = vshll.u32 %v1894_v7, %v1901_v50  ;;  %v1906_v12 = vsub.s32 4294967266, %v1901_v50  ;;  %v109_v7 = vpop.f32.mrf.mxu0  ;;  %2163 = vmatpush3.bf16.msra.mxu1 %v2237_v8 }
 0x164   :  { %vm1928_vm6 = vcmp.eq.s32.totalorder %v1923_v3, 2  ;;  %vm1925_vm7 = vcmp.eq.s32.totalorder %v1923_v3, 0  ;;  %vm1924_vm11 = vcmp.lt.s32.totalorder %v1923_v3, 2  ;;  %v604_v49 = vmul.f32 %v601_v20, %v383_v41  ;;  %v2131_v40 = vpop.f32.mrf.mxu1  ;;  %2164 = vmatprep.subr.bf16.mxu1 %v2308_v62 }
 0x165   :  { %v1904_v31 = vshrl.u32 %v1886_v54, %v1902_v57  ;;  %v1907_v34 = vadd.s32 127, %v1906_v12  ;;  %v2125_v47 = vpop.f32.mrf.mxu0  ;;  %v2238_v57 = vld [vmem:[%s3594_s6] sm:$0xff]  }
 0x166   :  { %v914_v50 = vpop.f32.mrf.mxu1 }
 0x167   :  { %v1905_v14 = vor.u32 %v1904_v31, %v1903_v13  ;;  %v1908_v2 = vshll.u32 %v1907_v34, 23  ;;  %v646_v53 = vpop.f32.mrf.mxu0  ;;  %2165 = vmatpush3.bf16.msra.mxu1 %v2238_v57 }
 0x168   :  { %v871_v54 = vmul.f32 %v864_v26, %v646_v53  ;;  %v2142_v31 = vpop.f32.mrf.mxu1 }
 0x169   :  { %v1909_v15 = vor.u32 4788187, %v1908_v2  ;;  %v1912_v18 = vcvt.s32.f32 %v1905_v14  ;;  %v2136_v59 = vpop.f32.mrf.mxu0 }
 0x16a   :  { %v917_v2 = vpop.f32.mrf.mxu1 }
 0x16b   :  { %v1910_v5 = vand.u32 2147483647, %v1909_v15  ;;  %v649_v60 = vpop.f32.mrf.mxu0 }
 0x16d   :  { %v1913_v19 = vmul.f32 %v1912_v18, %v1910_v5  ;;  %v2137_v15 = vpop.f32.mrf.mxu0  ;;  %v2143_v18 = vpop.f32.mrf.mxu1 }
 0x16f   :  { %v2292_v45 = vpop.eup %2291  ;;  %v1914_v27 = vxor.u32 2147483648, %v1913_v19 }
 0x170   :  { %v2294_v44 = vpop.eup %2293  ;;  %v1661_v55 = vxor.u32 2147483648, %v2292_v45 }
 0x171   :  { %v1658_v48 = vxor.u32 2147483648, %v2294_v44  ;;  %v1915_v6 = vsel %vm1832_vm9, %v1914_v27, %v1913_v19 }
 0x172   :  { %v1662_v58 = vsel %vm1660_vm2, %v1661_v55, %v2294_v44  ;;  %v1918_v24 = vsel %vm1831_vm10, %v3383_v17, %v1915_v6  ;;  %v1132_v17 = vpop.permute.xlu0 %1131  ;;  %v1450_v55 = vpop.f32.mrf.mxu1 }
 0x173   :  { %v1659_v11 = vsel %vm1657_vm3, %v2292_v45, %v1658_v48  ;;  %2295 = vcosq.f32 %v1918_v24  ;;  %v1139_v12 = vmul.f32 %v1132_v17, %v914_v50  ;;  %v1182_v45 = vpop.f32.mrf.mxu0 }
 0x174   :  { %v1663_v36 = vsel %vm1656_vm4, %v1659_v11, %v1662_v58  ;;  %2297 = vsinq.f32 %v1918_v24  ;;  %v324_v63 = vpop.permute.xlu1 %323  ;;  %v2154_v11 = vpop.f32.mrf.mxu1 }
 0x175   :  { %v1664_v30 = vsel %vm1654_vm5, nan, %v1663_v36  ;;  %v331_v56 = vmul.f32 %v324_v63, %v106_v9  ;;  %v2148_v48 = vpop.f32.mrf.mxu0 }
 0x176   :  { %1672 = vperm.xlu1 %2236, %v1664_v30   ;;  %v1400_v34 = vpop.permute.xlu0 %1399  ;;  %v1453_v30 = vpop.f32.mrf.mxu1 }
 0x177   :  { %v339_v10 = vadd.f32 %v2038_v23, %v331_v56  ;;  %v1407_v44 = vmul.f32 %v1400_v34, %v1182_v45  ;;  %v1185_v36 = vpop.f32.mrf.mxu0 }
 0x178   :  { %v2155_v62 = vpop.f32.mrf.mxu1 }
 0x179   :  { %v605_v39 = vadd.f32 %v603_v43, %v339_v10  ;;  %v2149_v6 = vpop.f32.mrf.mxu0 }
 0x17a   :  { %v1668_v5 = vpop.permute.xlu0 %1667 }
 0x17b   :  { %v873_v13 = vadd.f32 %v871_v54, %v605_v39  ;;  %v1675_v19 = vmul.f32 %v1668_v5, %v1450_v55  ;;  %v1718_v24 = vpop.f32.mrf.mxu0  ;;  %v2018_v39 = vld [vmem:[%s3596_s2] sm:$0xff] }
 0x17d   :  { %v1141_v14 = vadd.f32 %v1139_v12, %v873_v13  ;;  %v2160_v52 = vpop.f32.mrf.mxu0 }
 0x17e   :  { %v1936_v28 = vpop.permute.xlu0 %1935 }
 0x17f   :  { %v1409_v58 = vadd.f32 %v1407_v44, %v1141_v14  ;;  %v1943_v1 = vmul.f32 %v1936_v28, %v1718_v24  ;;  %v1721_v16 = vpop.f32.mrf.mxu0 }
 0x180   :  { %v2296_v25 = vpop.eup %2295 }
 0x181   :  { %v2298_v0 = vpop.eup %2297  ;;  %v1929_v4 = vxor.u32 2147483648, %v2296_v25  ;;  %v1677_v27 = vadd.f32 %v1675_v19, %v1409_v58  ;;  %v2161_v3 = vpop.f32.mrf.mxu0 }
 0x182   :  { %v1926_v42 = vxor.u32 2147483648, %v2298_v0 }
 0x183   :  { %v1930_v33 = vsel %vm1928_vm6, %v1929_v4, %v2298_v0  ;;  %v1945_v20 = vadd.f32 %v1943_v1, %v1677_v27 }
 0x184   :  { %v1927_v61 = vsel %vm1925_vm7, %v2296_v25, %v1926_v42 }
 0x185   :  { %v1931_v51 = vsel %vm1924_vm11, %v1927_v61, %v1930_v33  ;;  %v1947_v10 = vmax.f32 %v1945_v20, 0.0 }
 0x186   :  { %v1932_v37 = vsel %vm1922_vm12, nan, %v1931_v51 }
 0x187   :  { %1940 = vperm.xlu1 %2236, %v1932_v37  }
 0x18b   :  { %v329_v32 = vpop.permute.xlu1 %328 }
 0x18c   :  { %v332_v22 = vmul.f32 %v329_v32, %v109_v7  ;;  %v2099_v32 = vld [vmem:[%s3595_s7] ss:$0 sm:$0xff] }
 0x18e   :  { %v340_v46 = vadd.f32 %v2038_v23, %v332_v22 }
 0x190   :  { %v606_v29 = vadd.f32 %v604_v49, %v340_v46  ;;  %v2019_v46 = vld [vmem:[%s3596_s2 + $0x8] sm:$0xff] }
 0x1a6   :  { %v869_v25 = vpop.permute.xlu1 %868 }
 0x1a7   :  { %v872_v63 = vmul.f32 %v869_v25, %v649_v60 }
 0x1a9   :  { %v874_v0 = vadd.f32 %v872_v63, %v606_v29 }
 0x1bf   :  { %v1137_v26 = vpop.permute.xlu1 %1136 }
 0x1c0   :  { %v1140_v4 = vmul.f32 %v1137_v26, %v917_v2 }
 0x1c2   :  { %v1142_v42 = vadd.f32 %v1140_v4, %v874_v0 }
 0x1d3   :  { %v1405_v9 = vpop.permute.xlu1 %1404 }
 0x1d4   :  { %v1408_v21 = vmul.f32 %v1405_v9, %v1185_v36 }
 0x1d6   :  { %v1410_v33 = vadd.f32 %v1408_v21, %v1142_v42 }
 0x1f1   :  { %v1673_v23 = vpop.permute.xlu1 %1672 }
 0x1f2   :  { %v1676_v56 = vmul.f32 %v1673_v23, %v1453_v30 }
 0x1f4   :  { %v1678_v38 = vadd.f32 %v1676_v56, %v1410_v33 }
 0x202   :  { %v1941_v61 = vpop.permute.xlu1 %1940 }
 0x203   :  { %v1944_v35 = vmul.f32 %v1941_v61, %v1721_v16 }
 0x205   :  { %v1946_v51 = vadd.f32 %v1944_v35, %v1678_v38 }
 0x207   :  { %v1948_v43 = vmax.f32 %v1946_v51, 0.0 }
 0x209   :  { %v1949_v37 = vpack.c.bf16 %v1948_v43, %v1947_v10 }
 0x20b   :  { %2167 = vmatmul.mubr.msk.bf16.vlgmr.msra.gmra.mxu1 %vm1973_vm13, %v1949_v37 }
 0x2cb   :  { %v2011_v7 = vpop.f32.mrf.mxu1 }
 0x2cc   :  { %v2012_v22 = vadd.f32 %v2099_v32, %v2011_v7 }
 0x2cd   :  { %v2168_v41 = vpop.f32.mrf.mxu1 }
 0x2ce   :  { %v2020_v17 = vmul.f32 %v2018_v39, %v2012_v22 }
 0x2cf   :  { %v2014_v47 = vpop.f32.mrf.mxu1 }
 0x2d0   :  { %2022 = vst.msk [vmem:[%s3597_s8] sm:$0xff] %vm1973_vm13, %v2020_v17  ;;  %v2015_v49 = vadd.f32 %v2099_v32, %v2014_v47 }
 0x2d1   :  { %v2169_v40 = vpop.f32.mrf.mxu1 }
 0x2d2   :  { %v2021_v53 = vmul.f32 %v2019_v46, %v2015_v49 }
 0x2d4   :  { %2023 = vst.msk [vmem:[%s3597_s8 + $0x8] sm:$0xff] %vm1973_vm13, %v2021_v53 }

// kernel: graphbp_forward.9
= control target key start
LH: loop header
LB: loop body
LE: loop exit
PB: predicated region body
PF: predicated region fallthrough
CT: control target
= control target key end

     0   :  { %s1649_s0 = inlined_call_operand.vmem [shape: f32[2], index: 0, kind: input, shape index: {}]   ;;  %s1650_s1 = inlined_call_operand.vmem [shape: f32[8,4], index: 1, kind: input, shape index: {}]   ;;  %s1651_s2 = inlined_call_operand.vmem [shape: bf16[8,32], index: 2, kind: input, shape index: {}]   ;;  %s1652_s3 = inlined_call_operand.vmem [shape: bf16[32,64], index: 3, kind: input, shape index: {}]   ;;  %s1653_s4 = inlined_call_operand.vmem [shape: f32[1,64], index: 4, kind: input, shape index: {}]   ;;  %s1654_s5 = inlined_call_operand.vmem [shape: bf16[2,64,4], index: 5, kind: input, shape index: {}]   ;;  %s1655_s6 = inlined_call_operand.vmem [shape: f32[2,1,4], index: 6, kind: input, shape index: {}]   ;;  %s1656_s7 = inlined_call_operand.vmem [shape: bf16[2,64,4], index: 7, kind: input, shape index: {}]   ;;  %s1657_s8 = inlined_call_operand.vmem [shape: f32[2,1,4], index: 8, kind: input, shape index: {}]   ;;  %s1658_s9 = inlined_call_operand.vmem [shape: f32[2], index: 9, kind: input, shape index: {}]   ;;  %s1659_s10 = inlined_call_operand.vmem [shape: f32[8,1], index: 10, kind: input, shape index: {}]   ;;  %s1660_s11 = inlined_call_operand.vmem [shape: bf16[8,32], index: 11, kind: input, shape index: {}]   ;;  %s1661_s12 = inlined_call_operand.vmem [shape: bf16[32,64], index: 12, kind: input, shape index: {}]   ;;  %s1662_s13 = inlined_call_operand.vmem [shape: f32[1,64], index: 13, kind: input, shape index: {}]   ;;  %s1663_s14 = inlined_call_operand.vmem [shape: bf16[2,64,1], index: 14, kind: input, shape index: {}]   ;;  %s1664_s15 = inlined_call_operand.vmem [shape: f32[2,1,1], index: 15, kind: input, shape index: {}]   ;;  %s1665_s16 = inlined_call_operand.vmem [shape: bf16[2,64,1], index: 16, kind: input, shape index: {}]   ;;  %s1666_s17 = inlined_call_operand.vmem [shape: f32[2,1,1], index: 17, kind: input, shape index: {}]   ;;  %s1667_s18 = inlined_call_operand.vmem [shape: f32[8,4], index: 18, kind: output, shape index: {0}]   ;;  %s1668_s19 = inlined_call_operand.vmem [shape: f32[8,4], index: 19, kind: output, shape index: {1}]   ;;  %s1669_s20 = inlined_call_operand.vmem [shape: f32[8,1], index: 20, kind: output, shape index: {2}]   ;;  %s1670_s21 = inlined_call_operand.vmem [shape: f32[8,1], index: 21, kind: output, shape index: {3}]  }
   0x1   :  { %1673 = sst [smem:[#allocation8_spill]] %s1649_s0 }
   0x2   :  { %1674 = sst [smem:[#allocation9_spill]] %s1650_s1 }
   0x3   :  { %1675 = sst [smem:[#allocation10_spill]] %s1651_s2 }
   0x4   :  { %1676 = sst [smem:[#allocation11_spill]] %s1652_s3 }
   0x5   :  { %1677 = sst [smem:[#allocation12_spill]] %s1653_s4 }
   0x6   :  { %1678 = sst [smem:[#allocation13_spill]] %s1654_s5 }
   0x7   :  { %27 = vsyncpa [#allocation3], 0  ;;  %s1679_s26 = sld [smem:[#allocation8_spill]] }
   0xd   :  { %s35_s27 = sshll.u32 %s1679_s26, 4  ;;  %s36_s27 = int_to_ptr.vmem [resolvable:$true] %s35_s27 }
   0xe   :  { %28 = vsyncpa [#allocation5], 0  ;;  %s61_s29 = sshll.u32 %s1658_s9, 4  ;;  %s1271_s0 = scalar_lea.vmem %s36_s27, 16  ;;  %s62_s29 = int_to_ptr.vmem [resolvable:$true] %s61_s29 }
   0xf   :  { %p1272_p0 = scmp.ne.s32.totalorder %s36_s27, %s1271_s0  ;;  %p1276_p1 = scmp.lt.s32.totalorder %s36_s27, %s36_s27 }
  0x10   :  { %p1277_p2 = scmp.lt.s32.totalorder %s1271_s0, %s1271_s0 }
  0x12   :  { %p1278_p3 = por %p1277_p2, %p1276_p1 }
  0x14   :  { %p1279_p4 = pnand %p1278_p3, %p1272_p0 }
  0x16   :  { %1282 = shalt.err (!%p1279_p4)
}
  0x17   :  { %s1299_s4 = smov [#allocation2]   ;;  %s1283_s30 = scalar_lea.vmem %s62_s29, 16 }
  0x18   :  { %38 = dma.vmem_to_smem %s36_s27, 16, %s1299_s4, [#allocation3]  }
  0x19   :  { %p1284_p5 = scmp.ne.s32.totalorder %s62_s29, %s1283_s30  ;;  %p1288_p6 = scmp.lt.s32.totalorder %s62_s29, %s62_s29 }
  0x1a   :  { %p1289_p7 = scmp.lt.s32.totalorder %s1283_s30, %s1283_s30 }
  0x1c   :  { %p1290_p8 = por %p1289_p7, %p1288_p6 }
  0x1e   :  { %p1291_p9 = pnand %p1290_p8, %p1284_p5 }
  0x20   :  { %1294 = shalt.err (!%p1291_p9)
}
  0x21   :  { %s1300_s5 = smov [#allocation4]  }
  0x22   :  { %64 = dma.vmem_to_smem %s62_s29, 16, %s1300_s5, [#allocation5]  }
  0x23   :  { %1295 = dma.done.wait [#allocation3], 16  }
  0x24   :  { %1296 = vsyncadd [#allocation3], 4294967280 }
  0x25   :  { %1297 = dma.done.wait [#allocation5], 16  }
  0x26   :  { %1298 = vsyncadd [#allocation5], 4294967280 }
  0x27   :  { %87 = sfence }
  0x28   :  { %s1680_s23 = sld [smem:[#allocation11_spill]]  ;;  %v1301_v1 = vmov 0.0   ;;  %vm1302_vm0 = vmmov 0   ;;  %vm108_vm1 = vcmask 261120   ;;  %v1210_v5 = vld [vmem:[%s1656_s7 + $0x18] sm:$0xff]   ;;  %v1212_v7 = vld [vmem:[%s1656_s7 + $0x10] sm:$0xff]  }
  0x29   :  { %1091 = vmatprep.subr.bf16.mxu0 %v1301_v1  ;;  %1099 = vmatprep.subr.bf16.mxu1 %v1301_v1  ;;  %s1681_s26 = sld [smem:[#allocation10_spill]]  ;;  %v1214_v9 = vld [vmem:[%s1656_s7 + $0x8] sm:$0xff]   ;;  %v1216_v11 = vld [vmem:[%s1656_s7] sm:$0xff]   ;;  %vm200_vm2 = vcmask 523264   ;;  %v1218_v20 = vld [vmem:[%s1656_s7 + $0x38] sm:$0xff]   ;;  %vm509_vm3 = vcmask 31744  }
  0x2a   :  { %1095 = vmatprep.mubr.msk.bf16.mxu0 %vm1302_vm0, %v1301_v1  ;;  %1107 = vmatprep.mubr.msk.bf16.mxu1 %vm1302_vm0, %v1301_v1  ;;  %s1682_s28 = sld [smem:[#allocation13_spill]]  ;;  %v1220_v23 = vld [vmem:[%s1656_s7 + $0x30] sm:$0xff]   ;;  %v1222_v25 = vld [vmem:[%s1656_s7 + $0x28] sm:$0xff]   ;;  %v1224_v27 = vld [vmem:[%s1656_s7 + $0x20] sm:$0xff]   ;;  %vm930_vm4 = vcmask 7168  }
  0x2b   :  { %s1683_s0 = sld [smem:[#allocation12_spill]]  ;;  %v1225_v28 = vld [vmem:[%s1661_s12 + $0x8] sm:$0xff]   ;;  %v1226_v29 = vld [vmem:[%s1661_s12] sm:$0xff]   ;;  %v1227_v31 = vld [vmem:[%s1663_s14 + $0x18] sm:$0xff]  }
  0x2c   :  { %v514_v30 = vld [vmem:[%s1660_s11] sm:$0xf]  ;;  %v1228_v32 = vld [vmem:[%s1665_s16 + $0x18] sm:$0xff]   ;;  %v1229_v33 = vld [vmem:[%s1663_s14 + $0x10] sm:$0xff]   ;;  %s323_s22 = sld [smem:[#allocation2]] }
  0x2d   :  { %v1230_v34 = vld [vmem:[%s1665_s16 + $0x10] sm:$0xff]   ;;  %v1231_v35 = vld [vmem:[%s1663_s14 + $0x8] sm:$0xff]   ;;  %v1233_v37 = vld [vmem:[%s1663_s14] sm:$0xff]   ;;  %s997_s1 = sld [smem:[#allocation2 + $0x1]] }
  0x2e   :  { %v1207_v0 = vld [vmem:[%s1680_s23 + $0x8] sm:$0xff]   ;;  %v1208_v2 = vld [vmem:[%s1680_s23] sm:$0xff]  }
  0x2f   :  { %1092 = vmatpush3.bf16.msra.mxu0 %v1207_v0  ;;  %v91_v3 = vld [vmem:[%s1681_s26] sm:$0xf]  ;;  %v1232_v36 = vld [vmem:[%s1665_s16 + $0x8] sm:$0xff]   ;;  %s1684_s26 = sld [smem:[#allocation9_spill]] }
  0x30   :  { %1093 = vmatprep.subr.bf16.mxu0 %v1301_v1  ;;  %v1209_v4 = vld [vmem:[%s1682_s28 + $0x18] sm:$0xff]   ;;  %v1211_v6 = vld [vmem:[%s1682_s28 + $0x10] sm:$0xff]   ;;  %v1213_v8 = vld [vmem:[%s1682_s28 + $0x8] sm:$0xff]  }
  0x31   :  { %1100 = vmatpush3.bf16.msra.mxu1 %v1209_v4  ;;  %v1215_v10 = vld [vmem:[%s1682_s28] sm:$0xff]   ;;  %v1217_v19 = vld [vmem:[%s1682_s28 + $0x38] sm:$0xff]   ;;  %v1219_v22 = vld [vmem:[%s1682_s28 + $0x30] sm:$0xff]  }
  0x32   :  { %1101 = vmatprep.subr.bf16.mxu1 %v1301_v1  ;;  %v954_v12 = vld [vmem:[%s1683_s0] ss:$0 sm:$0xff]  ;;  %v1221_v24 = vld [vmem:[%s1682_s28 + $0x28] sm:$0xff]   ;;  %v976_v49 = vld [vmem:[%s1655_s6 + $0x1] ss:$0 sm:$0xff]  ;;  %v325_v54 = vstv %s323_s22 }
  0x33   :  { %1094 = vmatpush3.bf16.msra.mxu0 %v1208_v2  ;;  %v1223_v26 = vld [vmem:[%s1682_s28 + $0x20] sm:$0xff]  }
  0x34   :  { %1111 = vmatprep.subr.bf16.mxu0 %v1301_v1  ;;  %v1234_v38 = vld [vmem:[%s1665_s16] sm:$0xff]  }
  0x35   :  { %1102 = vmatpush3.bf16.msra.mxu1 %v1211_v6  ;;  %v955_v39 = vld [vmem:[%s1655_s6] ss:$0 sm:$0xff] }
  0x36   :  { %1096 = vmatmul.mubr.msk.bf16.vlgmr.msra.gmra.mxu0 %vm108_vm1, %v91_v3  ;;  %1103 = vmatprep.subr.bf16.mxu1 %v1301_v1  ;;  %v1001_v62 = vld [vmem:[%s1662_s13] ss:$0 sm:$0xff] }
  0x37   :  { %1119 = vmatprep.mubr.msk.bf16.mxu0 %vm1302_vm0, %v1301_v1  ;;  %1112 = vmatpush3.bf16.msra.mxu0 %v1210_v5  ;;  %v499_v5 = vstv %s997_s1 }
  0x38   :  { %1113 = vmatprep.subr.bf16.mxu0 %v1301_v1 }
  0x39   :  { %1104 = vmatpush3.bf16.msra.mxu1 %v1213_v8 }
  0x3a   :  { %1105 = vmatprep.subr.bf16.mxu1 %v1301_v1 }
  0x3b   :  { %1114 = vmatpush3.bf16.msra.mxu0 %v1212_v7 }
  0x3c   :  { %1115 = vmatprep.subr.bf16.mxu0 %v1301_v1 }
  0x3d   :  { %1106 = vmatpush3.bf16.msra.mxu1 %v1215_v10  ;;  %v961_v10 = vld [vmem:[%s1657_s8] ss:$0 sm:$0xff] }
  0x3e   :  { %1123 = vmatprep.subr.bf16.mxu1 %v1301_v1 }
  0x3f   :  { %1116 = vmatpush3.bf16.msra.mxu0 %v1214_v9 }
  0x40   :  { %1117 = vmatprep.subr.bf16.mxu0 %v1301_v1 }
  0x43   :  { %1118 = vmatpush3.bf16.msra.mxu0 %v1216_v11 }
  0x44   :  { %1135 = vmatprep.subr.bf16.mxu0 %v1301_v1 }
  0xf6   :  { %v146_v13 = vpop.f32.mrf.mxu0 }
  0xf7   :  { %v158_v14 = vadd.f32 %v954_v12, %v146_v13  ;;  %v89_v13 = vld [vmem:[%s1684_s26] sm:$0xff]  ;;  %s744_s26 = sld [smem:[#allocation4]] }
  0xf8   :  { %v1097_v15 = vpop.f32.mrf.mxu0 }
  0xf9   :  { %1243 = vtanh.f32 %v158_v14  ;;  %v1235_v14 = vld [vmem:[%s1663_s14 + $0x38] sm:$0xff]  }
  0xfa   :  { %v149_v16 = vpop.f32.mrf.mxu0  ;;  %v1236_v15 = vld [vmem:[%s1665_s16 + $0x38] sm:$0xff]  }
  0xfc   :  { %v1098_v17 = vpop.f32.mrf.mxu0 }
 0x106   :  { %v1244_v18 = vpop.eup %1243 }
 0x107   :  { %v160_v21 = vpack.c.bf16 %v1244_v18, %v1244_v18 }
 0x109   :  { %1108 = vmatmul.mubr.msk.bf16.vlgmr.msra.gmra.mxu1 %vm200_vm2, %v160_v21  ;;  %1120 = vmatmul.mubr.msk.bf16.vlgmr.msra.gmra.mxu0 %vm200_vm2, %v160_v21 }
 0x10a   :  { %1124 = vmatpush3.bf16.msra.mxu1 %v1217_v19  ;;  %1136 = vmatpush3.bf16.msra.mxu0 %v1218_v20  ;;  %v991_v19 = vld [vmem:[%s1657_s8 + $0x1] ss:$0 sm:$0xff]  ;;  %v1237_v20 = vld [vmem:[%s1663_s14 + $0x30] sm:$0xff]  }
 0x10b   :  { %1125 = vmatprep.subr.bf16.mxu1 %v1301_v1  ;;  %1137 = vmatprep.subr.bf16.mxu0 %v1301_v1 }
 0x10c   :  { %1131 = vmatprep.mubr.msk.bf16.mxu1 %vm1302_vm0, %v1301_v1  ;;  %1143 = vmatprep.mubr.msk.bf16.mxu0 %vm1302_vm0, %v1301_v1 }
 0x10e   :  { %1126 = vmatpush3.bf16.msra.mxu1 %v1219_v22  ;;  %1138 = vmatpush3.bf16.msra.mxu0 %v1220_v23 }
 0x10f   :  { %1127 = vmatprep.subr.bf16.mxu1 %v1301_v1  ;;  %1139 = vmatprep.subr.bf16.mxu0 %v1301_v1 }
 0x112   :  { %1128 = vmatpush3.bf16.msra.mxu1 %v1221_v24  ;;  %1140 = vmatpush3.bf16.msra.mxu0 %v1222_v25  ;;  %v1239_v25 = vld [vmem:[%s1663_s14 + $0x28] sm:$0xff]  }
 0x113   :  { %1129 = vmatprep.subr.bf16.mxu1 %v1301_v1  ;;  %1141 = vmatprep.subr.bf16.mxu0 %v1301_v1 }
 0x116   :  { %1130 = vmatpush3.bf16.msra.mxu1 %v1223_v26  ;;  %1142 = vmatpush3.bf16.msra.mxu0 %v1224_v27  ;;  %v1240_v26 = vld [vmem:[%s1665_s16 + $0x28] sm:$0xff]  }
 0x117   :  { %1147 = vmatprep.subr.bf16.mxu1 %v1301_v1  ;;  %1155 = vmatprep.subr.bf16.mxu0 %v1301_v1 }
 0x119   :  { %1132 = vmatmul.mubr.msk.bf16.vlgmr.msra.gmra.mxu1 %vm200_vm2, %v160_v21  ;;  %1144 = vmatmul.mubr.msk.bf16.vlgmr.msra.gmra.mxu0 %vm200_vm2, %v160_v21  ;;  %v1238_v21 = vld [vmem:[%s1665_s16 + $0x30] sm:$0xff]  }
 0x11a   :  { %1148 = vmatpush3.bf16.msra.mxu1 %v1225_v28  ;;  %1151 = vmatprep.mubr.msk.bf16.mxu1 %vm1302_vm0, %v1301_v1 }
 0x11b   :  { %1149 = vmatprep.subr.bf16.mxu1 %v1301_v1  ;;  %1163 = vmatprep.mubr.msk.bf16.mxu0 %vm1302_vm0, %v1301_v1 }
 0x11c   :  { %1156 = vmatpush3.bf16.msra.mxu0 %v1227_v31  ;;  %v1241_v31 = vld [vmem:[%s1663_s14 + $0x20] sm:$0xff]  }
 0x11d   :  { %1157 = vmatprep.subr.bf16.mxu0 %v1301_v1 }
 0x11e   :  { %1150 = vmatpush3.bf16.msra.mxu1 %v1226_v29 }
 0x11f   :  { %1167 = vmatprep.subr.bf16.mxu1 %v1301_v1 }
 0x120   :  { %1158 = vmatpush3.bf16.msra.mxu0 %v1229_v33 }
 0x121   :  { %1152 = vmatmul.mubr.msk.bf16.vlgmr.msra.gmra.mxu1 %vm108_vm1, %v514_v30  ;;  %1159 = vmatprep.subr.bf16.mxu0 %v1301_v1 }
 0x122   :  { %1175 = vmatprep.mubr.msk.bf16.mxu1 %vm1302_vm0, %v1301_v1  ;;  %1168 = vmatpush3.bf16.msra.mxu1 %v1228_v32  ;;  %v1242_v32 = vld [vmem:[%s1665_s16 + $0x20] sm:$0xff]  }
 0x123   :  { %1169 = vmatprep.subr.bf16.mxu1 %v1301_v1 }
 0x124   :  { %1160 = vmatpush3.bf16.msra.mxu0 %v1231_v35 }
 0x125   :  { %1161 = vmatprep.subr.bf16.mxu0 %v1301_v1 }
 0x126   :  { %1170 = vmatpush3.bf16.msra.mxu1 %v1230_v34 }
 0x127   :  { %1171 = vmatprep.subr.bf16.mxu1 %v1301_v1 }
 0x128   :  { %1162 = vmatpush3.bf16.msra.mxu0 %v1233_v37 }
 0x129   :  { %1179 = vmatprep.subr.bf16.mxu0 %v1301_v1 }
 0x12a   :  { %1172 = vmatpush3.bf16.msra.mxu1 %v1232_v36 }
 0x12b   :  { %1173 = vmatprep.subr.bf16.mxu1 %v1301_v1 }
 0x12e   :  { %1174 = vmatpush3.bf16.msra.mxu1 %v1234_v38 }
 0x12f   :  { %1191 = vmatprep.subr.bf16.mxu1 %v1301_v1 }
 0x1c9   :  { %v238_v40 = vpop.f32.mrf.mxu1  ;;  %v317_v41 = vpop.f32.mrf.mxu0 }
 0x1ca   :  { %v239_v42 = vadd.f32 %v955_v39, %v238_v40  ;;  %v318_v11 = vadd.f32 %v961_v10, %v317_v41 }
 0x1cb   :  { %v1109_v43 = vpop.f32.mrf.mxu1  ;;  %v1121_v44 = vpop.f32.mrf.mxu0 }
 0x1cc   :  { %1245 = vtanh.f32 %v239_v42  ;;  %v329_v18 = vadd.f32 %v318_v11, %v89_v13 }
 0x1cd   :  { %v241_v45 = vpop.f32.mrf.mxu1  ;;  %v320_v46 = vpop.f32.mrf.mxu0 }
 0x1cf   :  { %v1110_v47 = vpop.f32.mrf.mxu1  ;;  %v1122_v48 = vpop.f32.mrf.mxu0 }
 0x1d0   :  { %v1023_v47 = vld [vmem:[%s1664_s15 + $0x1] ss:$0 sm:$0xff] }
 0x1d9   :  { %v410_v50 = vpop.f32.mrf.mxu1  ;;  %v491_v51 = vpop.f32.mrf.mxu0 }
 0x1da   :  { %v411_v52 = vadd.f32 %v976_v49, %v410_v50  ;;  %v1246_v53 = vpop.eup %1245  ;;  %v492_v24 = vadd.f32 %v991_v19, %v491_v51 }
 0x1db   :  { %v1133_v55 = vpop.f32.mrf.mxu1  ;;  %v1145_v56 = vpop.f32.mrf.mxu0  ;;  %v326_v59 = vmul.f32 %v1246_v53, %v325_v54 }
 0x1dc   :  { %1247 = vtanh.f32 %v411_v52  ;;  %v746_v52 = vstv %s744_s26 }
 0x1dd   :  { %v413_v57 = vpop.f32.mrf.mxu1  ;;  %v494_v58 = vpop.f32.mrf.mxu0  ;;  %v327_v0 = vmul.f32 1.442695, %v326_v59 }
 0x1df   :  { %v1134_v60 = vpop.f32.mrf.mxu1  ;;  %v1146_v61 = vpop.f32.mrf.mxu0 }
 0x1e1   :  { %v568_v63 = vpop.f32.mrf.mxu1 }
 0x1e2   :  { %v580_v2 = vadd.f32 %v1001_v62, %v568_v63 }
 0x1e3   :  { %v1153_v3 = vpop.f32.mrf.mxu1 }
 0x1e4   :  { %1249 = vtanh.f32 %v580_v2  ;;  %v1008_v2 = vld [vmem:[%s1666_s17] ss:$0 sm:$0xff] }
 0x1e5   :  { %v571_v4 = vpop.f32.mrf.mxu1  ;;  %1251 = vpow2.f32 %v327_v0 }
 0x1e6   :  { %v512_v4 = vld [vmem:[%s1659_s10] sm:$0xff] }
 0x1e7   :  { %v1154_v6 = vpop.f32.mrf.mxu1 }
 0x1e9   :  { %v1248_v7 = vpop.eup %1247 }
 0x1ea   :  { %v500_v8 = vmul.f32 %v1248_v7, %v499_v5  ;;  %v1038_v7 = vld [vmem:[%s1666_s17 + $0x1] ss:$0 sm:$0xff] }
 0x1ec   :  { %v501_v9 = vmul.f32 1.442695, %v500_v8 }
 0x1ee   :  { %1253 = vpow2.f32 %v501_v9 }
 0x1f1   :  { %v1250_v12 = vpop.eup %1249 }
 0x1f2   :  { %v582_v16 = vpack.c.bf16 %v1250_v12, %v1250_v12  ;;  %v1252_v17 = vpop.eup %1251 }
 0x1f3   :  { %v330_v22 = vmul.f32 %v1252_v17, %v329_v18  ;;  %v331_v23 = vadd.f32 1e-20, %v1252_v17 }
 0x1f4   :  { %1164 = vmatmul.mubr.msk.bf16.vlgmr.msra.gmra.mxu0 %vm200_vm2, %v582_v16  ;;  %1176 = vmatmul.mubr.msk.bf16.vlgmr.msra.gmra.mxu1 %vm200_vm2, %v582_v16 }
 0x1f5   :  { %1180 = vmatpush3.bf16.msra.mxu0 %v1235_v14  ;;  %1192 = vmatpush3.bf16.msra.mxu1 %v1236_v15  ;;  %v503_v27 = vadd.f32 %v492_v24, %v330_v22  ;;  %1255 = vlog2.f32 %v331_v23 }
 0x1f6   :  { %1181 = vmatprep.subr.bf16.mxu0 %v1301_v1  ;;  %1193 = vmatprep.subr.bf16.mxu1 %v1301_v1 }
 0x1f7   :  { %1187 = vmatprep.mubr.msk.bf16.mxu0 %vm1302_vm0, %v1301_v1  ;;  %1199 = vmatprep.mubr.msk.bf16.mxu1 %vm1302_vm0, %v1301_v1 }
 0x1f9   :  { %1182 = vmatpush3.bf16.msra.mxu0 %v1237_v20  ;;  %1194 = vmatpush3.bf16.msra.mxu1 %v1238_v21 }
 0x1fa   :  { %1183 = vmatprep.subr.bf16.mxu0 %v1301_v1  ;;  %1195 = vmatprep.subr.bf16.mxu1 %v1301_v1 }
 0x1fb   :  { %v1254_v28 = vpop.eup %1253 }
 0x1fc   :  { %v504_v29 = vmul.f32 %v1254_v28, %v503_v27  ;;  %v505_v30 = vadd.f32 1e-20, %v1254_v28 }
 0x1fd   :  { %1184 = vmatpush3.bf16.msra.mxu0 %v1239_v25  ;;  %1196 = vmatpush3.bf16.msra.mxu1 %v1240_v26 }
 0x1fe   :  { %1257 = vlog2.f32 %v505_v30  ;;  %510 = vst.msk [vmem:[%s1667_s18] sm:$0xff] %vm509_vm3, %v504_v29  ;;  %1185 = vmatprep.subr.bf16.mxu0 %v1301_v1  ;;  %1197 = vmatprep.subr.bf16.mxu1 %v1301_v1  ;;  %v1002_v1 = vld [vmem:[%s1664_s15] ss:$0 sm:$0xff] }
 0x201   :  { %1186 = vmatpush3.bf16.msra.mxu0 %v1241_v31  ;;  %1198 = vmatpush3.bf16.msra.mxu1 %v1242_v32 }
 0x202   :  { %v1256_v33 = vpop.eup %1255 }
 0x203   :  { %v333_v35 = vmul.f32 0.6931472, %v1256_v33 }
 0x204   :  { %1188 = vmatmul.mubr.msk.bf16.vlgmr.msra.gmra.mxu0 %vm200_vm2, %v582_v16  ;;  %1200 = vmatmul.mubr.msk.bf16.vlgmr.msra.gmra.mxu1 %vm200_vm2, %v582_v16 }
 0x20b   :  { %v1258_v34 = vpop.eup %1257 }
 0x20c   :  { %v507_v36 = vmul.f32 0.6931472, %v1258_v34 }
 0x20e   :  { %v508_v37 = vadd.f32 %v507_v36, %v333_v35 }
 0x210   :  { %511 = vst.msk [vmem:[%s1668_s19] sm:$0xff] %vm509_vm3, %v508_v37  ;;  %s1044_s19 = sld [smem:[#allocation4 + $0x1]] }
 0x216   :  { %v920_v61 = vstv %s1044_s19 }
 0x2b4   :  { %v659_v38 = vpop.f32.mrf.mxu0  ;;  %v738_v39 = vpop.f32.mrf.mxu1 }
 0x2b5   :  { %v660_v40 = vadd.f32 %v1002_v1, %v659_v38  ;;  %v739_v3 = vadd.f32 %v1008_v2, %v738_v39 }
 0x2b6   :  { %v1165_v41 = vpop.f32.mrf.mxu0  ;;  %v1177_v42 = vpop.f32.mrf.mxu1 }
 0x2b7   :  { %1259 = vtanh.f32 %v660_v40  ;;  %v750_v6 = vadd.f32 %v739_v3, %v512_v4 }
 0x2b8   :  { %v662_v43 = vpop.f32.mrf.mxu0  ;;  %v741_v44 = vpop.f32.mrf.mxu1 }
 0x2ba   :  { %v1166_v45 = vpop.f32.mrf.mxu0  ;;  %v1178_v46 = vpop.f32.mrf.mxu1 }
 0x2c4   :  { %v831_v48 = vpop.f32.mrf.mxu0  ;;  %v912_v49 = vpop.f32.mrf.mxu1 }
 0x2c5   :  { %v832_v50 = vadd.f32 %v1023_v47, %v831_v48  ;;  %v1260_v51 = vpop.eup %1259  ;;  %v913_v10 = vadd.f32 %v1038_v7, %v912_v49 }
 0x2c6   :  { %v1189_v53 = vpop.f32.mrf.mxu0  ;;  %v1201_v54 = vpop.f32.mrf.mxu1  ;;  %v747_v57 = vmul.f32 %v1260_v51, %v746_v52 }
 0x2c7   :  { %1261 = vtanh.f32 %v832_v50 }
 0x2c8   :  { %v834_v55 = vpop.f32.mrf.mxu0  ;;  %v915_v56 = vpop.f32.mrf.mxu1  ;;  %v748_v60 = vmul.f32 1.442695, %v747_v57 }
 0x2ca   :  { %v1190_v58 = vpop.f32.mrf.mxu0  ;;  %v1202_v59 = vpop.f32.mrf.mxu1  ;;  %1263 = vpow2.f32 %v748_v60 }
 0x2d4   :  { %v1262_v62 = vpop.eup %1261 }
 0x2d5   :  { %v921_v63 = vmul.f32 %v1262_v62, %v920_v61 }
 0x2d7   :  { %v922_v0 = vmul.f32 1.442695, %v921_v63  ;;  %v1264_v5 = vpop.eup %1263 }
 0x2d8   :  { %v751_v8 = vmul.f32 %v1264_v5, %v750_v6  ;;  %v752_v9 = vadd.f32 1e-20, %v1264_v5 }
 0x2d9   :  { %1265 = vpow2.f32 %v922_v0 }
 0x2da   :  { %v924_v11 = vadd.f32 %v913_v10, %v751_v8  ;;  %1267 = vlog2.f32 %v752_v9 }
 0x2e6   :  { %v1266_v12 = vpop.eup %1265 }
 0x2e7   :  { %v925_v13 = vmul.f32 %v1266_v12, %v924_v11  ;;  %v926_v14 = vadd.f32 1e-20, %v1266_v12  ;;  %v1268_v15 = vpop.eup %1267 }
 0x2e8   :  { %v754_v17 = vmul.f32 0.6931472, %v1268_v15 }
 0x2e9   :  { %1269 = vlog2.f32 %v926_v14  ;;  %931 = vst.msk [vmem:[%s1669_s20] sm:$0xff] %vm930_vm4, %v925_v13 }
 0x2f6   :  { %v1270_v16 = vpop.eup %1269 }
 0x2f7   :  { %v928_v18 = vmul.f32 0.6931472, %v1270_v16 }
 0x2f9   :  { %v929_v19 = vadd.f32 %v928_v18, %v754_v17 }
 0x2fb   :  { %932 = vst.msk [vmem:[%s1670_s21] sm:$0xff] %vm930_vm4, %v929_v19 }
 0x2fc   :  { %949 = vsyncpa [#allocation3], 1 }
 0x2fd   :  { %950 = vsyncpa [#allocation5], 1 }

// kernel: graphbp_forward.11
= control target key start
LH: loop header
LB: loop body
LE: loop exit
PB: predicated region body
PF: predicated region fallthrough
CT: control target
= control target key end

     0   :  { %20 = vsyncpa [#allocation3], 0  ;;  %s1044_s0 = inlined_call_operand.vmem [shape: f32[2], index: 0, kind: input, shape index: {}]   ;;  %s1045_s1 = inlined_call_operand.vmem [shape: f32[8,1], index: 1, kind: input, shape index: {}]   ;;  %s1046_s2 = inlined_call_operand.vmem [shape: bf16[8,32], index: 2, kind: input, shape index: {}]   ;;  %s1047_s3 = inlined_call_operand.vmem [shape: bf16[8,32], index: 3, kind: input, shape index: {}]   ;;  %s1048_s4 = inlined_call_operand.vmem [shape: bf16[8,32], index: 4, kind: input, shape index: {}]   ;;  %s1049_s5 = inlined_call_operand.vmem [shape: bf16[32,64], index: 5, kind: input, shape index: {}]   ;;  %s1050_s6 = inlined_call_operand.vmem [shape: bf16[32,64], index: 6, kind: input, shape index: {}]   ;;  %s1051_s7 = inlined_call_operand.vmem [shape: bf16[32,64], index: 7, kind: input, shape index: {}]   ;;  %s1052_s8 = inlined_call_operand.vmem [shape: f32[1,64], index: 8, kind: input, shape index: {}]   ;;  %s1053_s9 = inlined_call_operand.vmem [shape: bf16[2,64,1], index: 9, kind: input, shape index: {}]   ;;  %s1054_s10 = inlined_call_operand.vmem [shape: f32[2,1,1], index: 10, kind: input, shape index: {}]   ;;  %s1055_s11 = inlined_call_operand.vmem [shape: bf16[2,64,1], index: 11, kind: input, shape index: {}]   ;;  %s1056_s12 = inlined_call_operand.vmem [shape: f32[2,1,1], index: 12, kind: input, shape index: {}]   ;;  %s1057_s13 = inlined_call_operand.vmem [shape: f32[8,1], index: 13, kind: output, shape index: {0}]   ;;  %s1058_s14 = inlined_call_operand.vmem [shape: f32[8,1], index: 14, kind: output, shape index: {1}]  }
   0x1   :  { %s27_s15 = sshll.u32 %s1044_s0, 4  ;;  %s28_s15 = int_to_ptr.vmem [resolvable:$true] %s27_s15 }
   0x2   :  { %s807_s16 = scalar_lea.vmem %s28_s15, 16  ;;  %p812_p1 = scmp.lt.s32.totalorder %s28_s15, %s28_s15 }
   0x3   :  { %p808_p0 = scmp.ne.s32.totalorder %s28_s15, %s807_s16  ;;  %p813_p2 = scmp.lt.s32.totalorder %s807_s16, %s807_s16 }
   0x5   :  { %p814_p3 = por %p813_p2, %p812_p1 }
   0x7   :  { %p815_p4 = pnand %p814_p3, %p808_p0 }
   0x9   :  { %818 = shalt.err (!%p815_p4)
}
   0xa   :  { %s821_s17 = smov [#allocation2]  }
   0xb   :  { %30 = dma.vmem_to_smem %s28_s15, 16, %s821_s17, [#allocation3]  }
   0xc   :  { %819 = dma.done.wait [#allocation3], 16  }
   0xd   :  { %820 = vsyncadd [#allocation3], 4294967280 }
   0xe   :  { %58 = sfence }
   0xf   :  { %v771_v0 = vld [vmem:[%s1049_s5 + $0x8] sm:$0xff]   ;;  %v822_v1 = vmov 0.0   ;;  %v773_v3 = vld [vmem:[%s1049_s5] sm:$0xff]   ;;  %vm823_vm0 = vmmov 0   ;;  %vm79_vm1 = vcmask 261120   ;;  %v777_v10 = vld [vmem:[%s1053_s9 + $0x18] sm:$0xff]  }
  0x10   :  { %696 = vmatprep.subr.bf16.mxu0 %v822_v1  ;;  %704 = vmatprep.subr.bf16.mxu1 %v822_v1  ;;  %v772_v2 = vld [vmem:[%s1050_s6 + $0x8] sm:$0xff]   ;;  %v774_v4 = vld [vmem:[%s1050_s6] sm:$0xff]   ;;  %v778_v11 = vld [vmem:[%s1055_s11 + $0x18] sm:$0xff]   ;;  %vm293_vm2 = vcmask 523264   ;;  %s666_s25 = sld [smem:[#allocation2 + $0x1]]  ;;  %vm602_vm3 = vcmask 7168  }
  0x11   :  { %697 = vmatpush3.bf16.msra.mxu0 %v771_v0  ;;  %700 = vmatprep.mubr.msk.bf16.mxu0 %vm823_vm0, %v822_v1  ;;  %v62_v5 = vld [vmem:[%s1046_s2] sm:$0xf]  ;;  %v775_v6 = vld [vmem:[%s1051_s7 + $0x8] sm:$0xff]   ;;  %v779_v12 = vld [vmem:[%s1053_s9 + $0x10] sm:$0xff]  }
  0x12   :  { %705 = vmatpush3.bf16.msra.mxu1 %v772_v2  ;;  %698 = vmatprep.subr.bf16.mxu0 %v822_v1  ;;  %v130_v7 = vld [vmem:[%s1047_s3] sm:$0xf]  ;;  %v780_v13 = vld [vmem:[%s1055_s11 + $0x10] sm:$0xff]   ;;  %v781_v14 = vld [vmem:[%s1053_s9 + $0x8] sm:$0xff]  }
  0x13   :  { %706 = vmatprep.subr.bf16.mxu1 %v822_v1  ;;  %708 = vmatprep.mubr.msk.bf16.mxu1 %vm823_vm0, %v822_v1  ;;  %v776_v8 = vld [vmem:[%s1051_s7] sm:$0xff]   ;;  %v782_v15 = vld [vmem:[%s1055_s11 + $0x8] sm:$0xff]   ;;  %v785_v35 = vld [vmem:[%s1053_s9 + $0x38] sm:$0xff]  }
  0x14   :  { %v191_v9 = vld [vmem:[%s1048_s4] sm:$0xf]  ;;  %v786_v36 = vld [vmem:[%s1055_s11 + $0x38] sm:$0xff]   ;;  %v787_v38 = vld [vmem:[%s1053_s9 + $0x30] sm:$0xff]  }
  0x15   :  { %699 = vmatpush3.bf16.msra.mxu0 %v773_v3  ;;  %v783_v16 = vld [vmem:[%s1053_s9] sm:$0xff]   ;;  %v788_v39 = vld [vmem:[%s1055_s11 + $0x30] sm:$0xff]   ;;  %v789_v40 = vld [vmem:[%s1053_s9 + $0x28] sm:$0xff]  }
  0x16   :  { %707 = vmatpush3.bf16.msra.mxu1 %v774_v4  ;;  %712 = vmatprep.subr.bf16.mxu0 %v822_v1  ;;  %v784_v17 = vld [vmem:[%s1055_s11] sm:$0xff]   ;;  %v790_v41 = vld [vmem:[%s1055_s11 + $0x28] sm:$0xff]   ;;  %v592_v4 = vstv %s666_s25 }
  0x17   :  { %720 = vmatprep.subr.bf16.mxu1 %v822_v1  ;;  %v617_v18 = vld [vmem:[%s1052_s8] ss:$0 sm:$0xff]  ;;  %v645_v54 = vld [vmem:[%s1054_s10 + $0x1] ss:$0 sm:$0xff] }
  0x18   :  { %701 = vmatmul.mubr.msk.bf16.vlgmr.msra.gmra.mxu0 %vm79_vm1, %v62_v5  ;;  %v791_v42 = vld [vmem:[%s1053_s9 + $0x20] sm:$0xff]   ;;  %s416_s9 = sld [smem:[#allocation2]] }
  0x19   :  { %709 = vmatmul.mubr.msk.bf16.vlgmr.msra.gmra.mxu1 %vm79_vm1, %v130_v7  ;;  %713 = vmatpush3.bf16.msra.mxu0 %v775_v6  ;;  %v792_v43 = vld [vmem:[%s1055_s11 + $0x20] sm:$0xff]  }
  0x1a   :  { %714 = vmatprep.subr.bf16.mxu0 %v822_v1  ;;  %716 = vmatprep.mubr.msk.bf16.mxu0 %vm823_vm0, %v822_v1  ;;  %v624_v44 = vld [vmem:[%s1054_s10] ss:$0 sm:$0xff] }
  0x1b   :  { %728 = vmatprep.mubr.msk.bf16.mxu1 %vm823_vm0, %v822_v1  ;;  %721 = vmatpush3.bf16.msra.mxu1 %v777_v10  ;;  %v60_v10 = vld [vmem:[%s1045_s1] sm:$0xff] }
  0x1c   :  { %722 = vmatprep.subr.bf16.mxu1 %v822_v1 }
  0x1d   :  { %715 = vmatpush3.bf16.msra.mxu0 %v776_v8  ;;  %v630_v8 = vld [vmem:[%s1056_s12] ss:$0 sm:$0xff] }
  0x1e   :  { %732 = vmatprep.subr.bf16.mxu0 %v822_v1  ;;  %v418_v59 = vstv %s416_s9 }
  0x1f   :  { %723 = vmatpush3.bf16.msra.mxu1 %v779_v12 }
  0x20   :  { %717 = vmatmul.mubr.msk.bf16.vlgmr.msra.gmra.mxu0 %vm79_vm1, %v191_v9  ;;  %724 = vmatprep.subr.bf16.mxu1 %v822_v1 }
  0x21   :  { %740 = vmatprep.mubr.msk.bf16.mxu0 %vm823_vm0, %v822_v1  ;;  %733 = vmatpush3.bf16.msra.mxu0 %v778_v11 }
  0x22   :  { %734 = vmatprep.subr.bf16.mxu0 %v822_v1 }
  0x23   :  { %725 = vmatpush3.bf16.msra.mxu1 %v781_v14 }
  0x24   :  { %726 = vmatprep.subr.bf16.mxu1 %v822_v1 }
  0x25   :  { %735 = vmatpush3.bf16.msra.mxu0 %v780_v13  ;;  %v660_v13 = vld [vmem:[%s1056_s12 + $0x1] ss:$0 sm:$0xff] }
  0x26   :  { %736 = vmatprep.subr.bf16.mxu0 %v822_v1 }
  0x27   :  { %727 = vmatpush3.bf16.msra.mxu1 %v783_v16 }
  0x28   :  { %744 = vmatprep.subr.bf16.mxu1 %v822_v1 }
  0x29   :  { %737 = vmatpush3.bf16.msra.mxu0 %v782_v15 }
  0x2a   :  { %738 = vmatprep.subr.bf16.mxu0 %v822_v1 }
  0x2d   :  { %739 = vmatpush3.bf16.msra.mxu0 %v784_v17 }
  0x2e   :  { %756 = vmatprep.subr.bf16.mxu0 %v822_v1 }
  0xd8   :  { %v117_v19 = vpop.f32.mrf.mxu0 }
  0xd9   :  { %v184_v20 = vpop.f32.mrf.mxu1  ;;  %v129_v22 = vadd.f32 %v617_v18, %v117_v19 }
  0xda   :  { %v702_v21 = vpop.f32.mrf.mxu0 }
  0xdb   :  { %v710_v23 = vpop.f32.mrf.mxu1  ;;  %v190_v27 = vadd.f32 %v184_v20, %v129_v22 }
  0xdc   :  { %v120_v24 = vpop.f32.mrf.mxu0 }
  0xdd   :  { %v187_v25 = vpop.f32.mrf.mxu1 }
  0xde   :  { %v703_v26 = vpop.f32.mrf.mxu0 }
  0xdf   :  { %v711_v28 = vpop.f32.mrf.mxu1 }
  0xe0   :  { %v245_v29 = vpop.f32.mrf.mxu0 }
  0xe1   :  { %v251_v30 = vadd.f32 %v245_v29, %v190_v27 }
  0xe2   :  { %v718_v31 = vpop.f32.mrf.mxu0 }
  0xe3   :  { %793 = vtanh.f32 %v251_v30 }
  0xe4   :  { %v248_v32 = vpop.f32.mrf.mxu0 }
  0xe6   :  { %v719_v33 = vpop.f32.mrf.mxu0 }
  0xf0   :  { %v794_v34 = vpop.eup %793 }
  0xf1   :  { %v253_v37 = vpack.c.bf16 %v794_v34, %v794_v34 }
  0xf3   :  { %729 = vmatmul.mubr.msk.bf16.vlgmr.msra.gmra.mxu1 %vm293_vm2, %v253_v37  ;;  %741 = vmatmul.mubr.msk.bf16.vlgmr.msra.gmra.mxu0 %vm293_vm2, %v253_v37 }
  0xf4   :  { %745 = vmatpush3.bf16.msra.mxu1 %v785_v35  ;;  %757 = vmatpush3.bf16.msra.mxu0 %v786_v36 }
  0xf5   :  { %746 = vmatprep.subr.bf16.mxu1 %v822_v1  ;;  %758 = vmatprep.subr.bf16.mxu0 %v822_v1 }
  0xf6   :  { %752 = vmatprep.mubr.msk.bf16.mxu1 %vm823_vm0, %v822_v1  ;;  %764 = vmatprep.mubr.msk.bf16.mxu0 %vm823_vm0, %v822_v1 }
  0xf8   :  { %747 = vmatpush3.bf16.msra.mxu1 %v787_v38  ;;  %759 = vmatpush3.bf16.msra.mxu0 %v788_v39 }
  0xf9   :  { %748 = vmatprep.subr.bf16.mxu1 %v822_v1  ;;  %760 = vmatprep.subr.bf16.mxu0 %v822_v1 }
  0xfc   :  { %749 = vmatpush3.bf16.msra.mxu1 %v789_v40  ;;  %761 = vmatpush3.bf16.msra.mxu0 %v790_v41 }
  0xfd   :  { %750 = vmatprep.subr.bf16.mxu1 %v822_v1  ;;  %762 = vmatprep.subr.bf16.mxu0 %v822_v1 }
 0x100   :  { %751 = vmatpush3.bf16.msra.mxu1 %v791_v42  ;;  %763 = vmatpush3.bf16.msra.mxu0 %v792_v43 }
 0x103   :  { %753 = vmatmul.mubr.msk.bf16.vlgmr.msra.gmra.mxu1 %vm293_vm2, %v253_v37  ;;  %765 = vmatmul.mubr.msk.bf16.vlgmr.msra.gmra.mxu0 %vm293_vm2, %v253_v37 }
 0x1b3   :  { %v331_v45 = vpop.f32.mrf.mxu1  ;;  %v410_v46 = vpop.f32.mrf.mxu0 }
 0x1b4   :  { %v332_v47 = vadd.f32 %v624_v44, %v331_v45  ;;  %v411_v9 = vadd.f32 %v630_v8, %v410_v46 }
 0x1b5   :  { %v730_v48 = vpop.f32.mrf.mxu1  ;;  %v742_v49 = vpop.f32.mrf.mxu0 }
 0x1b6   :  { %795 = vtanh.f32 %v332_v47  ;;  %v422_v12 = vadd.f32 %v411_v9, %v60_v10 }
 0x1b7   :  { %v334_v50 = vpop.f32.mrf.mxu1  ;;  %v413_v51 = vpop.f32.mrf.mxu0 }
 0x1b9   :  { %v731_v52 = vpop.f32.mrf.mxu1  ;;  %v743_v53 = vpop.f32.mrf.mxu0 }
 0x1c3   :  { %v503_v55 = vpop.f32.mrf.mxu1  ;;  %v584_v56 = vpop.f32.mrf.mxu0 }
 0x1c4   :  { %v504_v57 = vadd.f32 %v645_v54, %v503_v55  ;;  %v796_v58 = vpop.eup %795  ;;  %v585_v16 = vadd.f32 %v660_v13, %v584_v56 }
 0x1c5   :  { %v754_v60 = vpop.f32.mrf.mxu1  ;;  %v766_v61 = vpop.f32.mrf.mxu0  ;;  %v419_v0 = vmul.f32 %v796_v58, %v418_v59 }
 0x1c6   :  { %797 = vtanh.f32 %v504_v57 }
 0x1c7   :  { %v506_v62 = vpop.f32.mrf.mxu1  ;;  %v587_v63 = vpop.f32.mrf.mxu0  ;;  %v420_v3 = vmul.f32 1.442695, %v419_v0 }
 0x1c9   :  { %v755_v1 = vpop.f32.mrf.mxu1  ;;  %v767_v2 = vpop.f32.mrf.mxu0  ;;  %799 = vpow2.f32 %v420_v3 }
 0x1d3   :  { %v798_v5 = vpop.eup %797 }
 0x1d4   :  { %v593_v6 = vmul.f32 %v798_v5, %v592_v4 }
 0x1d6   :  { %v594_v7 = vmul.f32 1.442695, %v593_v6  ;;  %v800_v11 = vpop.eup %799 }
 0x1d7   :  { %v423_v14 = vmul.f32 %v800_v11, %v422_v12  ;;  %v424_v15 = vadd.f32 1e-20, %v800_v11 }
 0x1d8   :  { %801 = vpow2.f32 %v594_v7 }
 0x1d9   :  { %v596_v17 = vadd.f32 %v585_v16, %v423_v14  ;;  %803 = vlog2.f32 %v424_v15 }
 0x1e5   :  { %v802_v18 = vpop.eup %801 }
 0x1e6   :  { %v597_v19 = vmul.f32 %v802_v18, %v596_v17  ;;  %v598_v20 = vadd.f32 1e-20, %v802_v18  ;;  %v804_v21 = vpop.eup %803 }
 0x1e7   :  { %v426_v23 = vmul.f32 0.6931472, %v804_v21 }
 0x1e8   :  { %805 = vlog2.f32 %v598_v20  ;;  %603 = vst.msk [vmem:[%s1057_s13] sm:$0xff] %vm602_vm3, %v597_v19 }
 0x1f5   :  { %v806_v22 = vpop.eup %805 }
 0x1f6   :  { %v600_v24 = vmul.f32 0.6931472, %v806_v22 }
 0x1f8   :  { %v601_v25 = vadd.f32 %v600_v24, %v426_v23 }
 0x1fa   :  { %604 = vst.msk [vmem:[%s1058_s14] sm:$0xff] %vm602_vm3, %v601_v25 }
 0x1fb   :  { %613 = vsyncpa [#allocation3], 1 }

</bundles_post_ra>
